<compile_context>
chip_gen: v6e
topology: v6e:2x2x1
jax: 0.10.0
libtpu: 0.0.40
codegen_flags: <defaults>
</compile_context>

<pallas_src>
import functools
import math

import jax
import jax.numpy as jnp
from jax.experimental import pallas as pl
from jax.experimental.pallas import tpu as pltpu

EPS = 1e-5  # nn.LayerNorm default eps


# ------------------------------ helpers ------------------------------------ #
def _vmem_limit_bytes():
    # ~75% of physical VMEM: ~48 MiB on v7x (64 MiB physical), ~96 MiB on
    # v5e/v6e (128 MiB physical).  Conservative fallback if the query fails.
    try:
        cap = int(pltpu.get_tpu_info().vmem_capacity_bytes)
        return max(32 * 1024 * 1024, min(int(cap * 0.75), 100 * 1024 * 1024))
    except Exception:  # pragma: no cover - hardware-info query unavailable
        return 48 * 1024 * 1024


def _const_spec(block_shape):
    # Inputs whose block index never changes: a single VMEM buffer is enough
    # (default double-buffering would waste VMEM for data that never moves).
    index_map = lambda b, l: (0,) * len(block_shape)
    try:
        return pl.BlockSpec(block_shape, index_map, pipeline_mode=pl.Buffered(1))
    except TypeError:  # older jax without pipeline_mode kwarg
        return pl.BlockSpec(block_shape, index_map)


def _layer_spec(block_shape):
    # Per-layer weight stacks: block index follows the depth grid axis so the
    # next layer's weights DMA while the current layer computes.
    return pl.BlockSpec(block_shape,
                        lambda b, l: (l,) + (0,) * (len(block_shape) - 1))


# ----------------------------- in-kernel math ------------------------------ #
def _layernorm(x, g, b):
    mu = jnp.mean(x, axis=-1, keepdims=True)
    xc = x - mu
    var = jnp.mean(xc * xc, axis=-1, keepdims=True)
    return xc * jax.lax.rsqrt(var + EPS) * g + b


def _gelu(x):
    # TODO(synk): tanh-approximate GELU (EUP tanh slot); torch nn.GELU defaults
    # to the exact erf form (~1e-3 max abs deviation per activation).
    c = math.sqrt(2.0 / math.pi)
    return 0.5 * x * (1.0 + jnp.tanh(c * (x + 0.044715 * x * x * x)))


# ------------------------------ fused ViT kernel ---------------------------- #
def vit_kernel(patches_ref, pw_ref, pb_ref, cls_ref, pos_ref,
               g1_ref, b1_ref, wq_ref, bq_ref, wk_ref, bk_ref, wv_ref, bv_ref,
               wo_ref, bo_ref, g2_ref, b2_ref, w1_ref, bm1_ref, w2_ref, bm2_ref,
               ng_ref, nb_ref, hw_ref, hb_ref,
               out_ref, tok_ref, *, num_heads, valid_s):
    layer = pl.program_id(1)
    bt, s_pad, e = tok_ref.shape
    n = patches_ref.shape[1]
    hd = e // num_heads
    rows = bt * s_pad
    scale = 1.0 / math.sqrt(hd)

    # ---- patch embedding: first depth step only; tokens then stay resident
    #      in the VMEM scratch across the whole depth loop ----
    @pl.when(layer == 0)
    def _():
        kdim = patches_ref.shape[2]
        proj = jnp.dot(patches_ref[...].reshape(bt * n, kdim), pw_ref[...],
                       preferred_element_type=jnp.float32) + pb_ref[...]
        proj = proj.reshape(bt, n, e) + pos_ref[1:n + 1, :]
        # pos folded into the stores (no read-back of the token block)
        tok_ref[:, 0:1, :] = jnp.broadcast_to(cls_ref[...] + pos_ref[0:1, :],
                                              (bt, 1, e))
        tok_ref[:, 1:n + 1, :] = proj
        if s_pad > n + 1:  # static: zero the sublane-padding rows
            tok_ref[:, n + 1:, :] = jnp.zeros((bt, s_pad - n - 1, e),
                                              jnp.float32)

    # ---- one pre-norm transformer encoder layer (runs every depth step) ----
    x = tok_ref[...].reshape(rows, e)                       # f32 residual rows
    h1 = _layernorm(x, g1_ref[0], b1_ref[0]).astype(jnp.bfloat16)
    q = jnp.dot(h1, wq_ref[0], preferred_element_type=jnp.float32) + bq_ref[0]
    k = jnp.dot(h1, wk_ref[0], preferred_element_type=jnp.float32) + bk_ref[0]
    v = jnp.dot(h1, wv_ref[0], preferred_element_type=jnp.float32) + bv_ref[0]
    q = (q * scale).astype(jnp.bfloat16)    # fold 1/sqrt(hd) into q once
    k = k.astype(jnp.bfloat16)
    v = v.astype(jnp.bfloat16)

    # head split once per layer over all Bt*S rows -> (H, rows, hd)
    qh = jnp.stack([q[:, h * hd:(h + 1) * hd] for h in range(num_heads)], axis=0)
    kh = jnp.stack([k[:, h * hd:(h + 1) * hd] for h in range(num_heads)], axis=0)
    vh = jnp.stack([v[:, h * hd:(h + 1) * hd] for h in range(num_heads)], axis=0)

    if s_pad > valid_s:  # static: mask the padded key columns out of softmax
        kmask = jax.lax.broadcasted_iota(jnp.int32, (1, 1, s_pad), 2) < valid_s
    else:
        kmask = None

    # attention per example (scores must not mix examples); heads batched on
    # the leading einsum axis (Mosaic-safe batched matmul form)
    per_ex = []
    for bi in range(bt):
        sl = slice(bi * s_pad, (bi + 1) * s_pad)
        qb, kb, vb = qh[:, sl, :], kh[:, sl, :], vh[:, sl, :]
        s = jnp.einsum('hqd,hkd->hqk', qb, kb,
                       preferred_element_type=jnp.float32)   # (H, S, S) f32
        if kmask is not None:
            s = jnp.where(kmask, s, -1e30)
        s = s - jnp.max(s, axis=-1, keepdims=True)
        p = jnp.exp(s)
        p = p * pl.reciprocal(jnp.sum(p, axis=-1, keepdims=True), approx=True)
        o = jnp.einsum('hqk,hkd->hqd', p.astype(jnp.bfloat16), vb,
                       preferred_element_type=jnp.float32)    # (H, S, hd) f32
        per_ex.append(jnp.concatenate([o[h] for h in range(num_heads)], axis=-1))
    o_all = jnp.concatenate(per_ex, axis=0)                   # (rows, E) f32

    attn = jnp.dot(o_all.astype(jnp.bfloat16), wo_ref[0],
                   preferred_element_type=jnp.float32) + bo_ref[0]
    x = x + attn                                # dropout == identity (eval)

    h2 = _layernorm(x, g2_ref[0], b2_ref[0]).astype(jnp.bfloat16)
    m = jnp.dot(h2, w1_ref[0], preferred_element_type=jnp.float32) + bm1_ref[0]
    m = _gelu(m)
    m = jnp.dot(m.astype(jnp.bfloat16), w2_ref[0],
                preferred_element_type=jnp.float32) + bm2_ref[0]
    x = x + m                                   # dropout == identity (eval)
    tok_ref[...] = x.reshape(bt, s_pad, e)

    # ---- final LayerNorm + classifier head, fused into the last depth step:
    #      only CLS rows are used, so the full token tensor never hits HBM ----
    @pl.when(layer == pl.num_programs(1) - 1)
    def _():
        cls_rows = x.reshape(bt, s_pad, e)[:, 0, :]           # (Bt, E)
        hc = _layernorm(cls_rows, ng_ref[...], nb_ref[...])
        out_ref[...] = jnp.dot(hc.astype(jnp.bfloat16), hw_ref[...],
                               preferred_element_type=jnp.float32) + hb_ref[...]


# -------------------------------- JAX glue ---------------------------------- #
def extract_patches(x, P):
    # NCHW -> (B, num_patches, C*P*P), flattened in (c, ph, pw) order so a
    # plain matmul with the flattened conv weight reproduces
    # Conv2d(kernel=stride=P).  Pure data movement: kept in XLA glue.
    B, C, H, W = x.shape
    x = x.reshape(B, C, H // P, P, W // P, P)
    x = x.transpose(0, 2, 4, 1, 3, 5)
    x = x.reshape(B, (H // P) * (W // P), C * P * P)
    return x.astype(jnp.bfloat16)


def vit_forward(params, x, *, patch_size, num_heads, batch_tile=8):
    patches = extract_patches(x, patch_size)                 # (B, N, K) bf16
    B, N, K = patches.shape
    E = params["proj_w"].shape[1]
    S_pad = params["pos"].shape[0]                            # padded seq len
    depth = params["wq"].shape[0]
    C = params["head_w"].shape[1]
    Hm = params["w1"].shape[2]

    bt = min(B, batch_tile)                                   # batch tile
    while B % bt:
        bt -= 1

    kernel = functools.partial(vit_kernel, num_heads=num_heads, valid_s=N + 1)

    in_specs = [
        pl.BlockSpec((bt, N, K), lambda b, l: (b, 0, 0)),     # patches (bf16)
        _const_spec((K, E)),                                  # proj weight (bf16)
        _const_spec((1, E)),                                  # proj bias
        _const_spec((1, E)),                                  # cls token
        _const_spec((S_pad, E)),                              # pos embedding (padded)
        _layer_spec((1, 1, E)), _layer_spec((1, 1, E)),       # ln1 gamma / beta
        _layer_spec((1, E, E)), _layer_spec((1, 1, E)),       # wq / bq
        _layer_spec((1, E, E)), _layer_spec((1, 1, E)),       # wk / bk
        _layer_spec((1, E, E)), _layer_spec((1, 1, E)),       # wv / bv
        _layer_spec((1, E, E)), _layer_spec((1, 1, E)),       # wo / bo
        _layer_spec((1, 1, E)), _layer_spec((1, 1, E)),       # ln2 gamma / beta
        _layer_spec((1, E, Hm)), _layer_spec((1, 1, Hm)),     # mlp w1 / b1
        _layer_spec((1, Hm, E)), _layer_spec((1, 1, E)),      # mlp w2 / b2
        _const_spec((1, E)), _const_spec((1, E)),             # final norm gamma/beta
        _const_spec((E, C)), _const_spec((1, C)),             # head weight / bias
    ]
    return pl.pallas_call(
        kernel,
        out_shape=jax.ShapeDtypeStruct((B, C), jnp.float32),
        grid_spec=pltpu.PrefetchScalarGridSpec(
            num_scalar_prefetch=0,
            grid=(B // bt, depth),
            in_specs=in_specs,
            out_specs=pl.BlockSpec((bt, C), lambda b, l: (b, 0)),
            scratch_shapes=[pltpu.VMEM((bt, S_pad, E), jnp.float32)]),
        compiler_params=pltpu.CompilerParams(
            dimension_semantics=("parallel", "arbitrary"),
            vmem_limit_bytes=_vmem_limit_bytes()),
    )(patches, params["proj_w"], params["proj_b"], params["cls"], params["pos"],
      params["g1"], params["b1"],
      params["wq"], params["bq"], params["wk"], params["bk"],
      params["wv"], params["bv"], params["wo"], params["bo"],
      params["g2"], params["b2"],
      params["w1"], params["bm1"], params["w2"], params["bm2"],
      params["norm_g"], params["norm_b"], params["head_w"], params["head_b"])


def init_params(key, *, img_size, patch_size, in_channels, num_classes,
                embed_dim, num_heads, depth, mlp_ratio):
    del num_heads
    N = (img_size // patch_size) ** 2
    S = N + 1
    S_pad = ((S + 7) // 8) * 8     # sublane-aligned token count (keys masked)
    K = in_channels * patch_size * patch_size
    Hm = int(embed_dim * mlp_ratio)
    E = embed_dim
    keys = iter(jax.random.split(key, 32))

    def rnd(shape, dtype=jnp.float32, scale=0.02):
        return (scale * jax.random.normal(next(keys), shape, jnp.float32)).astype(dtype)

    bf16 = jnp.bfloat16
    pos = jnp.zeros((S_pad, E), jnp.float32).at[:S].set(rnd((S, E)))
    return dict(
        proj_w=rnd((K, E), bf16),                  # flattened conv weight (transposed)
        proj_b=rnd((1, E)),
        cls=rnd((1, E)),
        pos=pos,
        g1=jnp.ones((depth, 1, E), jnp.float32),
        b1=jnp.zeros((depth, 1, E), jnp.float32),
        wq=rnd((depth, E, E), bf16), bq=rnd((depth, 1, E)),
        wk=rnd((depth, E, E), bf16), bk=rnd((depth, 1, E)),
        wv=rnd((depth, E, E), bf16), bv=rnd((depth, 1, E)),
        wo=rnd((depth, E, E), bf16), bo=rnd((depth, 1, E)),
        g2=jnp.ones((depth, 1, E), jnp.float32),
        b2=jnp.zeros((depth, 1, E), jnp.float32),
        w1=rnd((depth, E, Hm), bf16), bm1=rnd((depth, 1, Hm)),
        w2=rnd((depth, Hm, E), bf16), bm2=rnd((depth, 1, E)),
        norm_g=jnp.ones((1, E), jnp.float32),
        norm_b=jnp.zeros((1, E), jnp.float32),
        head_w=rnd((E, num_classes), bf16),
        head_b=rnd((1, num_classes)),
    )


# ----------------------------------- main ----------------------------------- #
if __name__ == "__main__":
    cfg = dict(img_size=16, patch_size=4, in_channels=3, num_classes=5,
               embed_dim=32, num_heads=4, depth=2, mlp_ratio=4.0)

    key = jax.random.PRNGKey(0)
    pkey, xkey = jax.random.split(key)
    params = init_params(pkey, **cfg)
    x = jax.random.normal(
        xkey, (2, cfg["in_channels"], cfg["img_size"], cfg["img_size"]),
        jnp.float32)

    out = vit_forward(params, x, patch_size=cfg["patch_size"],
                      num_heads=cfg["num_heads"])
    out = jax.block_until_ready(out)
    assert out.shape == (2, cfg["num_classes"]) and out.dtype == jnp.float32
    assert bool(jnp.all(jnp.isfinite(out)))
    # TODO(synk): dropout layers are modeled as identity (eval mode); training-mode
    # stochastic dropout is not reproduced here.
    print("KERNEL_OK")
</pallas_src>

<mosaic_0001>
module attributes {stable_mosaic.version = 11 : i64} {
  func.func @vit_kernel(%arg0: i32, %arg1: i32, %arg2: memref<2x16x48xbf16, #tpu.memory_space<vmem>>, %arg3: memref<48x32xbf16, #tpu.memory_space<vmem>>, %arg4: memref<1x32xf32, #tpu.memory_space<vmem>>, %arg5: memref<1x32xf32, #tpu.memory_space<vmem>>, %arg6: memref<24x32xf32, #tpu.memory_space<vmem>>, %arg7: memref<1x1x32xf32, #tpu.memory_space<vmem>>, %arg8: memref<1x1x32xf32, #tpu.memory_space<vmem>>, %arg9: memref<1x32x32xbf16, #tpu.memory_space<vmem>>, %arg10: memref<1x1x32xf32, #tpu.memory_space<vmem>>, %arg11: memref<1x32x32xbf16, #tpu.memory_space<vmem>>, %arg12: memref<1x1x32xf32, #tpu.memory_space<vmem>>, %arg13: memref<1x32x32xbf16, #tpu.memory_space<vmem>>, %arg14: memref<1x1x32xf32, #tpu.memory_space<vmem>>, %arg15: memref<1x32x32xbf16, #tpu.memory_space<vmem>>, %arg16: memref<1x1x32xf32, #tpu.memory_space<vmem>>, %arg17: memref<1x1x32xf32, #tpu.memory_space<vmem>>, %arg18: memref<1x1x32xf32, #tpu.memory_space<vmem>>, %arg19: memref<1x32x128xbf16, #tpu.memory_space<vmem>>, %arg20: memref<1x1x128xf32, #tpu.memory_space<vmem>>, %arg21: memref<1x128x32xbf16, #tpu.memory_space<vmem>>, %arg22: memref<1x1x32xf32, #tpu.memory_space<vmem>>, %arg23: memref<1x32xf32, #tpu.memory_space<vmem>>, %arg24: memref<1x32xf32, #tpu.memory_space<vmem>>, %arg25: memref<32x5xbf16, #tpu.memory_space<vmem>>, %arg26: memref<1x5xf32, #tpu.memory_space<vmem>>, %arg27: memref<2x5xf32, #tpu.memory_space<vmem>>, %arg28: memref<2x24x32xf32, #tpu.memory_space<vmem>>) attributes {dimension_semantics = [#tpu.dimension_semantics<parallel>, #tpu.dimension_semantics<arbitrary>], iteration_bounds = array<i64: 1, 2>, scalar_prefetch = 0 : i64, scratch_operands = 1 : i64, tpu.core_type = #tpu.core_type<tc>, window_params = [{transform_indices = @transform_0, window_bounds = array<i64: 2, 16, 48>}, {pipeline_mode = #tpu.pipeline_mode<synchronous>, transform_indices = @transform_1, window_bounds = array<i64: 48, 32>}, {pipeline_mode = #tpu.pipeline_mode<synchronous>, transform_indices = @transform_2, window_bounds = array<i64: 1, 32>}, {pipeline_mode = #tpu.pipeline_mode<synchronous>, transform_indices = @transform_3, window_bounds = array<i64: 1, 32>}, {pipeline_mode = #tpu.pipeline_mode<synchronous>, transform_indices = @transform_4, window_bounds = array<i64: 24, 32>}, {transform_indices = @transform_5, window_bounds = array<i64: 1, 1, 32>}, {transform_indices = @transform_6, window_bounds = array<i64: 1, 1, 32>}, {transform_indices = @transform_7, window_bounds = array<i64: 1, 32, 32>}, {transform_indices = @transform_8, window_bounds = array<i64: 1, 1, 32>}, {transform_indices = @transform_9, window_bounds = array<i64: 1, 32, 32>}, {transform_indices = @transform_10, window_bounds = array<i64: 1, 1, 32>}, {transform_indices = @transform_11, window_bounds = array<i64: 1, 32, 32>}, {transform_indices = @transform_12, window_bounds = array<i64: 1, 1, 32>}, {transform_indices = @transform_13, window_bounds = array<i64: 1, 32, 32>}, {transform_indices = @transform_14, window_bounds = array<i64: 1, 1, 32>}, {transform_indices = @transform_15, window_bounds = array<i64: 1, 1, 32>}, {transform_indices = @transform_16, window_bounds = array<i64: 1, 1, 32>}, {transform_indices = @transform_17, window_bounds = array<i64: 1, 32, 128>}, {transform_indices = @transform_18, window_bounds = array<i64: 1, 1, 128>}, {transform_indices = @transform_19, window_bounds = array<i64: 1, 128, 32>}, {transform_indices = @transform_20, window_bounds = array<i64: 1, 1, 32>}, {pipeline_mode = #tpu.pipeline_mode<synchronous>, transform_indices = @transform_21, window_bounds = array<i64: 1, 32>}, {pipeline_mode = #tpu.pipeline_mode<synchronous>, transform_indices = @transform_22, window_bounds = array<i64: 1, 32>}, {pipeline_mode = #tpu.pipeline_mode<synchronous>, transform_indices = @transform_23, window_bounds = array<i64: 32, 5>}, {pipeline_mode = #tpu.pipeline_mode<synchronous>, transform_indices = @transform_24, window_bounds = array<i64: 1, 5>}, {transform_indices = @transform_25, window_bounds = array<i64: 2, 5>}]} {
    %c0_i32 = arith.constant 0 : i32
    %0 = arith.cmpi eq, %arg1, %c0_i32 : i32
    %1 = arith.extui %0 : i1 to i32
    %c0_i32_0 = arith.constant 0 : i32
    %2 = arith.cmpi ne, %1, %c0_i32_0 : i32
    scf.if %2 {
      %c0_85 = arith.constant 0 : index
      %c0_86 = arith.constant 0 : index
      %c0_87 = arith.constant 0 : index
      %213 = vector.load %arg2[%c0_85, %c0_86, %c0_87] : memref<2x16x48xbf16, #tpu.memory_space<vmem>>, vector<2x16x48xbf16>
      %214 = vector.shape_cast %213 : vector<2x16x48xbf16> to vector<32x48xbf16>
      %c0_88 = arith.constant 0 : index
      %c0_89 = arith.constant 0 : index
      %215 = vector.load %arg3[%c0_88, %c0_89] : memref<48x32xbf16, #tpu.memory_space<vmem>>, vector<48x32xbf16>
      %cst_90 = arith.constant dense<0.000000e+00> : vector<32x32xf32>
      %216 = tpu.matmul %214, %215, %cst_90 {dimension_numbers = #tpu.dot_dimension_numbers<[1], [0], [0], [1], [0, 0, 1, 1], [], []>} : vector<32x48xbf16>, vector<48x32xbf16>, vector<32x32xf32> -> vector<32x32xf32>
      %c0_91 = arith.constant 0 : index
      %c0_92 = arith.constant 0 : index
      %217 = vector.load %arg4[%c0_91, %c0_92] : memref<1x32xf32, #tpu.memory_space<vmem>>, vector<1x32xf32>
      %218 = vector.broadcast %217 : vector<1x32xf32> to vector<32x32xf32>
      %219 = arith.addf %216, %218 : vector<32x32xf32>
      %220 = vector.shape_cast %219 : vector<32x32xf32> to vector<2x16x32xf32>
      %c1 = arith.constant 1 : index
      %c0_93 = arith.constant 0 : index
      %221 = vector.load %arg6[%c1, %c0_93] : memref<24x32xf32, #tpu.memory_space<vmem>>, vector<16x32xf32>
      %222 = vector.shape_cast %221 : vector<16x32xf32> to vector<1x16x32xf32>
      %223 = vector.broadcast %222 : vector<1x16x32xf32> to vector<2x16x32xf32>
      %224 = arith.addf %220, %223 : vector<2x16x32xf32>
      %c0_94 = arith.constant 0 : index
      %c0_95 = arith.constant 0 : index
      %225 = vector.load %arg5[%c0_94, %c0_95] : memref<1x32xf32, #tpu.memory_space<vmem>>, vector<1x32xf32>
      %c0_96 = arith.constant 0 : index
      %c0_97 = arith.constant 0 : index
      %226 = vector.load %arg6[%c0_96, %c0_97] : memref<24x32xf32, #tpu.memory_space<vmem>>, vector<1x32xf32>
      %227 = arith.addf %225, %226 : vector<1x32xf32>
      %228 = vector.shape_cast %227 : vector<1x32xf32> to vector<1x1x32xf32>
      %229 = vector.broadcast %228 : vector<1x1x32xf32> to vector<2x1x32xf32>
      %c0_98 = arith.constant 0 : index
      %c0_99 = arith.constant 0 : index
      %c0_100 = arith.constant 0 : index
      %230 = vector.load %arg28[%c0_98, %c0_99, %c0_100] : memref<2x24x32xf32, #tpu.memory_space<vmem>>, vector<2x1x32xf32>
      tpu.vector_store %arg28[%c0_98, %c0_99, %c0_100], %229 {strides = array<i32>} : memref<2x24x32xf32, #tpu.memory_space<vmem>>, vector<2x1x32xf32>,
      %c0_101 = arith.constant 0 : index
      %c1_102 = arith.constant 1 : index
      %c0_103 = arith.constant 0 : index
      %231 = vector.load %arg28[%c0_101, %c1_102, %c0_103] : memref<2x24x32xf32, #tpu.memory_space<vmem>>, vector<2x16x32xf32>
      tpu.vector_store %arg28[%c0_101, %c1_102, %c0_103], %224 {strides = array<i32>} : memref<2x24x32xf32, #tpu.memory_space<vmem>>, vector<2x16x32xf32>,
      %cst_104 = arith.constant 0.000000e+00 : f32
      %232 = vector.broadcast %cst_104 : f32 to vector<2x7x32xf32>
      %c0_105 = arith.constant 0 : index
      %c17 = arith.constant 17 : index
      %c0_106 = arith.constant 0 : index
      %233 = vector.load %arg28[%c0_105, %c17, %c0_106] : memref<2x24x32xf32, #tpu.memory_space<vmem>>, vector<2x7x32xf32>
      tpu.vector_store %arg28[%c0_105, %c17, %c0_106], %232 {strides = array<i32>} : memref<2x24x32xf32, #tpu.memory_space<vmem>>, vector<2x7x32xf32>,
    } else {
    }
    %c0 = arith.constant 0 : index
    %c0_1 = arith.constant 0 : index
    %c0_2 = arith.constant 0 : index
    %3 = vector.load %arg28[%c0, %c0_1, %c0_2] : memref<2x24x32xf32, #tpu.memory_space<vmem>>, vector<2x24x32xf32>
    %4 = vector.shape_cast %3 : vector<2x24x32xf32> to vector<48x32xf32>
    %c0_3 = arith.constant 0 : index
    %c0_4 = arith.constant 0 : index
    %c0_5 = arith.constant 0 : index
    %5 = vector.load %arg7[%c0_3, %c0_4, %c0_5] : memref<1x1x32xf32, #tpu.memory_space<vmem>>, vector<1x1x32xf32>
    %6 = vector.shape_cast %5 : vector<1x1x32xf32> to vector<1x32xf32>
    %c0_6 = arith.constant 0 : index
    %c0_7 = arith.constant 0 : index
    %c0_8 = arith.constant 0 : index
    %7 = vector.load %arg8[%c0_6, %c0_7, %c0_8] : memref<1x1x32xf32, #tpu.memory_space<vmem>>, vector<1x1x32xf32>
    %8 = vector.shape_cast %7 : vector<1x1x32xf32> to vector<1x32xf32>
    %cst = arith.constant dense<0.000000e+00> : vector<48xf32>
    %9 = vector.multi_reduction <add>, %4, %cst [1] : vector<48x32xf32> to vector<48xf32>
    %10 = vector.shape_cast %9 : vector<48xf32> to vector<48x1xf32>
    %cst_9 = arith.constant 3.200000e+01 : f32
    %11 = vector.broadcast %cst_9 : f32 to vector<48x1xf32>
    %12 = arith.divf %10, %11 : vector<48x1xf32>
    %13 = vector.broadcast %12 : vector<48x1xf32> to vector<48x32xf32>
    %14 = arith.subf %4, %13 : vector<48x32xf32>
    %15 = arith.mulf %14, %14 : vector<48x32xf32>
    %cst_10 = arith.constant dense<0.000000e+00> : vector<48xf32>
    %16 = vector.multi_reduction <add>, %15, %cst_10 [1] : vector<48x32xf32> to vector<48xf32>
    %17 = vector.shape_cast %16 : vector<48xf32> to vector<48x1xf32>
    %cst_11 = arith.constant 3.200000e+01 : f32
    %18 = vector.broadcast %cst_11 : f32 to vector<48x1xf32>
    %19 = arith.divf %17, %18 : vector<48x1xf32>
    %cst_12 = arith.constant 9.99999974E-6 : f32
    %20 = vector.broadcast %cst_12 : f32 to vector<48x1xf32>
    %21 = arith.addf %19, %20 : vector<48x1xf32>
    %22 = math.rsqrt %21 : vector<48x1xf32>
    %23 = vector.broadcast %22 : vector<48x1xf32> to vector<48x32xf32>
    %24 = arith.mulf %14, %23 : vector<48x32xf32>
    %25 = vector.broadcast %6 : vector<1x32xf32> to vector<48x32xf32>
    %26 = arith.mulf %24, %25 : vector<48x32xf32>
    %27 = vector.broadcast %8 : vector<1x32xf32> to vector<48x32xf32>
    %28 = arith.addf %26, %27 : vector<48x32xf32>
    %29 = arith.truncf %28 : vector<48x32xf32> to vector<48x32xbf16>
    %c0_13 = arith.constant 0 : index
    %c0_14 = arith.constant 0 : index
    %c0_15 = arith.constant 0 : index
    %30 = vector.load %arg9[%c0_13, %c0_14, %c0_15] : memref<1x32x32xbf16, #tpu.memory_space<vmem>>, vector<1x32x32xbf16>
    %31 = vector.shape_cast %30 : vector<1x32x32xbf16> to vector<32x32xbf16>
    %cst_16 = arith.constant dense<0.000000e+00> : vector<48x32xf32>
    %32 = tpu.matmul %29, %31, %cst_16 {dimension_numbers = #tpu.dot_dimension_numbers<[1], [0], [0], [1], [0, 0, 1, 1], [], []>} : vector<48x32xbf16>, vector<32x32xbf16>, vector<48x32xf32> -> vector<48x32xf32>
    %c0_17 = arith.constant 0 : index
    %c0_18 = arith.constant 0 : index
    %c0_19 = arith.constant 0 : index
    %33 = vector.load %arg10[%c0_17, %c0_18, %c0_19] : memref<1x1x32xf32, #tpu.memory_space<vmem>>, vector<1x1x32xf32>
    %34 = vector.shape_cast %33 : vector<1x1x32xf32> to vector<1x32xf32>
    %35 = vector.broadcast %34 : vector<1x32xf32> to vector<48x32xf32>
    %36 = arith.addf %32, %35 : vector<48x32xf32>
    %c0_20 = arith.constant 0 : index
    %c0_21 = arith.constant 0 : index
    %c0_22 = arith.constant 0 : index
    %37 = vector.load %arg11[%c0_20, %c0_21, %c0_22] : memref<1x32x32xbf16, #tpu.memory_space<vmem>>, vector<1x32x32xbf16>
    %38 = vector.shape_cast %37 : vector<1x32x32xbf16> to vector<32x32xbf16>
    %cst_23 = arith.constant dense<0.000000e+00> : vector<48x32xf32>
    %39 = tpu.matmul %29, %38, %cst_23 {dimension_numbers = #tpu.dot_dimension_numbers<[1], [0], [0], [1], [0, 0, 1, 1], [], []>} : vector<48x32xbf16>, vector<32x32xbf16>, vector<48x32xf32> -> vector<48x32xf32>
    %c0_24 = arith.constant 0 : index
    %c0_25 = arith.constant 0 : index
    %c0_26 = arith.constant 0 : index
    %40 = vector.load %arg12[%c0_24, %c0_25, %c0_26] : memref<1x1x32xf32, #tpu.memory_space<vmem>>, vector<1x1x32xf32>
    %41 = vector.shape_cast %40 : vector<1x1x32xf32> to vector<1x32xf32>
    %42 = vector.broadcast %41 : vector<1x32xf32> to vector<48x32xf32>
    %43 = arith.addf %39, %42 : vector<48x32xf32>
    %c0_27 = arith.constant 0 : index
    %c0_28 = arith.constant 0 : index
    %c0_29 = arith.constant 0 : index
    %44 = vector.load %arg13[%c0_27, %c0_28, %c0_29] : memref<1x32x32xbf16, #tpu.memory_space<vmem>>, vector<1x32x32xbf16>
    %45 = vector.shape_cast %44 : vector<1x32x32xbf16> to vector<32x32xbf16>
    %cst_30 = arith.constant dense<0.000000e+00> : vector<48x32xf32>
    %46 = tpu.matmul %29, %45, %cst_30 {dimension_numbers = #tpu.dot_dimension_numbers<[1], [0], [0], [1], [0, 0, 1, 1], [], []>} : vector<48x32xbf16>, vector<32x32xbf16>, vector<48x32xf32> -> vector<48x32xf32>
    %c0_31 = arith.constant 0 : index
    %c0_32 = arith.constant 0 : index
    %c0_33 = arith.constant 0 : index
    %47 = vector.load %arg14[%c0_31, %c0_32, %c0_33] : memref<1x1x32xf32, #tpu.memory_space<vmem>>, vector<1x1x32xf32>
    %48 = vector.shape_cast %47 : vector<1x1x32xf32> to vector<1x32xf32>
    %49 = vector.broadcast %48 : vector<1x32xf32> to vector<48x32xf32>
    %50 = arith.addf %46, %49 : vector<48x32xf32>
    %cst_34 = arith.constant 0.353553385 : f32
    %51 = vector.broadcast %cst_34 : f32 to vector<48x32xf32>
    %52 = arith.mulf %36, %51 : vector<48x32xf32>
    %53 = arith.truncf %52 : vector<48x32xf32> to vector<48x32xbf16>
    %54 = arith.truncf %43 : vector<48x32xf32> to vector<48x32xbf16>
    %55 = arith.truncf %50 : vector<48x32xf32> to vector<48x32xbf16>
    %56 = vector.extract_strided_slice %53 {offsets = [0, 0], sizes = [48, 8], strides = [1, 1]} : vector<48x32xbf16> to vector<48x8xbf16>
    %57 = vector.extract_strided_slice %53 {offsets = [0, 8], sizes = [48, 8], strides = [1, 1]} : vector<48x32xbf16> to vector<48x8xbf16>
    %58 = vector.extract_strided_slice %53 {offsets = [0, 16], sizes = [48, 8], strides = [1, 1]} : vector<48x32xbf16> to vector<48x8xbf16>
    %59 = vector.extract_strided_slice %53 {offsets = [0, 24], sizes = [48, 8], strides = [1, 1]} : vector<48x32xbf16> to vector<48x8xbf16>
    %60 = vector.shape_cast %56 : vector<48x8xbf16> to vector<1x48x8xbf16>
    %61 = vector.shape_cast %57 : vector<48x8xbf16> to vector<1x48x8xbf16>
    %62 = vector.shape_cast %58 : vector<48x8xbf16> to vector<1x48x8xbf16>
    %63 = vector.shape_cast %59 : vector<48x8xbf16> to vector<1x48x8xbf16>
    %64 = tpu.concatenate %60, %61, %62, %63 in 0 : vector<1x48x8xbf16>, vector<1x48x8xbf16>, vector<1x48x8xbf16>, vector<1x48x8xbf16> -> vector<4x48x8xbf16>
    %65 = vector.extract_strided_slice %54 {offsets = [0, 0], sizes = [48, 8], strides = [1, 1]} : vector<48x32xbf16> to vector<48x8xbf16>
    %66 = vector.extract_strided_slice %54 {offsets = [0, 8], sizes = [48, 8], strides = [1, 1]} : vector<48x32xbf16> to vector<48x8xbf16>
    %67 = vector.extract_strided_slice %54 {offsets = [0, 16], sizes = [48, 8], strides = [1, 1]} : vector<48x32xbf16> to vector<48x8xbf16>
    %68 = vector.extract_strided_slice %54 {offsets = [0, 24], sizes = [48, 8], strides = [1, 1]} : vector<48x32xbf16> to vector<48x8xbf16>
    %69 = vector.shape_cast %65 : vector<48x8xbf16> to vector<1x48x8xbf16>
    %70 = vector.shape_cast %66 : vector<48x8xbf16> to vector<1x48x8xbf16>
    %71 = vector.shape_cast %67 : vector<48x8xbf16> to vector<1x48x8xbf16>
    %72 = vector.shape_cast %68 : vector<48x8xbf16> to vector<1x48x8xbf16>
    %73 = tpu.concatenate %69, %70, %71, %72 in 0 : vector<1x48x8xbf16>, vector<1x48x8xbf16>, vector<1x48x8xbf16>, vector<1x48x8xbf16> -> vector<4x48x8xbf16>
    %74 = vector.extract_strided_slice %55 {offsets = [0, 0], sizes = [48, 8], strides = [1, 1]} : vector<48x32xbf16> to vector<48x8xbf16>
    %75 = vector.extract_strided_slice %55 {offsets = [0, 8], sizes = [48, 8], strides = [1, 1]} : vector<48x32xbf16> to vector<48x8xbf16>
    %76 = vector.extract_strided_slice %55 {offsets = [0, 16], sizes = [48, 8], strides = [1, 1]} : vector<48x32xbf16> to vector<48x8xbf16>
    %77 = vector.extract_strided_slice %55 {offsets = [0, 24], sizes = [48, 8], strides = [1, 1]} : vector<48x32xbf16> to vector<48x8xbf16>
    %78 = vector.shape_cast %74 : vector<48x8xbf16> to vector<1x48x8xbf16>
    %79 = vector.shape_cast %75 : vector<48x8xbf16> to vector<1x48x8xbf16>
    %80 = vector.shape_cast %76 : vector<48x8xbf16> to vector<1x48x8xbf16>
    %81 = vector.shape_cast %77 : vector<48x8xbf16> to vector<1x48x8xbf16>
    %82 = tpu.concatenate %78, %79, %80, %81 in 0 : vector<1x48x8xbf16>, vector<1x48x8xbf16>, vector<1x48x8xbf16>, vector<1x48x8xbf16> -> vector<4x48x8xbf16>
    %83 = tpu.iota {dimensions = array<i32: 2>} : vector<1x1x24xi32>
    %c17_i32 = arith.constant 17 : i32
    %84 = vector.broadcast %c17_i32 : i32 to vector<1x1x24xi32>
    %85 = arith.cmpi slt, %83, %84 : vector<1x1x24xi32>
    %86 = vector.extract_strided_slice %64 {offsets = [0, 0, 0], sizes = [4, 24, 8], strides = [1, 1, 1]} : vector<4x48x8xbf16> to vector<4x24x8xbf16>
    %87 = vector.extract_strided_slice %73 {offsets = [0, 0, 0], sizes = [4, 24, 8], strides = [1, 1, 1]} : vector<4x48x8xbf16> to vector<4x24x8xbf16>
    %88 = vector.extract_strided_slice %82 {offsets = [0, 0, 0], sizes = [4, 24, 8], strides = [1, 1, 1]} : vector<4x48x8xbf16> to vector<4x24x8xbf16>
    "tpu.trace_start"() <{level = 10 : i32, message = "hqd,hkd->hqk"}> : () -> ()
    %cst_35 = arith.constant dense<0.000000e+00> : vector<4x24x24xf32>
    %89 = tpu.matmul %86, %87, %cst_35 {dimension_numbers = #tpu.dot_dimension_numbers<[2], [2], [1], [1], [0, 0, 0, 1, 1, 1], [0], [0]>} : vector<4x24x8xbf16>, vector<4x24x8xbf16>, vector<4x24x24xf32> -> vector<4x24x24xf32>
    %cst_36 = arith.constant -1.000000e+30 : f32
    "tpu.trace_stop"() : () -> ()
    %90 = vector.shape_cast %85 : vector<1x1x24xi1> to vector<1x1x24xi1>
    %91 = vector.broadcast %90 : vector<1x1x24xi1> to vector<4x24x24xi1>
    %92 = vector.broadcast %cst_36 : f32 to vector<4x24x24xf32>
    %93 = arith.select %91, %89, %92 : vector<4x24x24xi1>, vector<4x24x24xf32>
    %cst_37 = arith.constant dense<0xFF800000> : vector<4x24xf32>
    %94 = vector.multi_reduction <maximumf>, %93, %cst_37 [2] : vector<4x24x24xf32> to vector<4x24xf32>
    %95 = vector.shape_cast %94 : vector<4x24xf32> to vector<4x24x1xf32>
    %96 = vector.broadcast %95 : vector<4x24x1xf32> to vector<4x24x24xf32>
    %97 = arith.subf %93, %96 : vector<4x24x24xf32>
    %98 = math.exp %97 : vector<4x24x24xf32>
    %cst_38 = arith.constant dense<0.000000e+00> : vector<4x24xf32>
    %99 = vector.multi_reduction <add>, %98, %cst_38 [2] : vector<4x24x24xf32> to vector<4x24xf32>
    %100 = vector.shape_cast %99 : vector<4x24xf32> to vector<4x24x1xf32>
    %101 = tpu.reciprocal %100 {approx = true} : vector<4x24x1xf32> -> vector<4x24x1xf32>
    %102 = vector.broadcast %101 : vector<4x24x1xf32> to vector<4x24x24xf32>
    %103 = arith.mulf %98, %102 : vector<4x24x24xf32>
    %104 = arith.truncf %103 : vector<4x24x24xf32> to vector<4x24x24xbf16>
    "tpu.trace_start"() <{level = 10 : i32, message = "hqk,hkd->hqd"}> : () -> ()
    %cst_39 = arith.constant dense<0.000000e+00> : vector<4x24x8xf32>
    %105 = tpu.matmul %104, %88, %cst_39 {dimension_numbers = #tpu.dot_dimension_numbers<[2], [1], [1], [2], [0, 0, 0, 1, 1, 2], [0], [0]>} : vector<4x24x24xbf16>, vector<4x24x8xbf16>, vector<4x24x8xf32> -> vector<4x24x8xf32>
    "tpu.trace_stop"() : () -> ()
    %106 = vector.extract_strided_slice %105 {offsets = [0, 0, 0], sizes = [1, 24, 8], strides = [1, 1, 1]} : vector<4x24x8xf32> to vector<1x24x8xf32>
    %107 = vector.shape_cast %106 : vector<1x24x8xf32> to vector<24x8xf32>
    %108 = vector.extract_strided_slice %105 {offsets = [1, 0, 0], sizes = [1, 24, 8], strides = [1, 1, 1]} : vector<4x24x8xf32> to vector<1x24x8xf32>
    %109 = vector.shape_cast %108 : vector<1x24x8xf32> to vector<24x8xf32>
    %110 = vector.extract_strided_slice %105 {offsets = [2, 0, 0], sizes = [1, 24, 8], strides = [1, 1, 1]} : vector<4x24x8xf32> to vector<1x24x8xf32>
    %111 = vector.shape_cast %110 : vector<1x24x8xf32> to vector<24x8xf32>
    %112 = vector.extract_strided_slice %105 {offsets = [3, 0, 0], sizes = [1, 24, 8], strides = [1, 1, 1]} : vector<4x24x8xf32> to vector<1x24x8xf32>
    %113 = vector.shape_cast %112 : vector<1x24x8xf32> to vector<24x8xf32>
    %114 = tpu.concatenate %107, %109, %111, %113 in 1 : vector<24x8xf32>, vector<24x8xf32>, vector<24x8xf32>, vector<24x8xf32> -> vector<24x32xf32>
    %115 = vector.extract_strided_slice %64 {offsets = [0, 24, 0], sizes = [4, 24, 8], strides = [1, 1, 1]} : vector<4x48x8xbf16> to vector<4x24x8xbf16>
    %116 = vector.extract_strided_slice %73 {offsets = [0, 24, 0], sizes = [4, 24, 8], strides = [1, 1, 1]} : vector<4x48x8xbf16> to vector<4x24x8xbf16>
    %117 = vector.extract_strided_slice %82 {offsets = [0, 24, 0], sizes = [4, 24, 8], strides = [1, 1, 1]} : vector<4x48x8xbf16> to vector<4x24x8xbf16>
    "tpu.trace_start"() <{level = 10 : i32, message = "hqd,hkd->hqk"}> : () -> ()
    %cst_40 = arith.constant dense<0.000000e+00> : vector<4x24x24xf32>
    %118 = tpu.matmul %115, %116, %cst_40 {dimension_numbers = #tpu.dot_dimension_numbers<[2], [2], [1], [1], [0, 0, 0, 1, 1, 1], [0], [0]>} : vector<4x24x8xbf16>, vector<4x24x8xbf16>, vector<4x24x24xf32> -> vector<4x24x24xf32>
    %cst_41 = arith.constant -1.000000e+30 : f32
    "tpu.trace_stop"() : () -> ()
    %119 = vector.shape_cast %85 : vector<1x1x24xi1> to vector<1x1x24xi1>
    %120 = vector.broadcast %119 : vector<1x1x24xi1> to vector<4x24x24xi1>
    %121 = vector.broadcast %cst_41 : f32 to vector<4x24x24xf32>
    %122 = arith.select %120, %118, %121 : vector<4x24x24xi1>, vector<4x24x24xf32>
    %cst_42 = arith.constant dense<0xFF800000> : vector<4x24xf32>
    %123 = vector.multi_reduction <maximumf>, %122, %cst_42 [2] : vector<4x24x24xf32> to vector<4x24xf32>
    %124 = vector.shape_cast %123 : vector<4x24xf32> to vector<4x24x1xf32>
    %125 = vector.broadcast %124 : vector<4x24x1xf32> to vector<4x24x24xf32>
    %126 = arith.subf %122, %125 : vector<4x24x24xf32>
    %127 = math.exp %126 : vector<4x24x24xf32>
    %cst_43 = arith.constant dense<0.000000e+00> : vector<4x24xf32>
    %128 = vector.multi_reduction <add>, %127, %cst_43 [2] : vector<4x24x24xf32> to vector<4x24xf32>
    %129 = vector.shape_cast %128 : vector<4x24xf32> to vector<4x24x1xf32>
    %130 = tpu.reciprocal %129 {approx = true} : vector<4x24x1xf32> -> vector<4x24x1xf32>
    %131 = vector.broadcast %130 : vector<4x24x1xf32> to vector<4x24x24xf32>
    %132 = arith.mulf %127, %131 : vector<4x24x24xf32>
    %133 = arith.truncf %132 : vector<4x24x24xf32> to vector<4x24x24xbf16>
    "tpu.trace_start"() <{level = 10 : i32, message = "hqk,hkd->hqd"}> : () -> ()
    %cst_44 = arith.constant dense<0.000000e+00> : vector<4x24x8xf32>
    %134 = tpu.matmul %133, %117, %cst_44 {dimension_numbers = #tpu.dot_dimension_numbers<[2], [1], [1], [2], [0, 0, 0, 1, 1, 2], [0], [0]>} : vector<4x24x24xbf16>, vector<4x24x8xbf16>, vector<4x24x8xf32> -> vector<4x24x8xf32>
    "tpu.trace_stop"() : () -> ()
    %135 = vector.extract_strided_slice %134 {offsets = [0, 0, 0], sizes = [1, 24, 8], strides = [1, 1, 1]} : vector<4x24x8xf32> to vector<1x24x8xf32>
    %136 = vector.shape_cast %135 : vector<1x24x8xf32> to vector<24x8xf32>
    %137 = vector.extract_strided_slice %134 {offsets = [1, 0, 0], sizes = [1, 24, 8], strides = [1, 1, 1]} : vector<4x24x8xf32> to vector<1x24x8xf32>
    %138 = vector.shape_cast %137 : vector<1x24x8xf32> to vector<24x8xf32>
    %139 = vector.extract_strided_slice %134 {offsets = [2, 0, 0], sizes = [1, 24, 8], strides = [1, 1, 1]} : vector<4x24x8xf32> to vector<1x24x8xf32>
    %140 = vector.shape_cast %139 : vector<1x24x8xf32> to vector<24x8xf32>
    %141 = vector.extract_strided_slice %134 {offsets = [3, 0, 0], sizes = [1, 24, 8], strides = [1, 1, 1]} : vector<4x24x8xf32> to vector<1x24x8xf32>
    %142 = vector.shape_cast %141 : vector<1x24x8xf32> to vector<24x8xf32>
    %143 = tpu.concatenate %136, %138, %140, %142 in 1 : vector<24x8xf32>, vector<24x8xf32>, vector<24x8xf32>, vector<24x8xf32> -> vector<24x32xf32>
    %144 = tpu.concatenate %114, %143 in 0 : vector<24x32xf32>, vector<24x32xf32> -> vector<48x32xf32>
    %145 = arith.truncf %144 : vector<48x32xf32> to vector<48x32xbf16>
    %c0_45 = arith.constant 0 : index
    %c0_46 = arith.constant 0 : index
    %c0_47 = arith.constant 0 : index
    %146 = vector.load %arg15[%c0_45, %c0_46, %c0_47] : memref<1x32x32xbf16, #tpu.memory_space<vmem>>, vector<1x32x32xbf16>
    %147 = vector.shape_cast %146 : vector<1x32x32xbf16> to vector<32x32xbf16>
    %cst_48 = arith.constant dense<0.000000e+00> : vector<48x32xf32>
    %148 = tpu.matmul %145, %147, %cst_48 {dimension_numbers = #tpu.dot_dimension_numbers<[1], [0], [0], [1], [0, 0, 1, 1], [], []>} : vector<48x32xbf16>, vector<32x32xbf16>, vector<48x32xf32> -> vector<48x32xf32>
    %c0_49 = arith.constant 0 : index
    %c0_50 = arith.constant 0 : index
    %c0_51 = arith.constant 0 : index
    %149 = vector.load %arg16[%c0_49, %c0_50, %c0_51] : memref<1x1x32xf32, #tpu.memory_space<vmem>>, vector<1x1x32xf32>
    %150 = vector.shape_cast %149 : vector<1x1x32xf32> to vector<1x32xf32>
    %151 = vector.broadcast %150 : vector<1x32xf32> to vector<48x32xf32>
    %152 = arith.addf %148, %151 : vector<48x32xf32>
    %153 = arith.addf %4, %152 : vector<48x32xf32>
    %c0_52 = arith.constant 0 : index
    %c0_53 = arith.constant 0 : index
    %c0_54 = arith.constant 0 : index
    %154 = vector.load %arg17[%c0_52, %c0_53, %c0_54] : memref<1x1x32xf32, #tpu.memory_space<vmem>>, vector<1x1x32xf32>
    %155 = vector.shape_cast %154 : vector<1x1x32xf32> to vector<1x32xf32>
    %c0_55 = arith.constant 0 : index
    %c0_56 = arith.constant 0 : index
    %c0_57 = arith.constant 0 : index
    %156 = vector.load %arg18[%c0_55, %c0_56, %c0_57] : memref<1x1x32xf32, #tpu.memory_space<vmem>>, vector<1x1x32xf32>
    %157 = vector.shape_cast %156 : vector<1x1x32xf32> to vector<1x32xf32>
    %cst_58 = arith.constant dense<0.000000e+00> : vector<48xf32>
    %158 = vector.multi_reduction <add>, %153, %cst_58 [1] : vector<48x32xf32> to vector<48xf32>
    %159 = vector.shape_cast %158 : vector<48xf32> to vector<48x1xf32>
    %cst_59 = arith.constant 3.200000e+01 : f32
    %160 = vector.broadcast %cst_59 : f32 to vector<48x1xf32>
    %161 = arith.divf %159, %160 : vector<48x1xf32>
    %162 = vector.broadcast %161 : vector<48x1xf32> to vector<48x32xf32>
    %163 = arith.subf %153, %162 : vector<48x32xf32>
    %164 = arith.mulf %163, %163 : vector<48x32xf32>
    %cst_60 = arith.constant dense<0.000000e+00> : vector<48xf32>
    %165 = vector.multi_reduction <add>, %164, %cst_60 [1] : vector<48x32xf32> to vector<48xf32>
    %166 = vector.shape_cast %165 : vector<48xf32> to vector<48x1xf32>
    %cst_61 = arith.constant 3.200000e+01 : f32
    %167 = vector.broadcast %cst_61 : f32 to vector<48x1xf32>
    %168 = arith.divf %166, %167 : vector<48x1xf32>
    %cst_62 = arith.constant 9.99999974E-6 : f32
    %169 = vector.broadcast %cst_62 : f32 to vector<48x1xf32>
    %170 = arith.addf %168, %169 : vector<48x1xf32>
    %171 = math.rsqrt %170 : vector<48x1xf32>
    %172 = vector.broadcast %171 : vector<48x1xf32> to vector<48x32xf32>
    %173 = arith.mulf %163, %172 : vector<48x32xf32>
    %174 = vector.broadcast %155 : vector<1x32xf32> to vector<48x32xf32>
    %175 = arith.mulf %173, %174 : vector<48x32xf32>
    %176 = vector.broadcast %157 : vector<1x32xf32> to vector<48x32xf32>
    %177 = arith.addf %175, %176 : vector<48x32xf32>
    %178 = arith.truncf %177 : vector<48x32xf32> to vector<48x32xbf16>
    %c0_63 = arith.constant 0 : index
    %c0_64 = arith.constant 0 : index
    %c0_65 = arith.constant 0 : index
    %179 = vector.load %arg19[%c0_63, %c0_64, %c0_65] : memref<1x32x128xbf16, #tpu.memory_space<vmem>>, vector<1x32x128xbf16>
    %180 = vector.shape_cast %179 : vector<1x32x128xbf16> to vector<32x128xbf16>
    %cst_66 = arith.constant dense<0.000000e+00> : vector<48x128xf32>
    %181 = tpu.matmul %178, %180, %cst_66 {dimension_numbers = #tpu.dot_dimension_numbers<[1], [0], [0], [1], [0, 0, 1, 1], [], []>} : vector<48x32xbf16>, vector<32x128xbf16>, vector<48x128xf32> -> vector<48x128xf32>
    %c0_67 = arith.constant 0 : index
    %c0_68 = arith.constant 0 : index
    %c0_69 = arith.constant 0 : index
    %182 = vector.load %arg20[%c0_67, %c0_68, %c0_69] : memref<1x1x128xf32, #tpu.memory_space<vmem>>, vector<1x1x128xf32>
    %183 = vector.shape_cast %182 : vector<1x1x128xf32> to vector<1x128xf32>
    %184 = vector.broadcast %183 : vector<1x128xf32> to vector<48x128xf32>
    %185 = arith.addf %181, %184 : vector<48x128xf32>
    %cst_70 = arith.constant 5.000000e-01 : f32
    %186 = vector.broadcast %cst_70 : f32 to vector<48x128xf32>
    %187 = arith.mulf %186, %185 : vector<48x128xf32>
    %cst_71 = arith.constant 4.471500e-02 : f32
    %188 = vector.broadcast %cst_71 : f32 to vector<48x128xf32>
    %189 = arith.mulf %188, %185 : vector<48x128xf32>
    %190 = arith.mulf %189, %185 : vector<48x128xf32>
    %191 = arith.mulf %190, %185 : vector<48x128xf32>
    %192 = arith.addf %185, %191 : vector<48x128xf32>
    %cst_72 = arith.constant 0.797884583 : f32
    %193 = vector.broadcast %cst_72 : f32 to vector<48x128xf32>
    %194 = arith.mulf %193, %192 : vector<48x128xf32>
    %195 = math.tanh %194 : vector<48x128xf32>
    %cst_73 = arith.constant 1.000000e+00 : f32
    %196 = vector.broadcast %cst_73 : f32 to vector<48x128xf32>
    %197 = arith.addf %196, %195 : vector<48x128xf32>
    %198 = arith.mulf %187, %197 : vector<48x128xf32>
    %199 = arith.truncf %198 : vector<48x128xf32> to vector<48x128xbf16>
    %c0_74 = arith.constant 0 : index
    %c0_75 = arith.constant 0 : index
    %c0_76 = arith.constant 0 : index
    %200 = vector.load %arg21[%c0_74, %c0_75, %c0_76] : memref<1x128x32xbf16, #tpu.memory_space<vmem>>, vector<1x128x32xbf16>
    %201 = vector.shape_cast %200 : vector<1x128x32xbf16> to vector<128x32xbf16>
    %cst_77 = arith.constant dense<0.000000e+00> : vector<48x32xf32>
    %202 = tpu.matmul %199, %201, %cst_77 {dimension_numbers = #tpu.dot_dimension_numbers<[1], [0], [0], [1], [0, 0, 1, 1], [], []>} : vector<48x128xbf16>, vector<128x32xbf16>, vector<48x32xf32> -> vector<48x32xf32>
    %c0_78 = arith.constant 0 : index
    %c0_79 = arith.constant 0 : index
    %c0_80 = arith.constant 0 : index
    %203 = vector.load %arg22[%c0_78, %c0_79, %c0_80] : memref<1x1x32xf32, #tpu.memory_space<vmem>>, vector<1x1x32xf32>
    %204 = vector.shape_cast %203 : vector<1x1x32xf32> to vector<1x32xf32>
    %205 = vector.broadcast %204 : vector<1x32xf32> to vector<48x32xf32>
    %206 = arith.addf %202, %205 : vector<48x32xf32>
    %207 = arith.addf %153, %206 : vector<48x32xf32>
    %208 = vector.shape_cast %207 : vector<48x32xf32> to vector<2x24x32xf32>
    %c0_81 = arith.constant 0 : index
    %c0_82 = arith.constant 0 : index
    %c0_83 = arith.constant 0 : index
    %209 = vector.load %arg28[%c0_81, %c0_82, %c0_83] : memref<2x24x32xf32, #tpu.memory_space<vmem>>, vector<2x24x32xf32>
    tpu.vector_store %arg28[%c0_81, %c0_82, %c0_83], %208 {strides = array<i32>} : memref<2x24x32xf32, #tpu.memory_space<vmem>>, vector<2x24x32xf32>,
    %c1_i32 = arith.constant 1 : i32
    %210 = arith.cmpi eq, %arg1, %c1_i32 : i32
    %211 = arith.extui %210 : i1 to i32
    %c0_i32_84 = arith.constant 0 : i32
    %212 = arith.cmpi ne, %211, %c0_i32_84 : i32
    scf.if %212 {
      %213 = vector.shape_cast %207 : vector<48x32xf32> to vector<2x24x32xf32>
      %214 = vector.extract_strided_slice %213 {offsets = [0, 0, 0], sizes = [2, 1, 32], strides = [1, 1, 1]} : vector<2x24x32xf32> to vector<2x1x32xf32>
      %215 = vector.shape_cast %214 : vector<2x1x32xf32> to vector<2x32xf32>
      %c0_85 = arith.constant 0 : index
      %c0_86 = arith.constant 0 : index
      %216 = vector.load %arg23[%c0_85, %c0_86] : memref<1x32xf32, #tpu.memory_space<vmem>>, vector<1x32xf32>
      %c0_87 = arith.constant 0 : index
      %c0_88 = arith.constant 0 : index
      %217 = vector.load %arg24[%c0_87, %c0_88] : memref<1x32xf32, #tpu.memory_space<vmem>>, vector<1x32xf32>
      %cst_89 = arith.constant dense<0.000000e+00> : vector<2xf32>
      %218 = vector.multi_reduction <add>, %215, %cst_89 [1] : vector<2x32xf32> to vector<2xf32>
      %219 = vector.shape_cast %218 : vector<2xf32> to vector<2x1xf32>
      %cst_90 = arith.constant 3.200000e+01 : f32
      %220 = vector.broadcast %cst_90 : f32 to vector<2x1xf32>
      %221 = arith.divf %219, %220 : vector<2x1xf32>
      %222 = vector.broadcast %221 : vector<2x1xf32> to vector<2x32xf32>
      %223 = arith.subf %215, %222 : vector<2x32xf32>
      %224 = arith.mulf %223, %223 : vector<2x32xf32>
      %cst_91 = arith.constant dense<0.000000e+00> : vector<2xf32>
      %225 = vector.multi_reduction <add>, %224, %cst_91 [1] : vector<2x32xf32> to vector<2xf32>
      %226 = vector.shape_cast %225 : vector<2xf32> to vector<2x1xf32>
      %cst_92 = arith.constant 3.200000e+01 : f32
      %227 = vector.broadcast %cst_92 : f32 to vector<2x1xf32>
      %228 = arith.divf %226, %227 : vector<2x1xf32>
      %cst_93 = arith.constant 9.99999974E-6 : f32
      %229 = vector.broadcast %cst_93 : f32 to vector<2x1xf32>
      %230 = arith.addf %228, %229 : vector<2x1xf32>
      %231 = math.rsqrt %230 : vector<2x1xf32>
      %232 = vector.broadcast %231 : vector<2x1xf32> to vector<2x32xf32>
      %233 = arith.mulf %223, %232 : vector<2x32xf32>
      %234 = vector.broadcast %216 : vector<1x32xf32> to vector<2x32xf32>
      %235 = arith.mulf %233, %234 : vector<2x32xf32>
      %236 = vector.broadcast %217 : vector<1x32xf32> to vector<2x32xf32>
      %237 = arith.addf %235, %236 : vector<2x32xf32>
      %238 = arith.truncf %237 : vector<2x32xf32> to vector<2x32xbf16>
      %c0_94 = arith.constant 0 : index
      %c0_95 = arith.constant 0 : index
      %239 = vector.load %arg25[%c0_94, %c0_95] : memref<32x5xbf16, #tpu.memory_space<vmem>>, vector<32x5xbf16>
      %cst_96 = arith.constant dense<0.000000e+00> : vector<2x5xf32>
      %240 = tpu.matmul %238, %239, %cst_96 {dimension_numbers = #tpu.dot_dimension_numbers<[1], [0], [0], [1], [0, 0, 1, 1], [], []>} : vector<2x32xbf16>, vector<32x5xbf16>, vector<2x5xf32> -> vector<2x5xf32>
      %c0_97 = arith.constant 0 : index
      %c0_98 = arith.constant 0 : index
      %241 = vector.load %arg26[%c0_97, %c0_98] : memref<1x5xf32, #tpu.memory_space<vmem>>, vector<1x5xf32>
      %242 = vector.broadcast %241 : vector<1x5xf32> to vector<2x5xf32>
      %243 = arith.addf %240, %242 : vector<2x5xf32>
      %c0_99 = arith.constant 0 : index
      %c0_100 = arith.constant 0 : index
      %244 = vector.load %arg27[%c0_99, %c0_100] : memref<2x5xf32, #tpu.memory_space<vmem>>, vector<2x5xf32>
      tpu.vector_store %arg27[%c0_99, %c0_100], %243 {strides = array<i32>} : memref<2x5xf32, #tpu.memory_space<vmem>>, vector<2x5xf32>,
    } else {
    }
    return
  }
  func.func @transform_0(%arg0: i32, %arg1: i32) -> (i32, i32, i32) {
    %c0_i32 = arith.constant 0 : i32
    %c0_i32_0 = arith.constant 0 : i32
    %c0_i32_1 = arith.constant 0 : i32
    return %arg0, %c0_i32, %c0_i32_0 : i32, i32, i32
  }
  func.func @transform_1(%arg0: i32, %arg1: i32) -> (i32, i32) {
    %c0_i32 = arith.constant 0 : i32
    %c0_i32_0 = arith.constant 0 : i32
    %c0_i32_1 = arith.constant 0 : i32
    return %c0_i32, %c0_i32_0 : i32, i32
  }
  func.func @transform_2(%arg0: i32, %arg1: i32) -> (i32, i32) {
    %c0_i32 = arith.constant 0 : i32
    %c0_i32_0 = arith.constant 0 : i32
    %c0_i32_1 = arith.constant 0 : i32
    return %c0_i32, %c0_i32_0 : i32, i32
  }
  func.func @transform_3(%arg0: i32, %arg1: i32) -> (i32, i32) {
    %c0_i32 = arith.constant 0 : i32
    %c0_i32_0 = arith.constant 0 : i32
    %c0_i32_1 = arith.constant 0 : i32
    return %c0_i32, %c0_i32_0 : i32, i32
  }
  func.func @transform_4(%arg0: i32, %arg1: i32) -> (i32, i32) {
    %c0_i32 = arith.constant 0 : i32
    %c0_i32_0 = arith.constant 0 : i32
    %c0_i32_1 = arith.constant 0 : i32
    return %c0_i32, %c0_i32_0 : i32, i32
  }
  func.func @transform_5(%arg0: i32, %arg1: i32) -> (i32, i32, i32) {
    %c0_i32 = arith.constant 0 : i32
    %c0_i32_0 = arith.constant 0 : i32
    %c0_i32_1 = arith.constant 0 : i32
    return %arg1, %c0_i32, %c0_i32_0 : i32, i32, i32
  }
  func.func @transform_6(%arg0: i32, %arg1: i32) -> (i32, i32, i32) {
    %c0_i32 = arith.constant 0 : i32
    %c0_i32_0 = arith.constant 0 : i32
    %c0_i32_1 = arith.constant 0 : i32
    return %arg1, %c0_i32, %c0_i32_0 : i32, i32, i32
  }
  func.func @transform_7(%arg0: i32, %arg1: i32) -> (i32, i32, i32) {
    %c0_i32 = arith.constant 0 : i32
    %c0_i32_0 = arith.constant 0 : i32
    %c0_i32_1 = arith.constant 0 : i32
    return %arg1, %c0_i32, %c0_i32_0 : i32, i32, i32
  }
  func.func @transform_8(%arg0: i32, %arg1: i32) -> (i32, i32, i32) {
    %c0_i32 = arith.constant 0 : i32
    %c0_i32_0 = arith.constant 0 : i32
    %c0_i32_1 = arith.constant 0 : i32
    return %arg1, %c0_i32, %c0_i32_0 : i32, i32, i32
  }
  func.func @transform_9(%arg0: i32, %arg1: i32) -> (i32, i32, i32) {
    %c0_i32 = arith.constant 0 : i32
    %c0_i32_0 = arith.constant 0 : i32
    %c0_i32_1 = arith.constant 0 : i32
    return %arg1, %c0_i32, %c0_i32_0 : i32, i32, i32
  }
  func.func @transform_10(%arg0: i32, %arg1: i32) -> (i32, i32, i32) {
    %c0_i32 = arith.constant 0 : i32
    %c0_i32_0 = arith.constant 0 : i32
    %c0_i32_1 = arith.constant 0 : i32
    return %arg1, %c0_i32, %c0_i32_0 : i32, i32, i32
  }
  func.func @transform_11(%arg0: i32, %arg1: i32) -> (i32, i32, i32) {
    %c0_i32 = arith.constant 0 : i32
    %c0_i32_0 = arith.constant 0 : i32
    %c0_i32_1 = arith.constant 0 : i32
    return %arg1, %c0_i32, %c0_i32_0 : i32, i32, i32
  }
  func.func @transform_12(%arg0: i32, %arg1: i32) -> (i32, i32, i32) {
    %c0_i32 = arith.constant 0 : i32
    %c0_i32_0 = arith.constant 0 : i32
    %c0_i32_1 = arith.constant 0 : i32
    return %arg1, %c0_i32, %c0_i32_0 : i32, i32, i32
  }
  func.func @transform_13(%arg0: i32, %arg1: i32) -> (i32, i32, i32) {
    %c0_i32 = arith.constant 0 : i32
    %c0_i32_0 = arith.constant 0 : i32
    %c0_i32_1 = arith.constant 0 : i32
    return %arg1, %c0_i32, %c0_i32_0 : i32, i32, i32
  }
  func.func @transform_14(%arg0: i32, %arg1: i32) -> (i32, i32, i32) {
    %c0_i32 = arith.constant 0 : i32
    %c0_i32_0 = arith.constant 0 : i32
    %c0_i32_1 = arith.constant 0 : i32
    return %arg1, %c0_i32, %c0_i32_0 : i32, i32, i32
  }
  func.func @transform_15(%arg0: i32, %arg1: i32) -> (i32, i32, i32) {
    %c0_i32 = arith.constant 0 : i32
    %c0_i32_0 = arith.constant 0 : i32
    %c0_i32_1 = arith.constant 0 : i32
    return %arg1, %c0_i32, %c0_i32_0 : i32, i32, i32
  }
  func.func @transform_16(%arg0: i32, %arg1: i32) -> (i32, i32, i32) {
    %c0_i32 = arith.constant 0 : i32
    %c0_i32_0 = arith.constant 0 : i32
    %c0_i32_1 = arith.constant 0 : i32
    return %arg1, %c0_i32, %c0_i32_0 : i32, i32, i32
  }
  func.func @transform_17(%arg0: i32, %arg1: i32) -> (i32, i32, i32) {
    %c0_i32 = arith.constant 0 : i32
    %c0_i32_0 = arith.constant 0 : i32
    %c0_i32_1 = arith.constant 0 : i32
    return %arg1, %c0_i32, %c0_i32_0 : i32, i32, i32
  }
  func.func @transform_18(%arg0: i32, %arg1: i32) -> (i32, i32, i32) {
    %c0_i32 = arith.constant 0 : i32
    %c0_i32_0 = arith.constant 0 : i32
    %c0_i32_1 = arith.constant 0 : i32
    return %arg1, %c0_i32, %c0_i32_0 : i32, i32, i32
  }
  func.func @transform_19(%arg0: i32, %arg1: i32) -> (i32, i32, i32) {
    %c0_i32 = arith.constant 0 : i32
    %c0_i32_0 = arith.constant 0 : i32
    %c0_i32_1 = arith.constant 0 : i32
    return %arg1, %c0_i32, %c0_i32_0 : i32, i32, i32
  }
  func.func @transform_20(%arg0: i32, %arg1: i32) -> (i32, i32, i32) {
    %c0_i32 = arith.constant 0 : i32
    %c0_i32_0 = arith.constant 0 : i32
    %c0_i32_1 = arith.constant 0 : i32
    return %arg1, %c0_i32, %c0_i32_0 : i32, i32, i32
  }
  func.func @transform_21(%arg0: i32, %arg1: i32) -> (i32, i32) {
    %c0_i32 = arith.constant 0 : i32
    %c0_i32_0 = arith.constant 0 : i32
    %c0_i32_1 = arith.constant 0 : i32
    return %c0_i32, %c0_i32_0 : i32, i32
  }
  func.func @transform_22(%arg0: i32, %arg1: i32) -> (i32, i32) {
    %c0_i32 = arith.constant 0 : i32
    %c0_i32_0 = arith.constant 0 : i32
    %c0_i32_1 = arith.constant 0 : i32
    return %c0_i32, %c0_i32_0 : i32, i32
  }
  func.func @transform_23(%arg0: i32, %arg1: i32) -> (i32, i32) {
    %c0_i32 = arith.constant 0 : i32
    %c0_i32_0 = arith.constant 0 : i32
    %c0_i32_1 = arith.constant 0 : i32
    return %c0_i32, %c0_i32_0 : i32, i32
  }
  func.func @transform_24(%arg0: i32, %arg1: i32) -> (i32, i32) {
    %c0_i32 = arith.constant 0 : i32
    %c0_i32_0 = arith.constant 0 : i32
    %c0_i32_1 = arith.constant 0 : i32
    return %c0_i32, %c0_i32_0 : i32, i32
  }
  func.func @transform_25(%arg0: i32, %arg1: i32) -> (i32, i32) {
    %c0_i32 = arith.constant 0 : i32
    %c0_i32_0 = arith.constant 0 : i32
    return %arg0, %c0_i32 : i32, i32
  }
}

</mosaic_0001>

<bundles_post_ra>
// kernel: tpu_custom_call.1
= control target key start
LH: loop header
LB: loop body
LE: loop exit
PB: predicated region body
PF: predicated region fallthrough
CT: control target
= control target key end

     0   :  { %s5997_s0 = inlined_call_operand.hbm [shape: bf16[2,16,48], index: 0, kind: input, shape index: {}]   ;;  %s5998_s1 = inlined_call_operand.vmem [shape: bf16[48,32], index: 1, kind: input, shape index: {}]   ;;  %s5999_s2 = inlined_call_operand.hbm [shape: f32[1,32], index: 2, kind: input, shape index: {}]   ;;  %s6000_s3 = inlined_call_operand.hbm [shape: f32[1,32], index: 3, kind: input, shape index: {}]   ;;  %s6001_s4 = inlined_call_operand.vmem [shape: f32[24,32], index: 4, kind: input, shape index: {}]   ;;  %s6002_s5 = inlined_call_operand.vmem [shape: f32[2,1,32], index: 5, kind: input, shape index: {}]   ;;  %s6003_s6 = inlined_call_operand.vmem [shape: f32[2,1,32], index: 6, kind: input, shape index: {}]   ;;  %s6004_s7 = inlined_call_operand.vmem [shape: bf16[2,32,32], index: 7, kind: input, shape index: {}]   ;;  %s6005_s8 = inlined_call_operand.vmem [shape: f32[2,1,32], index: 8, kind: input, shape index: {}]   ;;  %s6006_s9 = inlined_call_operand.vmem [shape: bf16[2,32,32], index: 9, kind: input, shape index: {}]   ;;  %s6007_s10 = inlined_call_operand.vmem [shape: f32[2,1,32], index: 10, kind: input, shape index: {}]   ;;  %s6008_s11 = inlined_call_operand.vmem [shape: bf16[2,32,32], index: 11, kind: input, shape index: {}]   ;;  %s6009_s12 = inlined_call_operand.vmem [shape: f32[2,1,32], index: 12, kind: input, shape index: {}]   ;;  %s6010_s13 = inlined_call_operand.vmem [shape: bf16[2,32,32], index: 13, kind: input, shape index: {}]   ;;  %s6011_s14 = inlined_call_operand.vmem [shape: f32[2,1,32], index: 14, kind: input, shape index: {}]   ;;  %s6012_s15 = inlined_call_operand.vmem [shape: f32[2,1,32], index: 15, kind: input, shape index: {}]   ;;  %s6013_s16 = inlined_call_operand.vmem [shape: f32[2,1,32], index: 16, kind: input, shape index: {}]   ;;  %s6014_s17 = inlined_call_operand.vmem [shape: bf16[2,32,128], index: 17, kind: input, shape index: {}]   ;;  %s6015_s18 = inlined_call_operand.vmem [shape: f32[2,1,128], index: 18, kind: input, shape index: {}]   ;;  %s6016_s19 = inlined_call_operand.vmem [shape: bf16[2,128,32], index: 19, kind: input, shape index: {}]   ;;  %s6017_s20 = inlined_call_operand.vmem [shape: f32[2,1,32], index: 20, kind: input, shape index: {}]   ;;  %s6018_s21 = inlined_call_operand.vmem [shape: f32[1,32], index: 21, kind: input, shape index: {}]   ;;  %s6019_s22 = inlined_call_operand.vmem [shape: f32[1,32], index: 22, kind: input, shape index: {}]   ;;  %s6020_s23 = inlined_call_operand.vmem [shape: bf16[32,5], index: 23, kind: input, shape index: {}]   ;;  %s6021_s24 = inlined_call_operand.vmem [shape: f32[1,5], index: 24, kind: input, shape index: {}]   ;;  %s6022_s25 = inlined_call_operand.hbm [shape: f32[2,5], index: 25, kind: output, shape index: {}]  }
   0x1   :  { %6030 = sst [smem:[#allocation17_spill]] %s5997_s0 }
   0x2   :  { %6031 = sst [smem:[#allocation18_spill]] %s5998_s1 }
   0x3   :  { %6032 = sst [smem:[#allocation19_spill]] %s5999_s2 }
   0x4   :  { %6033 = sst [smem:[#allocation20_spill]] %s6000_s3 }
   0x5   :  { %6034 = sst [smem:[#allocation21_spill]] %s6001_s4 }
   0x6   :  { %6035 = sst [smem:[#allocation22_spill]] %s6002_s5 }
   0x7   :  { %6036 = sst [smem:[#allocation23_spill]] %s6003_s6 }
   0x8   :  { %6037 = sst [smem:[#allocation24_spill]] %s6004_s7 }
   0x9   :  { %6038 = sst [smem:[#allocation25_spill]] %s6005_s8 }
   0xa   :  { %6039 = sst [smem:[#allocation26_spill]] %s6006_s9 }
   0xb   :  { %6040 = sst [smem:[#allocation27_spill]] %s6008_s11 }
   0xc   :  { %6041 = sst [smem:[#allocation28_spill]] %s6010_s13 }
   0xd   :  { %6042 = sst [smem:[#allocation29_spill]] %s6018_s21 }
   0xe   :  { %6043 = sst [smem:[#allocation30_spill]] %s6019_s22 }
   0xf   :  { %6044 = sst [smem:[#allocation31_spill]] %s6020_s23 }
  0x10   :  { %6045 = sst [smem:[#allocation32_spill]] %s6021_s24 }
  0x11   :  { %6046 = sst [smem:[#allocation33_spill]] %s6022_s25 }
  0x12   :  { %30 = vsyncpa [#allocation4], 0 }
  0x13   :  { %31 = vsyncpa [#allocation7], 0 }
  0x14   :  { %32 = vsyncpa [#allocation5], 0  ;;  %s4960_s29 = smov 0   ;;  %s4962_s2 = smov 0  }
  0x15   :  { %s4964_s6 = smov 0  }
  0x16 LB: > { %6047 = sst [smem:[#allocation13_spill]] %s4803_s29  ;;  %s4813_s30 = smov [#allocation6]   ;;  %s4811_s6 = sphi %s4964_s6, %s38_s6   ;;  %s4807_s2 = sphi %s4962_s2, %s6089_s2   ;;  %s4803_s29 = sphi %s4960_s29, %s6088_s29  }
  0x17   : > { %6048 = sst [smem:[#allocation14_spill]] %s4807_s2  ;;  %s724_s7 = sshll.u32 %s4813_s30, 4  ;;  %s725_s7 = int_to_ptr.vmem [resolvable:$true] %s724_s7 }
  0x18   : > { %6049 = sst [smem:[#allocation15_spill]] %s4811_s6  ;;  %s6025_s3 = sadd.s32 4294967295, %s4811_s6  }
  0x19   : > { %p3878_p0 = scmp.ge.s32.totalorder %s4811_s6, 1  ;;  %p691_p1 = scmp.lt.s32.totalorder %s4811_s6, 3 }
  0x1a   : > { %p4980_p2 = scmp.eq.s32.totalorder %s6025_s3, 0  ;;  %s47_s8 = sadd.s32 1, %s4807_s2 }
  0x1b   : > { %p4984_p3 = pnand %p3878_p0, %p691_p1  ;;  %p4997_p6 = scmp.ge.s32.totalorder %s47_s8, 2 }
  0x1c   : > { %s4814_s28 = smov [#allocation3]   ;;  %s4686_s5 = scalar_lea.vmem %s725_s7, 16 }
  0x1d   : > { %p4406_p4 = pneg %p4984_p3  ;;  %s707_s9 = sshll.u32 %s4814_s28, 4  ;;  %s708_s9 = int_to_ptr.vmem [resolvable:$true] %s707_s9 }
  0x1e   : > { %p4687_p8 = scmp.ne.s32.totalorder %s725_s7, %s4686_s5  ;;  %s4693_s0 = scalar_lea.vmem %s725_s7, 32 }
  0x1f   : > { %p4993_p5 = pnand %p4980_p2, %p4406_p4  ;;  %p4694_p11 = scmp.lt.s32.totalorder %s725_s7, %s725_s7 }
  0x20   : > { %p4695_p12 = scmp.lt.s32.totalorder %s4693_s0, %s4686_s5 }
  0x21   : > { %p4677_p7 = pneg %p4993_p5 }
  0x22   : > { %p4696_p13 = por %p4695_p12, %p4694_p11 }
  0x23   : > { %p4689_p9 = pnand %p4687_p8, %p4677_p7 }
  0x25   : > { %p4690_p10 = pneg %p4689_p9 }
  0x27   : > { %p4697_p0 = pnand %p4696_p13, %p4690_p10 }
  0x29   : > { %4700 = shalt.err (!%p4697_p0)
}
  0x2a   : > { %s6054_s28 = sld [smem:[#allocation19_spill]]  ;;  %s6091_s8 = smov (%p4997_p6, %s47_s8), 0 }
  0x2b   : > { %6055 = sst [smem:[#allocation16_spill]] %s6091_s8  ;;  %s4712_s2 = scalar_lea.vmem %s708_s9, 256 }
  0x2c   : > { %p4713_p1 = scmp.ne.s32.totalorder %s708_s9, %s4712_s2  ;;  %p4720_p9 = scmp.lt.s32.totalorder %s708_s9, %s708_s9 }
  0x2d   : > { %p4721_p10 = scmp.lt.s32.totalorder %s4712_s2, %s4712_s2 }
  0x2e   : > { %p4715_p4 = pnand %p4713_p1, %p4677_p7 }
  0x2f   : > { %p4722_p11 = por %p4721_p10, %p4720_p9 }
  0x30   : > { %4412 = dma.hbm_to_vmem [thread:$0]  (!%p4993_p5), %s6054_s28, 16, %s725_s7, [#allocation7]  }
  0x31   : > { %p4716_p8 = pneg %p4715_p4 }
  0x33   : > { %p4723_p12 = pnand %p4722_p11, %p4716_p8 }
  0x35   : > { %4726 = shalt.err (!%p4723_p12)
}
  0x36   : > { %s4815_s5 = smov 64   ;;  %s4816_s3 = smov 4  }
  0x37   : > { %s6056_s0 = sld [smem:[#allocation17_spill]]  ;;  %s4817_s30 = smov [#allocation8]  }
  0x38   : > { %s735_s28 = sshll.u32 %s4817_s30, 4  ;;  %s736_s28 = int_to_ptr.vmem [resolvable:$true] %s735_s28 }
  0x39   : > { %s4738_s8 = scalar_lea.vmem %s736_s28, 16  ;;  %s4745_s2 = scalar_lea.vmem %s736_s28, 32 }
  0x3a   : > { %p4739_p6 = scmp.ne.s32.totalorder %s736_s28, %s4738_s8  ;;  %p4746_p1 = scmp.lt.s32.totalorder %s736_s28, %s736_s28 }
  0x3b   : > { %p4747_p4 = scmp.lt.s32.totalorder %s4745_s2, %s4738_s8 }
  0x3c   : > { %p4741_p13 = pnand %p4739_p6, %p4677_p7 }
  0x3d   : > { %4409 = dma.hbm_to_vmem [thread:$0]  (!%p4993_p5), %s6056_s0, 256, %s708_s9, [#allocation4], %s4815_s5, %s4815_s5, %s4816_s3  }
  0x3e   : > { %p4742_p0 = pneg %p4741_p13  ;;  %p4748_p8 = por %p4747_p4, %p4746_p1 }
  0x40   : > { %p4749_p9 = pnand %p4748_p8, %p4742_p0 }
  0x42   : > { %4752 = shalt.err (!%p4749_p9)
}
  0x43   : > { %s6057_s9 = sld [smem:[#allocation20_spill]] }
  0x45   : > { %871 = sbr.rel (%p4984_p3) target bundleno = 3939 (0xf63), region = 120 }
  0x49   : > { %4415 = dma.hbm_to_vmem [thread:$0]  (!%p4993_p5), %s6057_s9, 16, %s736_s28, [#allocation7]  }
  0x4a   : > { %4790 = dma.done.wait (%p4980_p2), [#allocation4], 256  }
  0x4b   : > { %4792 = vsyncadd (%p4980_p2), [#allocation4], 4294967040 }
  0x4c   : > { %4794 = dma.done.wait (%p4980_p2), [#allocation7], 32  }
  0x4d   : > { %4796 = vsyncadd (%p4980_p2), [#allocation7], 4294967264  ;;  %p998_p7 = scmp.lt.s32.totalorder %s4803_s29, 1  ;;  %s6061_s6 = sld [smem:[#allocation24_spill]] }
  0x4e   : > { %s6062_s23 = sld [smem:[#allocation26_spill]] }
  0x4f   : > { %s5043_s25 = scalar_select %p998_p7, %s4803_s29, 1 }
  0x50   : > { %s6063_s11 = sld [smem:[#allocation27_spill]] }
  0x51   : > { %s3994_s30 = sshll.u32 %s5043_s25, 4  ;;  %s6064_s13 = sld [smem:[#allocation28_spill]] }
  0x52   : > { %s1038_s5 = scalar_lea.vmem %s6012_s15, %s5043_s25  ;;  %s5101_s2 = scalar_lea.vmem %s6014_s17, %s3994_s30 }
  0x53   : > { %s5061_s24 = scalar_lea.vmem %s6061_s6, %s3994_s30  ;;  %s1049_s7 = scalar_lea.vmem %s6015_s18, %s5043_s25 }
  0x54   : > { %s5066_s29 = scalar_lea.vmem %s6062_s23, %s3994_s30  ;;  %s1057_s3 = scalar_lea.vmem %s6017_s20, %s5043_s25 }
  0x55   : > { %s6065_s4 = sld [smem:[#allocation13_spill]] }
  0x56   : > { %s5075_s0 = scalar_lea.vmem %s6063_s11, %s3994_s30 }
  0x57   : > { %s5084_s8 = scalar_lea.vmem %s6064_s13, %s3994_s30  ;;  %s3999_s13 = sshll.u32 %s5043_s25, 6 }
  0x58   : > { %s5111_s23 = scalar_lea.vmem %s6016_s19, %s3999_s13 }
  0x5b   : > { %p3899_p2 = scmp.ne.s32.totalorder %s6065_s4, 0 }
  0x5c   : > { %s6066_s28 = sld [smem:[#allocation18_spill]] (!%p3899_p2) }
  0x5d   : > { %1062 = sbr.rel (%p3899_p2) target bundleno = 315 (0x13b), region = 136  ;;  %s6067_s9 = sld [smem:[#allocation21_spill]] (!%p3899_p2) }
  0x62   : > { %v4465_v0 = vld [vmem:[%s6066_s28 + $0x10] sm:$0xff]   ;;  %v4466_v1 = vld [vmem:[%s6066_s28 + $0x8] sm:$0xff]   ;;  %vm1108_vm0 = vcmask 392192   ;;  %v4467_v3 = vld [vmem:[%s6066_s28] sm:$0xff]   ;;  %vm1173_vm1 = vcmask 253952   ;;  %vm1181_vm2 = vcmask 260096  }
  0x63   : > { %4108 = vmatprep.subr.bf16.mxu0 %v4465_v0  ;;  %v4468_v2 = vld [vmem:[#allocation3] sm:$0xff]   ;;  %v4469_v4 = vld [vmem:[#allocation3 + $0x8] sm:$0xff]   ;;  %v1170_v5 = vld [vmem:[#allocation8] sm:$0x1]  ;;  %v4818_v8 = vmov 0.0   ;;  %vm1176_vm3 = vcmask 261120  }
  0x64   : > { %4109 = vmatpush3.bf16.msra.mxu0 %v4465_v0  ;;  %4114 = vmatprep.mubr.msk.bf16.mxu0 %vm1108_vm0, %v4468_v2  ;;  %v1171_v6 = vld [vmem:[%s6067_s9] sm:$0x1]  ;;  %1182 = vst.msk [vmem:[#allocation2 + $0x11] sm:$0x7f] %vm1181_vm2, %v4818_v8  ;;  %1183 = vst.msk [vmem:[#allocation2 + $0x29] sm:$0x7f] %vm1181_vm2, %v4818_v8 }
  0x65   : > { %4110 = vmatprep.subr.bf16.mxu0 %v4466_v1  ;;  %v1172_v7 = vadd.f32 %v1171_v6, %v1170_v5  ;;  %v3900_v9 = vld [vmem:[#allocation6] ss:$0 sm:$0xff]  ;;  %v1164_v11 = vld [vmem:[%s6067_s9 + $0x1] sm:$0xff]  ;;  %v1165_v17 = vld [vmem:[%s6067_s9 + $0x9] sm:$0xff] }
  0x67   : > { %1174 = vst.msk [vmem:[#allocation2] sm:$0x1] %vm1173_vm1, %v1172_v7  ;;  %1175 = vst.msk [vmem:[#allocation2 + $0x18] sm:$0x1] %vm1173_vm1, %v1172_v7 }
  0x68   : > { %4111 = vmatpush3.bf16.msra.mxu0 %v4466_v1 }
  0x69   : > { %4112 = vmatprep.subr.bf16.mxu0 %v4467_v3 }
  0x6c   : > { %4113 = vmatpush3.bf16.msra.mxu0 %v4467_v3 }
  0x6f   : > { %4115 = vmatmul.mubr.msk.bf16.vlgmr.msra.gmra.mxu0 %vm1108_vm0, %v4469_v4 }
 0x12f   : > { %v4116_v10 = vpop.f32.mrf.mxu0 }
 0x130   : > { %v1158_v12 = vadd.f32 %v4116_v10, %v3900_v9 }
 0x131   : > { %v1149_v13 = vpop.f32.mrf.mxu0 }
 0x132   : > { %v1168_v14 = vadd.f32 %v1164_v11, %v1158_v12  ;;  %v1150_v15 = vadd.f32 %v3900_v9, %v1149_v13 }
 0x133   : > { %v4117_v16 = vpop.f32.mrf.mxu0 }
 0x134   : > { %1179 = vst.msk [vmem:[#allocation2 + $0x19] sm:$0xff] %vm1176_vm3, %v1168_v14  ;;  %v1166_v18 = vadd.f32 %v1164_v11, %v1150_v15  ;;  %v1161_v19 = vadd.f32 %v4117_v16, %v3900_v9 }
 0x135   : > { %v1152_v20 = vpop.f32.mrf.mxu0 }
 0x136   : > { %1177 = vst.msk [vmem:[#allocation2 + $0x1] sm:$0xff] %vm1176_vm3, %v1166_v18  ;;  %v1169_v21 = vadd.f32 %v1165_v17, %v1161_v19  ;;  %v1153_v22 = vadd.f32 %v3900_v9, %v1152_v20 }
 0x138   : > { %1180 = vst.msk [vmem:[#allocation2 + $0x21] sm:$0xff] %vm1176_vm3, %v1169_v21  ;;  %v1167_v23 = vadd.f32 %v1165_v17, %v1153_v22 }
 0x13a   : > { %1178 = vst.msk [vmem:[#allocation2 + $0x9] sm:$0xff] %vm1176_vm3, %v1167_v23 }
 0x13b PF: > { %vm1192_vm4 = vcmask 261120   ;;  %v1187_v29 = vld [vmem:[#allocation2 + $0x18] sm:$0xff]  ;;  %v4515_v2 = vld [vmem:[%s5061_s24 + $0x8] sm:$0xff]   ;;  %v4819_v4 = vmov 0.0   ;;  %v4516_v5 = vld [vmem:[%s5061_s24] sm:$0xff]   ;;  %vm4820_vm5 = vmmov 0   ;;  %s6076_s11 = scalar_lea.vmem %s6011_s14, %s5043_s25 }
 0x13c   : > { %v1202_v33 = vsel %vm1192_vm4, %v1187_v29, 0.0  ;;  %v5174_v3 = vld [vmem:[%s5066_s29 + $0x8] sm:$0xff]   ;;  %4118 = vmatprep.subr.bf16.mxu0 %v4819_v4  ;;  %4362 = vmatprep.subr.bf16.mxu1 %v4819_v4  ;;  %v4518_v6 = vld [vmem:[%s5066_s29] sm:$0xff]   ;;  %s6068_s30 = sld [smem:[#allocation22_spill]]  ;;  %s6074_s29 = scalar_lea.vmem %s6007_s10, %s5043_s25  ;;  %vm1632_vm6 = vcmask 64512   ;;  %vm2034_vm7 = vcmask 1043456  }
 0x13d   : > { %v1184_v24 = vld [vmem:[#allocation2] sm:$0xff]  ;;  %4119 = vmatpush3.bf16.msra.mxu0 %v4515_v2  ;;  %4364 = vmatpush3.bf16.msra.mxu1 %v5174_v3  ;;  %s6070_s21 = sld [smem:[#allocation23_spill]]  ;;  %s4823_s13 = smov 112   ;;  %vm1887_vm9 = vcmask 195584   ;;  %vm2296_vm10 = vcmask 130048  }
 0x13e   : > { %v1193_v27 = vsel %vm1192_vm4, %v1184_v24, 0.0  ;;  %4120 = vmatprep.subr.bf16.mxu0 %v4819_v4  ;;  %4122 = vmatprep.mubr.msk.bf16.mxu0 %vm4820_vm5, %v4819_v4  ;;  %s6072_s27 = sld [smem:[#allocation25_spill]]  ;;  %s4825_s26 = smov 16  }
 0x13f   : > { %v1188_v30 = vld [vmem:[#allocation2 + $0x20] sm:$0xff]  ;;  %v1189_v31 = vld [vmem:[#allocation2 + $0x28] sm:$0xff]  ;;  %1194 = vadd.xlane.f32.xlu0 %v1193_v27  ;;  %4363 = vmatprep.subr.bf16.mxu1 %v4819_v4 }
 0x140   : > { %v1205_v34 = vsel %vm1192_vm4, %v1188_v30, 0.0  ;;  %v1208_v35 = vsel %vm1192_vm4, %v1189_v31, 0.0  ;;  %4142 = vmatprep.mubr.msk.bf16.mxu1 %vm4820_vm5, %v4819_v4 }
 0x141   : > { %v1186_v25 = vld [vmem:[#allocation2 + $0x10] sm:$0xff]  ;;  %v1185_v26 = vld [vmem:[#allocation2 + $0x8] sm:$0xff]  ;;  %4121 = vmatpush3.bf16.msra.mxu0 %v4516_v5  ;;  %4365 = vmatpush3.bf16.msra.mxu1 %v4518_v6 }
 0x142   : > { %v1199_v28 = vsel %vm1192_vm4, %v1186_v25, 0.0  ;;  %v1196_v32 = vsel %vm1192_vm4, %v1185_v26, 0.0  ;;  %4134 = vmatprep.subr.bf16.mxu0 %v4819_v4  ;;  %s6069_s6 = scalar_lea.vmem %s6068_s30, %s5043_s25  ;;  %s4821_s30 = smov 120  }
 0x143   : > { %1200 = vadd.xlane.f32.xlu1 %v1199_v28  ;;  %1197 = vadd.xlane.f32.xlu0 %v1196_v32  ;;  %v3908_v27 = vld [vmem:[%s6069_s6] ss:$0 sm:$0xff]  ;;  %s6071_s22 = scalar_lea.vmem %s6070_s21, %s5043_s25  ;;  %s4822_s6 = smov 104  }
 0x144   : > { %v3909_v32 = vld [vmem:[%s6071_s22] ss:$0 sm:$0xff]  ;;  %s6073_s4 = scalar_lea.vmem %s6072_s27, %s5043_s25  ;;  %s6075_s22 = scalar_lea.vmem %s6009_s12, %s5043_s25 }
 0x145   : > { %s4826_s27 = smov 24  }
 0x147   : > { %1203 = vadd.xlane.f32.xlu1 %v1202_v33  ;;  %1206 = vadd.xlane.f32.xlu0 %v1205_v34 }
 0x14b   : > { %1209 = vadd.xlane.f32.xlu1 %v1208_v35 }
 0x1c8   : > { %v1195_v36 = vpop.xlane.xlu0 %1194 }
 0x1c9   : > { %v1212_v38 = vmul.f32 0.03125, %v1195_v36 }
 0x1cb   : > { %v5142_v40 = vsub.f32 %v1184_v24, %v1212_v38 }
 0x1cc   : > { %v1201_v37 = vpop.xlane.xlu1 %1200  ;;  %v1198_v42 = vpop.xlane.xlu0 %1197 }
 0x1cd   : > { %v1214_v39 = vmul.f32 0.03125, %v1201_v37  ;;  %v1213_v44 = vmul.f32 0.03125, %v1198_v42  ;;  %v1224_v46 = vmul.f32 %v5142_v40, %v5142_v40 }
 0x1cf   : > { %v5144_v41 = vsub.f32 %v1186_v25, %v1214_v39  ;;  %v5150_v48 = vsub.f32 %v1185_v26, %v1213_v44  ;;  %v1230_v50 = vsel %vm1192_vm4, %v1224_v46, 0.0 }
 0x1d0   : > { %v1204_v43 = vpop.xlane.xlu1 %1203  ;;  %1231 = vadd.xlane.f32.xlu0 %v1230_v50  ;;  %v1207_v51 = vpop.xlane.xlu0 %1206 }
 0x1d1   : > { %v1215_v45 = vmul.f32 0.03125, %v1204_v43  ;;  %v1226_v47 = vmul.f32 %v5144_v41, %v5144_v41  ;;  %v1216_v54 = vmul.f32 0.03125, %v1207_v51  ;;  %v1225_v56 = vmul.f32 %v5150_v48, %v5150_v48 }
 0x1d3   : > { %v5152_v49 = vsub.f32 %v1187_v29, %v1215_v45  ;;  %v1236_v53 = vsel %vm1192_vm4, %v1226_v47, 0.0  ;;  %v5160_v58 = vsub.f32 %v1188_v30, %v1216_v54  ;;  %v1233_v60 = vsel %vm1192_vm4, %v1225_v56, 0.0  ;;  %v4519_v54 = vld [vmem:[%s5075_s0 + $0x8] sm:$0xff]   ;;  %v3910_v56 = vld [vmem:[%s6073_s4] ss:$0 sm:$0xff] }
 0x1d4   : > { %v1210_v52 = vpop.xlane.xlu1 %1209  ;;  %1237 = vadd.xlane.f32.xlu0 %v1236_v53  ;;  %1234 = vadd.xlane.f32.xlu1 %v1233_v60 }
 0x1d5   : > { %v1217_v55 = vmul.f32 0.03125, %v1210_v52  ;;  %v1227_v57 = vmul.f32 %v5152_v49, %v5152_v49  ;;  %v1228_v62 = vmul.f32 %v5160_v58, %v5160_v58 }
 0x1d7   : > { %v5162_v59 = vsub.f32 %v1189_v31, %v1217_v55  ;;  %v1239_v61 = vsel %vm1192_vm4, %v1227_v57, 0.0  ;;  %v1242_v0 = vsel %vm1192_vm4, %v1228_v62, 0.0  ;;  %v4520_v55 = vld [vmem:[%s5075_s0] sm:$0xff]   ;;  %s4824_s0 = smov 8  }
 0x1d8   : > { %1240 = vadd.xlane.f32.xlu1 %v1239_v61  ;;  %1243 = vadd.xlane.f32.xlu0 %v1242_v0 }
 0x1d9   : > { %v1229_v63 = vmul.f32 %v5162_v59, %v5162_v59 }
 0x1db   : > { %v1245_v1 = vsel %vm1192_vm4, %v1229_v63, 0.0  ;;  %v3916_v63 = vld [vmem:[%s6074_s29] ss:$0 sm:$0xff] }
 0x1dc   : > { %1246 = vadd.xlane.f32.xlu1 %v1245_v1 }
 0x259   : > { %v1232_v7 = vpop.xlane.xlu0 %1231 }
 0x25a   : > { %v1248_v8 = vmul.f32 0.03125, %v1232_v7 }
 0x25c   : > { %v1254_v9 = vadd.f32 1e-05, %v1248_v8 }
 0x25d   : > { %v1235_v10 = vpop.xlane.xlu1 %1234  ;;  %v1238_v11 = vpop.xlane.xlu0 %1237 }
 0x25e   : > { %4533 = vrsqrt.f32 %v1254_v9  ;;  %v1249_v12 = vmul.f32 0.03125, %v1235_v10  ;;  %v1250_v13 = vmul.f32 0.03125, %v1238_v11 }
 0x260   : > { %v1255_v14 = vadd.f32 1e-05, %v1249_v12  ;;  %v1256_v15 = vadd.f32 1e-05, %v1250_v13 }
 0x261   : > { %v1241_v16 = vpop.xlane.xlu1 %1240  ;;  %v1244_v17 = vpop.xlane.xlu0 %1243 }
 0x262   : > { %4535 = vrsqrt.f32 %v1255_v14  ;;  %v1251_v18 = vmul.f32 0.03125, %v1241_v16  ;;  %v1252_v19 = vmul.f32 0.03125, %v1244_v17 }
 0x263   : > { %4537 = vrsqrt.f32 %v1256_v15 }
 0x264   : > { %v1257_v20 = vadd.f32 1e-05, %v1251_v18  ;;  %v1258_v21 = vadd.f32 1e-05, %v1252_v19 }
 0x265   : > { %v1247_v22 = vpop.xlane.xlu1 %1246 }
 0x266   : > { %4539 = vrsqrt.f32 %v1257_v20  ;;  %v1253_v23 = vmul.f32 0.03125, %v1247_v22 }
 0x267   : > { %4541 = vrsqrt.f32 %v1258_v21 }
 0x268   : > { %v1259_v24 = vadd.f32 1e-05, %v1253_v23 }
 0x26a   : > { %4543 = vrsqrt.f32 %v1259_v24 }
 0x26b   : > { %v4534_v25 = vpop.eup %4533 }
 0x26c   : > { %v1266_v26 = vmul.f32 %v4534_v25, %v5142_v40 }
 0x26e   : > { %v1278_v31 = vmul.f32 %v3908_v27, %v1266_v26 }
 0x26f   : > { %v4536_v28 = vpop.eup %4535 }
 0x270   : > { %v4538_v29 = vpop.eup %4537  ;;  %v1267_v30 = vmul.f32 %v4536_v28, %v5150_v48  ;;  %v1290_v36 = vadd.f32 %v3909_v32, %v1278_v31 }
 0x271   : > { %v1268_v33 = vmul.f32 %v4538_v29, %v5144_v41 }
 0x272   : > { %v1279_v34 = vmul.f32 %v3908_v27, %v1267_v30 }
 0x273   : > { %v4540_v35 = vpop.eup %4539  ;;  %v1280_v39 = vmul.f32 %v3908_v27, %v1268_v33 }
 0x274   : > { %v1291_v37 = vadd.f32 %v3909_v32, %v1279_v34  ;;  %v1269_v38 = vmul.f32 %v4540_v35, %v5152_v49  ;;  %v4542_v40 = vpop.eup %4541 }
 0x275   : > { %v1292_v45 = vadd.f32 %v3909_v32, %v1280_v39  ;;  %v1270_v47 = vmul.f32 %v4542_v40, %v5160_v58 }
 0x276   : > { %v1296_v42 = vpack.c.bf16 %v1291_v37, %v1290_v36  ;;  %v1281_v43 = vmul.f32 %v3908_v27, %v1269_v38 }
 0x277   : > { %v4544_v44 = vpop.eup %4543  ;;  %v1282_v50 = vmul.f32 %v3908_v27, %v1270_v47 }
 0x278   : > { %4123 = vmatmul.mubr.msk.bf16.vlgmr.msra.gmra.mxu0 %vm1192_vm4, %v1296_v42  ;;  %v1293_v46 = vadd.f32 %v3909_v32, %v1281_v43  ;;  %v1271_v48 = vmul.f32 %v4544_v44, %v5162_v59  ;;  %v3922_v44 = vld [vmem:[%s6075_s22] ss:$0 sm:$0xff] }
 0x279   : > { %4126 = vmatprep.mubr.msk.bf16.mxu0 %vm4820_vm5, %v4819_v4  ;;  %4135 = vmatpush3.bf16.msra.mxu0 %v5174_v3  ;;  %v1294_v52 = vadd.f32 %v3909_v32, %v1282_v50 }
 0x27a   : > { %v1297_v41 = vpack.c.bf16 %v1293_v46, %v1292_v45  ;;  %v1283_v49 = vmul.f32 %v3908_v27, %v1271_v48  ;;  %4136 = vmatprep.subr.bf16.mxu0 %v4819_v4 }
 0x27c   : > { %4143 = vmatmul.mubr.msk.bf16.vlgmr.msra.gmra.mxu1 %vm1192_vm4, %v1297_v41  ;;  %v1295_v51 = vadd.f32 %v3909_v32, %v1283_v49 }
 0x27d   : > { %4146 = vmatprep.mubr.msk.bf16.mxu1 %vm4820_vm5, %v4819_v4  ;;  %4137 = vmatpush3.bf16.msra.mxu0 %v4518_v6 }
 0x27e   : > { %4150 = vmatprep.subr.bf16.mxu0 %v4819_v4  ;;  %v1298_v53 = vpack.c.bf16 %v1295_v51, %v1294_v52 }
 0x280   : > { %4127 = vmatmul.mubr.msk.bf16.gmra.mxu0 %vm1192_vm4, %v1297_v41 }
 0x281   : > { %4130 = vmatprep.mubr.msk.bf16.mxu0 %vm4820_vm5, %v4819_v4 }
 0x284   : > { %4147 = vmatmul.mubr.msk.bf16.gmra.mxu1 %vm1192_vm4, %v1298_v53 }
 0x288   : > { %4131 = vmatmul.mubr.msk.bf16.gmra.mxu0 %vm1192_vm4, %v1298_v53 }
 0x289   : > { %4138 = vmatprep.mubr.msk.bf16.mxu0 %vm4820_vm5, %v4819_v4 }
 0x290   : > { %4139 = vmatmul.mubr.msk.bf16.vlgmr.msra.gmra.mxu0 %vm1192_vm4, %v1296_v42 }
 0x291   : > { %4151 = vmatpush3.bf16.msra.mxu0 %v4519_v54  ;;  %4154 = vmatprep.mubr.msk.bf16.mxu0 %vm4820_vm5, %v4819_v4 }
 0x292   : > { %4152 = vmatprep.subr.bf16.mxu0 %v4819_v4 }
 0x295   : > { %4153 = vmatpush3.bf16.msra.mxu0 %v4520_v55 }
 0x298   : > { %4155 = vmatmul.mubr.msk.bf16.vlgmr.msra.gmra.mxu0 %vm1192_vm4, %v1296_v42 }
 0x299   : > { %4158 = vmatprep.mubr.msk.bf16.mxu0 %vm4820_vm5, %v4819_v4 }
 0x2a0   : > { %4159 = vmatmul.mubr.msk.bf16.gmra.mxu0 %vm1192_vm4, %v1297_v41 }
 0x2a1   : > { %4162 = vmatprep.mubr.msk.bf16.mxu0 %vm4820_vm5, %v4819_v4 }
 0x2a8   : > { %4163 = vmatmul.mubr.msk.bf16.gmra.mxu0 %vm1192_vm4, %v1298_v53 }
 0x338   : > { %v1365_v57 = vpop.f32.mrf.mxu0 }
 0x339   : > { %v1366_v59 = vadd.f32 %v3910_v56, %v1365_v57 }
 0x33a   : > { %v4124_v58 = vpop.f32.mrf.mxu0 }
 0x33b   : > { %v1548_v2 = vmul.f32 0.35355338, %v1366_v59 }
 0x33c   : > { %v1368_v60 = vpop.f32.mrf.mxu0  ;;  %v1453_v61 = vpop.f32.mrf.mxu1 }
 0x33d   : > { %v1369_v62 = vadd.f32 %v3910_v56, %v1368_v60  ;;  %v1454_v8 = vadd.f32 %v3916_v63, %v1453_v61 }
 0x33e   : > { %v4125_v0 = vpop.f32.mrf.mxu0  ;;  %v4144_v1 = vpop.f32.mrf.mxu1 }
 0x33f   : > { %v1549_v3 = vmul.f32 0.35355338, %v1369_v62 }
 0x340   : > { %v1373_v5 = vpop.f32.mrf.mxu0  ;;  %v1456_v6 = vpop.f32.mrf.mxu1 }
 0x341   : > { %v1554_v7 = vpack.c.bf16 %v1549_v3, %v1548_v2  ;;  %v1457_v9 = vadd.f32 %v3916_v63, %v1456_v6  ;;  %v1374_v43 = vadd.f32 %v3910_v56, %v1373_v5 }
 0x342   : > { %v4128_v10 = vpop.f32.mrf.mxu0  ;;  %v4145_v11 = vpop.f32.mrf.mxu1 }
 0x343   : > { %v5243_v12 = vpack.c.bf16 %v1457_v9, %v1454_v8  ;;  %4170 = vmatprep.mubr.msk.bf16.mxu1 %vm1632_vm6, %v1554_v7  ;;  %v1550_v49 = vmul.f32 0.35355338, %v1374_v43 }
 0x344   : > { %v1376_v13 = vpop.f32.mrf.mxu0  ;;  %v1461_v14 = vpop.f32.mrf.mxu1 }
 0x345   : > { %v1462_v15 = vadd.f32 %v3916_v63, %v1461_v14  ;;  %1589 = vrot.lane.b32.xlu0 %v5243_v12, %s4821_s30  ;;  %4366 = vmatprep.subr.msk.bf16.mxu1 %vm1632_vm6, %v5243_v12  ;;  %v1643_v16 = vsel %vm1632_vm6, %v5243_v12, 0  ;;  %v1377_v39 = vadd.f32 %v3910_v56, %v1376_v13 }
 0x346   : > { %v4129_v17 = vpop.f32.mrf.mxu0  ;;  %v4148_v18 = vpop.f32.mrf.mxu1  ;;  %4167 = vmatpush3.bf16.xpose.msra.mxu1 %v1643_v16 }
 0x347   : > { %v1551_v46 = vmul.f32 0.35355338, %v1377_v39 }
 0x348   : > { %v1381_v19 = vpop.f32.mrf.mxu0  ;;  %v1464_v20 = vpop.f32.mrf.mxu1 }
 0x349   : > { %v1382_v21 = vadd.f32 %v3910_v56, %v1381_v19  ;;  %v1465_v22 = vadd.f32 %v3916_v63, %v1464_v20  ;;  %1601 = vrot.lane.b32.xlu0 %v5243_v12, %s4822_s6  ;;  %v5272_v52 = vpack.c.bf16 %v1551_v46, %v1550_v49 }
 0x34a   : > { %v4132_v23 = vpop.f32.mrf.mxu0  ;;  %v4149_v24 = vpop.f32.mrf.mxu1 }
 0x34b   : > { %v5254_v25 = vpack.c.bf16 %v1465_v22, %v1462_v15  ;;  %v1552_v29 = vmul.f32 0.35355338, %v1382_v21  ;;  %v1629_v24 = vlaneseq }
 0x34c   : > { %v1384_v26 = vpop.f32.mrf.mxu0 }
 0x34d   : > { %v1385_v27 = vadd.f32 %v3910_v56, %v1384_v26  ;;  %v5334_v26 = vand.u32 127, %v1629_v24 }
 0x34e   : > { %v4133_v28 = vpop.f32.mrf.mxu0 }
 0x34f   : > { %v1553_v30 = vmul.f32 0.35355338, %v1385_v27  ;;  %vm1631_vm8 = vcmp.lt.s32.totalorder %v5334_v26, 17 }
 0x350   : > { %v1445_v31 = vpop.f32.mrf.mxu0 }
 0x351   : > { %v5256_v32 = vpack.c.bf16 %v1553_v30, %v1552_v29  ;;  %v1446_v35 = vadd.f32 %v3916_v63, %v1445_v31 }
 0x352   : > { %v4140_v33 = vpop.f32.mrf.mxu0 }
 0x354   : > { %v1448_v34 = vpop.f32.mrf.mxu0 }
 0x355   : > { %v1449_v36 = vadd.f32 %v3916_v63, %v1448_v34 }
 0x356   : > { %v4141_v37 = vpop.f32.mrf.mxu0 }
 0x357   : > { %v1557_v38 = vpack.c.bf16 %v1449_v36, %v1446_v35 }
 0x358   : > { %v1525_v40 = vpop.f32.mrf.mxu0 }
 0x359   : > { %1593 = vrot.lane.b32.xlu0 %v1557_v38, %s4823_s13  ;;  %1587 = vrot.lane.b32.xlu1 %v1557_v38, %s4821_s30  ;;  %v1640_v42 = vsel %vm1632_vm6, %v1557_v38, 0  ;;  %v1526_v48 = vadd.f32 %v3922_v44, %v1525_v40 }
 0x35a   : > { %4367 = vmatprep.subr.msk.bf16.mxu1 %vm1632_vm6, %v1557_v38  ;;  %v4156_v45 = vpop.f32.mrf.mxu0 }
 0x35b   : > { %4169 = vmatpush3.bf16.xpose.msra.mxu1 %v1640_v42 }
 0x35c   : > { %v1528_v47 = vpop.f32.mrf.mxu0 }
 0x35d   : > { %v1529_v41 = vadd.f32 %v3922_v44, %v1528_v47  ;;  %1572 = vrot.lane.b32.xlu0 %v1554_v7, %s4823_s13  ;;  %1595 = vrot.lane.b32.xlu1 %v5243_v12, %s4823_s13 }
 0x35e   : > { %v4157_v50 = vpop.f32.mrf.mxu0 }
 0x35f   : > { %v5270_v51 = vpack.c.bf16 %v1529_v41, %v1526_v48 }
 0x360   : > { %v1533_v53 = vpop.f32.mrf.mxu0 }
 0x361   : > { %1578 = vrot.lane.b32.xlu0 %v1554_v7, %s4822_s6  ;;  %1566 = vrot.lane.b32.xlu1 %v1554_v7, %s4821_s30  ;;  %v1534_v56 = vadd.f32 %v3922_v44, %v1533_v53 }
 0x362   : > { %4171 = vmatmul.mubr.msk.bf16.vlgmr.msra.gmra.mxu1 %vm1632_vm6, %v5272_v52  ;;  %v4160_v54 = vpop.f32.mrf.mxu0 }
 0x364   : > { %v1536_v55 = vpop.f32.mrf.mxu0 }
 0x365   : > { %v1537_v57 = vadd.f32 %v3922_v44, %v1536_v55  ;;  %1568 = vrot.lane.b32.xlu1 %v5272_v52, %s4821_s30 }
 0x366   : > { %v4161_v58 = vpop.f32.mrf.mxu0 }
 0x367   : > { %v5280_v59 = vpack.c.bf16 %v1537_v57, %v1534_v56 }
 0x368   : > { %v1541_v60 = vpop.f32.mrf.mxu0 }
 0x369   : > { %v1542_v61 = vadd.f32 %v3922_v44, %v1541_v60  ;;  %1599 = vrot.lane.b32.xlu1 %v1557_v38, %s4822_s6  ;;  %v2036_v22 = vsel %vm2034_vm7, %v5280_v59, 0 }
 0x36a   : > { %v4164_v62 = vpop.f32.mrf.mxu0 }
 0x36c   : > { %v1544_v63 = vpop.f32.mrf.mxu0 }
 0x36d   : > { %v1545_v0 = vadd.f32 %v3922_v44, %v1544_v63  ;;  %1574 = vrot.lane.b32.xlu1 %v5272_v52, %s4823_s13 }
 0x36e   : > { %v4165_v1 = vpop.f32.mrf.mxu0 }
 0x36f   : > { %v5285_v2 = vpack.c.bf16 %v1545_v0, %v1542_v61 }
 0x371   : > { %1580 = vrot.lane.b32.xlu1 %v5272_v52, %s4822_s6 }
 0x3b7   : > { %v5289_v3 = vpop.permute.xlu0 %1589 }
 0x3b8   : > { %4368 = vmatprep.subr.msk.bf16.mxu1 %vm1632_vm6, %v5289_v3  ;;  %v1703_v5 = vsel %vm1632_vm6, %v5289_v3, 0 }
 0x3b9   : > { %4175 = vmatpush3.bf16.xpose.msra.mxu1 %v1703_v5 }
 0x3bb   : > { %v5295_v6 = vpop.permute.xlu0 %1601 }
 0x3bc   : > { %v1823_v17 = vsel %vm1632_vm6, %v5295_v6, 0 }
 0x3cb   : > { %v1588_v7 = vpop.permute.xlu1 %1587  ;;  %v1594_v8 = vpop.permute.xlu0 %1593 }
 0x3cc   : > { %v1700_v9 = vsel %vm1632_vm6, %v1588_v7, 0  ;;  %4369 = vmatprep.subr.msk.bf16.mxu1 %vm1632_vm6, %v1588_v7  ;;  %v1760_v16 = vsel %vm1632_vm6, %v1594_v8, 0 }
 0x3cd   : > { %4177 = vmatpush3.bf16.xpose.msra.mxu1 %v1700_v9 }
 0x3ce   : > { %4372 = vmatprep.subr.msk.bf16.mxu1 %vm1632_vm6, %v5295_v6 }
 0x3cf   : > { %v5301_v10 = vpop.permute.xlu1 %1595  ;;  %v1573_v11 = vpop.permute.xlu0 %1572 }
 0x3d0   : > { %4370 = vmatprep.subr.msk.bf16.mxu0 %vm1632_vm6, %v5301_v10  ;;  %4186 = vmatprep.mubr.msk.bf16.mxu0 %vm1632_vm6, %v1573_v11  ;;  %v1763_v13 = vsel %vm1632_vm6, %v5301_v10, 0 }
 0x3d1   : > { %4183 = vmatpush3.bf16.xpose.msra.mxu0 %v1763_v13 }
 0x3d2   : > { %4371 = vmatprep.subr.msk.bf16.mxu0 %vm1632_vm6, %v1594_v8 }
 0x3d3   : > { %v1567_v14 = vpop.permute.xlu1 %1566  ;;  %v1579_v18 = vpop.permute.xlu0 %1578 }
 0x3d4   : > { %4178 = vmatprep.mubr.msk.bf16.mxu1 %vm1632_vm6, %v1567_v14 }
 0x3d7   : > { %v5310_v15 = vpop.permute.xlu1 %1568 }
 0x3d8   : > { %4179 = vmatmul.mubr.msk.bf16.vlgmr.msra.gmra.mxu1 %vm1632_vm6, %v5310_v15 }
 0x3d9   : > { %4191 = vmatpush3.bf16.xpose.msra.mxu1 %v1823_v17  ;;  %4185 = vmatpush3.bf16.xpose.msra.mxu0 %v1760_v16 }
 0x3da   : > { %4194 = vmatprep.mubr.msk.bf16.mxu1 %vm1632_vm6, %v1579_v18  ;;  %4374 = vmatprep.subr.msk.bf16.mxu0 %vm2034_vm7, %v5280_v59 }
 0x3db   : > { %v1600_v19 = vpop.permute.xlu1 %1599 }
 0x3dc   : > { %4373 = vmatprep.subr.msk.bf16.mxu1 %vm1632_vm6, %v1600_v19  ;;  %v1820_v21 = vsel %vm1632_vm6, %v1600_v19, 0 }
 0x3df   : > { %v5321_v20 = vpop.permute.xlu1 %1574 }
 0x3e0   : > { %4187 = vmatmul.mubr.msk.bf16.vlgmr.msra.gmra.mxu0 %vm1632_vm6, %v5321_v20 }
 0x3e1   : > { %4193 = vmatpush3.bf16.xpose.msra.mxu1 %v1820_v21  ;;  %4199 = vmatpush3.bf16.msra.mxu0 %v2036_v22 }
 0x3e2   : > { %4200 = vmatprep.subr.bf16.mxu0 %v5270_v51 }
 0x3e3   : > { %v5330_v23 = vpop.permute.xlu1 %1580 }
 0x3e5   : > { %4201 = vmatpush3.bf16.msra.mxu0 %v5270_v51 }
 0x3e8   : > { %4195 = vmatmul.mubr.msk.bf16.vlgmr.msra.gmra.mxu1 %vm1632_vm6, %v5330_v23 }
 0x422   : > { %v4172_v27 = vpop.f32.mrf.mxu1 }
 0x423   : > { %v1877_v28 = vsel %vm1631_vm8, %v4172_v27, -1e+30 }
 0x424   : > { %v1679_v29 = vpop.f32.mrf.mxu1  ;;  %v1894_v30 = vsel %vm1887_vm9, %v1877_v28, -inf }
 0x425   : > { %v1875_v31 = vsel %vm1631_vm8, %v1679_v29, -1e+30  ;;  %1895 = vmax.xlane.f32.xlu0 %v1894_v30 }
 0x426   : > { %v4173_v33 = vpop.f32.mrf.mxu1  ;;  %v1888_v35 = vsel %vm1887_vm9, %v1875_v31, -inf }
 0x428   : > { %v1682_v34 = vpop.f32.mrf.mxu1 }
 0x429   : > { %v1876_v36 = vsel %vm1631_vm8, %v1682_v34, -1e+30  ;;  %1889 = vmax.xlane.f32.xlu0 %v1888_v35 }
 0x42a   : > { %v1891_v37 = vsel %vm1887_vm9, %v1876_v36, -inf }
 0x42b   : > { %1892 = vmax.xlane.f32.xlu1 %v1891_v37 }
 0x498   : > { %v4180_v38 = vpop.f32.mrf.mxu1 }
 0x499   : > { %v5348_v39 = vsel %vm1631_vm8, %v4180_v38, -1e+30 }
 0x49a   : > { %v1739_v40 = vpop.f32.mrf.mxu1  ;;  %v1903_v42 = vsel %vm1887_vm9, %v5348_v39, -inf }
 0x49b   : > { %1904 = vmax.xlane.f32.xlu1 %v1903_v42  ;;  %v5360_v48 = vsel %vm1631_vm8, %v1739_v40, -1e+30 }
 0x49c   : > { %v4181_v43 = vpop.f32.mrf.mxu1  ;;  %v1897_v53 = vsel %vm1887_vm9, %v5360_v48, -inf }
 0x49e   : > { %v1742_v49 = vpop.f32.mrf.mxu1 }
 0x49f   : > { %v5379_v62 = vsel %vm1631_vm8, %v1742_v49, -1e+30 }
 0x4a0   : > { %v4188_v44 = vpop.f32.mrf.mxu0  ;;  %v1900_v7 = vsel %vm1887_vm9, %v5379_v62, -inf }
 0x4a1   : > { %v5354_v45 = vsel %vm1631_vm8, %v4188_v44, -1e+30 }
 0x4a2   : > { %v1799_v46 = vpop.f32.mrf.mxu0  ;;  %v1912_v47 = vsel %vm1887_vm9, %v5354_v45, -inf }
 0x4a3   : > { %1913 = vmax.xlane.f32.xlu0 %v1912_v47  ;;  %v5366_v54 = vsel %vm1631_vm8, %v1799_v46, -1e+30 }
 0x4a4   : > { %v4189_v41 = vpop.f32.mrf.mxu0  ;;  %v1906_v61 = vsel %vm1887_vm9, %v5366_v54, -inf }
 0x4a6   : > { %v1802_v50 = vpop.f32.mrf.mxu0 }
 0x4a7   : > { %v1882_v55 = vsel %vm1631_vm8, %v1802_v50, -1e+30  ;;  %1898 = vmax.xlane.f32.xlu0 %v1897_v53 }
 0x4a8   : > { %v4196_v56 = vpop.f32.mrf.mxu1  ;;  %v1909_v57 = vsel %vm1887_vm9, %v1882_v55, -inf }
 0x4a9   : > { %v5373_v58 = vsel %vm1631_vm8, %v4196_v56, -1e+30  ;;  %1910 = vmax.xlane.f32.xlu1 %v1909_v57 }
 0x4aa   : > { %v1859_v60 = vpop.f32.mrf.mxu1  ;;  %v1921_v0 = vsel %vm1887_vm9, %v5373_v58, -inf }
 0x4ab   : > { %1907 = vmax.xlane.f32.xlu0 %v1906_v61  ;;  %v5385_v1 = vsel %vm1631_vm8, %v1859_v60, -1e+30 }
 0x4ac   : > { %v4197_v63 = vpop.f32.mrf.mxu1  ;;  %v1915_v9 = vsel %vm1887_vm9, %v5385_v1, -inf }
 0x4ad   : > { %1922 = vmax.xlane.f32.xlu1 %v1921_v0 }
 0x4ae   : > { %v1862_v5 = vpop.f32.mrf.mxu1  ;;  %v1896_v13 = vpop.xlane.xlu0 %1895 }
 0x4af   : > { %v5391_v8 = vsel %vm1631_vm8, %v1862_v5, -1e+30  ;;  %1901 = vmax.xlane.f32.xlu0 %v1900_v7  ;;  %v1926_v14 = vsub.f32 %v1877_v28, %v1896_v13 }
 0x4b0   : > { %v1918_v11 = vsel %vm1887_vm9, %v5391_v8, -inf }
 0x4b1   : > { %1916 = vmax.xlane.f32.xlu1 %v1915_v9  ;;  %v1940_v18 = vmul.f32 1.442695, %v1926_v14 }
 0x4b2   : > { %v1890_v16 = vpop.xlane.xlu0 %1889 }
 0x4b3   : > { %1919 = vmax.xlane.f32.xlu0 %v1918_v11  ;;  %v1924_v19 = vsub.f32 %v1875_v31, %v1890_v16  ;;  %4545 = vpow2.f32 %v1940_v18 }
 0x4b4   : > { %v1893_v17 = vpop.xlane.xlu1 %1892 }
 0x4b5   : > { %v1925_v21 = vsub.f32 %v1876_v36, %v1893_v17  ;;  %v1936_v22 = vmul.f32 1.442695, %v1924_v19 }
 0x4b7   : > { %v1938_v24 = vmul.f32 1.442695, %v1925_v21  ;;  %4547 = vpow2.f32 %v1936_v22 }
 0x4b9   : > { %4549 = vpow2.f32 %v1938_v24 }
 0x4c0   : > { %v5405_v27 = vpop.eup %4545 }
 0x4c1   : > { %v1966_v29 = vsel %vm1887_vm9, %v5405_v27, 0.0 }
 0x4c2   : > { %1608 = vrot.lane.b32.xlu1 %v5270_v51, %s4821_s30 }
 0x4c4   : > { %v5409_v30 = vpop.eup %4547 }
 0x4c5   : > { %v1960_v28 = vsel %vm1887_vm9, %v5409_v30, 0.0 }
 0x4c6   : > { %1617 = vrot.lane.b32.xlu1 %v5280_v59, %s4823_s13  ;;  %v5411_v33 = vpop.eup %4549 }
 0x4c7   : > { %v1963_v31 = vsel %vm1887_vm9, %v5411_v33, 0.0 }
 0x4c9   : > { %1610 = vrot.lane.b32.xlu0 %v5280_v59, %s4821_s30 }
 0x4ca   : > { %1624 = vrot.lane.b32.xlu1 %v5280_v59, %s4822_s6 }
 0x4e8   : > { %1967 = vadd.xlane.f32.xlu0 %v1966_v29 }
 0x4ec   : > { %1961 = vadd.xlane.f32.xlu0 %v1960_v28 }
 0x4ee   : > { %1964 = vadd.xlane.f32.xlu1 %v1963_v31 }
 0x524   : > { %v1905_v34 = vpop.xlane.xlu1 %1904 }
 0x525   : > { %v1929_v35 = vsub.f32 %v5348_v39, %v1905_v34 }
 0x527   : > { %v1946_v36 = vmul.f32 1.442695, %v1929_v35 }
 0x529   : > { %4551 = vpow2.f32 %v1946_v36 }
 0x52c   : > { %v1914_v37 = vpop.xlane.xlu0 %1913 }
 0x52d   : > { %v1932_v38 = vsub.f32 %v5354_v45, %v1914_v37 }
 0x52f   : > { %v1952_v40 = vmul.f32 1.442695, %v1932_v38 }
 0x530   : > { %v1899_v42 = vpop.xlane.xlu0 %1898 }
 0x531   : > { %4553 = vpow2.f32 %v1952_v40  ;;  %v1927_v43 = vsub.f32 %v5360_v48, %v1899_v42 }
 0x532   : > { %v1911_v44 = vpop.xlane.xlu1 %1910 }
 0x533   : > { %v1942_v46 = vmul.f32 1.442695, %v1927_v43  ;;  %v1931_v47 = vsub.f32 %v1882_v55, %v1911_v44 }
 0x534   : > { %v1908_v41 = vpop.xlane.xlu0 %1907 }
 0x535   : > { %4555 = vpow2.f32 %v1942_v46  ;;  %v1950_v49 = vmul.f32 1.442695, %v1931_v47  ;;  %v1930_v50 = vsub.f32 %v5366_v54, %v1908_v41 }
 0x536   : > { %v5421_v53 = vpop.eup %4551  ;;  %v1923_v39 = vpop.xlane.xlu1 %1922 }
 0x537   : > { %4557 = vpow2.f32 %v1950_v49  ;;  %v1948_v56 = vmul.f32 1.442695, %v1930_v50  ;;  %v1935_v45 = vsub.f32 %v5373_v58, %v1923_v39  ;;  %v1975_v57 = vsel %vm1887_vm9, %v5421_v53, 0.0 }
 0x538   : > { %1976 = vadd.xlane.f32.xlu1 %v1975_v57  ;;  %v1902_v48 = vpop.xlane.xlu0 %1901 }
 0x539   : > { %4559 = vpow2.f32 %v1948_v56  ;;  %v1958_v60 = vmul.f32 1.442695, %v1935_v45  ;;  %v1928_v55 = vsub.f32 %v5379_v62, %v1902_v48 }
 0x53a   : > { %v1917_v61 = vpop.xlane.xlu1 %1916 }
 0x53b   : > { %4561 = vpow2.f32 %v1958_v60  ;;  %v1944_v63 = vmul.f32 1.442695, %v1928_v55  ;;  %v1933_v54 = vsub.f32 %v5385_v1, %v1917_v61  ;;  %v2308_v60 = vrot.slane %v5254_v25, 4 }
 0x53c   : > { %v1920_v0 = vpop.xlane.xlu0 %1919 }
 0x53d   : > { %4563 = vpow2.f32 %v1944_v63  ;;  %v1954_v5 = vmul.f32 1.442695, %v1933_v54  ;;  %v1934_v34 = vsub.f32 %v5391_v8, %v1920_v0 }
 0x53e   : > { %v5428_v7 = vpop.eup %4553  ;;  %v1609_v58 = vpop.permute.xlu1 %1608 }
 0x53f   : > { %4565 = vpow2.f32 %v1954_v5  ;;  %v1984_v9 = vsel %vm1887_vm9, %v5428_v7, 0.0  ;;  %v1956_v35 = vmul.f32 1.442695, %v1934_v34 }
 0x540   : > { %1985 = vadd.xlane.f32.xlu0 %v1984_v9  ;;  %v5432_v11 = vpop.permute.xlu0 %1610 }
 0x541   : > { %4375 = vmatprep.subr.msk.bf16.mxu0 %vm2034_vm7, %v5432_v11  ;;  %4567 = vpow2.f32 %v1956_v35  ;;  %v2093_v39 = vsel %vm2034_vm7, %v5432_v11, 0 }
 0x542   : > { %v5436_v62 = vpop.eup %4555  ;;  %v5438_v13 = vpop.permute.xlu1 %1617 }
 0x543   : > { %4376 = vmatprep.subr.msk.bf16.mxu1 %vm2034_vm7, %v5438_v13  ;;  %v2150_v1 = vsel %vm2034_vm7, %v5438_v13, 0  ;;  %v1969_v14 = vsel %vm1887_vm9, %v5436_v62, 0.0 }
 0x544   : > { %v5446_v16 = vpop.eup %4557  ;;  %4215 = vmatpush3.bf16.msra.mxu1 %v2150_v1  ;;  %1970 = vadd.xlane.f32.xlu1 %v1969_v14  ;;  %v2305_v14 = vrot.slane %v5256_v32, 4 }
 0x545   : > { %v1981_v18 = vsel %vm1887_vm9, %v5446_v16, 0.0 }
 0x546   : > { %v5448_v17 = vpop.eup %4559  ;;  %v5477_v37 = vpop.permute.xlu1 %1624 }
 0x547   : > { %v1978_v19 = vsel %vm1887_vm9, %v5448_v17, 0.0 }
 0x548   : > { %v5454_v21 = vpop.eup %4561  ;;  %1982 = vadd.xlane.f32.xlu1 %v1981_v18  ;;  %1979 = vadd.xlane.f32.xlu0 %v1978_v19 }
 0x549   : > { %v1993_v24 = vsel %vm1887_vm9, %v5454_v21, 0.0 }
 0x54a   : > { %v5456_v22 = vpop.eup %4563 }
 0x54b   : > { %v1972_v29 = vsel %vm1887_vm9, %v5456_v22, 0.0 }
 0x54c   : > { %v5462_v28 = vpop.eup %4565  ;;  %1994 = vadd.xlane.f32.xlu1 %v1993_v24  ;;  %1973 = vadd.xlane.f32.xlu0 %v1972_v29  ;;  %v2304_v24 = vrot.slane %v5272_v52, 4 }
 0x54d   : > { %v1987_v31 = vsel %vm1887_vm9, %v5462_v28, 0.0 }
 0x54e   : > { %v5479_v40 = vpop.eup %4567 }
 0x54f   : > { %v1990_v8 = vsel %vm1887_vm9, %v5479_v40, 0.0 }
 0x550   : > { %1988 = vadd.xlane.f32.xlu1 %v1987_v31 }
 0x561   : > { %1622 = vrot.lane.b32.xlu1 %v5270_v51, %s4822_s6 }
 0x562   : > { %1615 = vrot.lane.b32.xlu0 %v5270_v51, %s4823_s13 }
 0x565   : > { %1570 = vrot.lane.b32.xlu1 %v5256_v32, %s4821_s30 }
 0x569   : > { %1603 = vrot.lane.b32.xlu1 %v5254_v25, %s4822_s6 }
 0x56d   : > { %1582 = vrot.lane.b32.xlu1 %v5256_v32, %s4822_s6 }
 0x571   : > { %v1968_v36 = vpop.xlane.xlu0 %1967 }
 0x572   : > { %4569 = vrcp.f32 %v1968_v36 }
 0x575   : > { %v1962_v38 = vpop.xlane.xlu0 %1961 }
 0x576   : > { %4571 = vrcp.f32 %v1962_v38 }
 0x577   : > { %v1965_v51 = vpop.xlane.xlu1 %1964 }
 0x578   : > { %4573 = vrcp.f32 %v1965_v51 }
 0x57f   : > { %v4570_v42 = vpop.eup %4569 }
 0x580   : > { %v2010_v46 = vmul.f32 %v4570_v42, %v5405_v27  ;;  %v2439_v42 = vrot.slane %v5301_v10, 4 }
 0x581   : > { %1991 = vadd.xlane.f32.xlu0 %v1990_v8 }
 0x582   : > { %v2021_v50 = vpack.c.bf16 %v2010_v46, %v2010_v46 }
 0x583   : > { %v4572_v43 = vpop.eup %4571 }
 0x584   : > { %v2008_v47 = vmul.f32 %v4572_v43, %v5409_v30 }
 0x585   : > { %v4574_v44 = vpop.eup %4573 }
 0x586   : > { %v2009_v41 = vmul.f32 %v4574_v44, %v5411_v33 }
 0x588   : > { %v2020_v49 = vpack.c.bf16 %v2009_v41, %v2008_v47 }
 0x58a   : > { %4202 = vmatprep.mubr.msk.bf16.mxu0 %vm1887_vm9, %v2020_v49 }
 0x58b   : > { %4203 = vmatmul.mubr.msk.bf16.vlgmr.msra.gmra.mxu0 %vm1887_vm9, %v2021_v50  ;;  %v2436_v50 = vrot.slane %v5321_v20, 4 }
 0x58c   : > { %4207 = vmatpush3.bf16.msra.mxu0 %v2093_v39 }
 0x58d   : > { %4208 = vmatprep.subr.bf16.mxu0 %v1609_v58 }
 0x590   : > { %4209 = vmatpush3.bf16.msra.mxu0 %v1609_v58 }
 0x591   : > { %4377 = vmatprep.subr.msk.bf16.mxu0 %vm2034_vm7, %v5477_v37 }
 0x597   : > { %1591 = vrot.lane.b32.xlu0 %v5254_v25, %s4821_s30 }
 0x59b   : > { %1597 = vrot.lane.b32.xlu0 %v5254_v25, %s4823_s13 }
 0x59f   : > { %1576 = vrot.lane.b32.xlu0 %v5256_v32, %s4823_s13  ;;  %v2320_v32 = vsel %vm1632_vm6, %v2308_v60, 0 }
 0x5c1   : > { %v1977_v27 = vpop.xlane.xlu1 %1976 }
 0x5c9   : > { %v1986_v30 = vpop.xlane.xlu0 %1985 }
 0x5ca   : > { %4575 = vrcp.f32 %v1986_v30 }
 0x5cd   : > { %v1971_v33 = vpop.xlane.xlu1 %1970 }
 0x5d1   : > { %v1983_v56 = vpop.xlane.xlu1 %1982  ;;  %v1980_v45 = vpop.xlane.xlu0 %1979 }
 0x5d2   : > { %4577 = vrcp.f32 %v1983_v56 }
 0x5d3   : > { %4579 = vrcp.f32 %v1980_v45 }
 0x5d4   : > { %4581 = vrcp.f32 %v1977_v27 }
 0x5d5   : > { %4583 = vrcp.f32 %v1971_v33  ;;  %v1974_v57 = vpop.xlane.xlu0 %1973  ;;  %v1995_v63 = vpop.xlane.xlu1 %1994 }
 0x5d6   : > { %4585 = vrcp.f32 %v1974_v57 }
 0x5d7   : > { %v4576_v55 = vpop.eup %4575  ;;  %4587 = vrcp.f32 %v1995_v63 }
 0x5d8   : > { %v2016_v5 = vmul.f32 %v4576_v55, %v5428_v7  ;;  %v2373_v55 = vrot.slane %v5289_v3, 4 }
 0x5d9   : > { %v1616_v48 = vpop.permute.xlu0 %1615  ;;  %v1989_v31 = vpop.xlane.xlu1 %1988 }
 0x5da   : > { %4216 = vmatprep.subr.bf16.mxu1 %v1616_v48  ;;  %v2025_v25 = vpack.c.bf16 %v2016_v5, %v2016_v5  ;;  %4589 = vrcp.f32 %v1989_v31 }
 0x5db   : > { %4217 = vmatpush3.bf16.msra.mxu1 %v1616_v48 }
 0x5dc   : > { %4378 = vmatprep.subr.msk.bf16.mxu1 %vm1632_vm6, %v2308_v60 }
 0x5df   : > { %v4578_v61 = vpop.eup %4577 }
 0x5e0   : > { %v4580_v54 = vpop.eup %4579  ;;  %v2015_v0 = vmul.f32 %v4578_v61, %v5446_v16  ;;  %v2307_v16 = vrot.slane %v5243_v12, 4  ;;  %v2207_v12 = vsel %vm2034_vm7, %v5477_v37, 0 }
 0x5e1   : > { %v4582_v58 = vpop.eup %4581  ;;  %v2014_v9 = vmul.f32 %v4580_v54, %v5448_v17  ;;  %v2306_v17 = vsel %vm2034_vm7, %v2304_v24, %v2305_v14 }
 0x5e2   : > { %v4584_v1 = vpop.eup %4583  ;;  %v2013_v29 = vmul.f32 %v4582_v58, %v5421_v53  ;;  %v2309_v52 = vsel %vm2034_vm7, %v2307_v16, %v2308_v60  ;;  %v2370_v60 = vrot.slane %v5310_v15, 4  ;;  %v2720_v15 = vrot.slane %v5280_v59, 4 }
 0x5e3   : > { %v2024_v18 = vpack.c.bf16 %v2015_v0, %v2014_v9  ;;  %v4586_v19 = vpop.eup %4585  ;;  %v2011_v7 = vmul.f32 %v4584_v1, %v5436_v62  ;;  %v1623_v62 = vpop.permute.xlu1 %1622  ;;  %v2505_v59 = vrot.slane %v5295_v6, 4 }
 0x5e4   : > { %v2012_v34 = vmul.f32 %v4586_v19, %v5456_v22  ;;  %v2023_v35 = vpack.c.bf16 %v2013_v29, %v2013_v29  ;;  %v2317_v22 = vsel %vm1632_vm6, %v2309_v52, 0  ;;  %v4588_v44 = vpop.eup %4587 }
 0x5e5   : > { %4218 = vmatprep.mubr.msk.bf16.mxu1 %vm1887_vm9, %v2024_v18  ;;  %v2019_v10 = vmul.f32 %v4588_v44, %v5454_v21 }
 0x5e6   : > { %4219 = vmatmul.mubr.msk.bf16.vlgmr.msra.gmra.mxu1 %vm1887_vm9, %v2025_v25  ;;  %v2022_v53 = vpack.c.bf16 %v2012_v34, %v2011_v7 }
 0x5e7   : > { %4231 = vmatpush3.bf16.xpose.msra.mxu1 %v2320_v32  ;;  %4234 = vmatprep.mubr.msk.bf16.mxu1 %vm1632_vm6, %v2306_v17  ;;  %v4590_v41 = vpop.eup %4589  ;;  %v1571_v39 = vpop.permute.xlu1 %1570  ;;  %v2027_v20 = vpack.c.bf16 %v2019_v10, %v2019_v10 }
 0x5e8   : > { %4379 = vmatprep.subr.msk.bf16.mxu1 %vm1632_vm6, %v2309_v52  ;;  %4210 = vmatprep.mubr.msk.bf16.mxu0 %vm1887_vm9, %v2022_v53  ;;  %v2017_v56 = vmul.f32 %v4590_v41, %v5462_v28  ;;  %v2371_v57 = vrot.slane %v1571_v39, 4 }
 0x5e9   : > { %4211 = vmatmul.mubr.msk.bf16.vlgmr.msra.gmra.mxu0 %vm1887_vm9, %v2023_v35 }
 0x5ea   : > { %4223 = vmatpush3.bf16.msra.mxu0 %v2207_v12  ;;  %v2372_v28 = vsel %vm2034_vm7, %v2370_v60, %v2371_v57 }
 0x5eb   : > { %4224 = vmatprep.subr.bf16.mxu0 %v1623_v62  ;;  %v1604_v3 = vpop.permute.xlu1 %1603 }
 0x5ec   : > { %v2506_v0 = vrot.slane %v1604_v3, 4 }
 0x5ee   : > { %4225 = vmatpush3.bf16.msra.mxu0 %v1623_v62  ;;  %v2518_v18 = vsel %vm1632_vm6, %v2506_v0, 0  ;;  %v2507_v25 = vsel %vm2034_vm7, %v2505_v59, %v2506_v0 }
 0x5ef   : > { %4233 = vmatpush3.bf16.xpose.msra.mxu1 %v2317_v22  ;;  %v1583_v9 = vpop.permute.xlu1 %1582  ;;  %v2515_v24 = vsel %vm1632_vm6, %v2507_v25, 0 }
 0x5f0   : > { %v2503_v1 = vrot.slane %v1583_v9, 4 }
 0x5f6   : > { %4235 = vmatmul.mubr.msk.bf16.vlgmr.msra.gmra.mxu1 %vm1632_vm6, %v2305_v14  ;;  %v2502_v14 = vrot.slane %v5330_v23, 4 }
 0x5f8   : > { %v2504_v19 = vsel %vm2034_vm7, %v2502_v14, %v2503_v1 }
 0x60a   : > { %v1992_v36 = vpop.xlane.xlu0 %1991 }
 0x60b   : > { %4591 = vrcp.f32 %v1992_v36 }
 0x60e   : > { %v1592_v38 = vpop.permute.xlu0 %1591 }
 0x60f   : > { %v2374_v51 = vrot.slane %v1592_v38, 4 }
 0x611   : > { %4380 = vmatprep.subr.msk.bf16.mxu0 %vm1632_vm6, %v2374_v51  ;;  %v2386_v21 = vsel %vm1632_vm6, %v2374_v51, 0  ;;  %v2375_v63 = vsel %vm2034_vm7, %v2373_v55, %v2374_v51 }
 0x612   : > { %v1598_v8 = vpop.permute.xlu0 %1597  ;;  %v2383_v5 = vsel %vm1632_vm6, %v2375_v63, 0 }
 0x613   : > { %v2440_v43 = vrot.slane %v1598_v8, 4 }
 0x615   : > { %4382 = vmatprep.subr.msk.bf16.mxu1 %vm1632_vm6, %v2440_v43  ;;  %v2452_v46 = vsel %vm1632_vm6, %v2440_v43, 0  ;;  %v2441_v47 = vsel %vm2034_vm7, %v2439_v42, %v2440_v43 }
 0x616   : > { %4247 = vmatpush3.bf16.xpose.msra.mxu1 %v2452_v46  ;;  %v1577_v49 = vpop.permute.xlu0 %1576  ;;  %v2449_v61 = vsel %vm1632_vm6, %v2441_v47, 0 }
 0x617   : > { %v2437_v27 = vrot.slane %v1577_v49, 4  ;;  %4383 = vmatprep.subr.msk.bf16.mxu1 %vm1632_vm6, %v2441_v47 }
 0x618   : > { %v4592_v30 = vpop.eup %4591 }
 0x619   : > { %v2438_v33 = vsel %vm2034_vm7, %v2436_v50, %v2437_v27  ;;  %v2018_v45 = vmul.f32 %v4592_v30, %v5479_v40  ;;  %v2721_v40 = vrot.slane %v5285_v2, 4 }
 0x61a   : > { %4250 = vmatprep.mubr.msk.bf16.mxu1 %vm1632_vm6, %v2438_v33 }
 0x61b   : > { %v2026_v48 = vpack.c.bf16 %v2018_v45, %v2017_v56  ;;  %v2731_v54 = vsel %vm2034_vm7, %v2721_v40, 0  ;;  %v2722_v58 = vsel %vm2034_vm7, %v2720_v15, %v2721_v40 }
 0x61d   : > { %4226 = vmatprep.mubr.msk.bf16.mxu0 %vm1887_vm9, %v2026_v48 }
 0x61e   : > { %4227 = vmatmul.mubr.msk.bf16.vlgmr.msra.gmra.mxu0 %vm1887_vm9, %v2027_v20  ;;  %4249 = vmatpush3.bf16.xpose.msra.mxu1 %v2449_v61 }
 0x61f   : > { %4239 = vmatpush3.bf16.xpose.msra.mxu0 %v2386_v21  ;;  %4242 = vmatprep.mubr.msk.bf16.mxu0 %vm1632_vm6, %v2372_v28 }
 0x620   : > { %4381 = vmatprep.subr.msk.bf16.mxu0 %vm1632_vm6, %v2375_v63  ;;  %4386 = vmatprep.subr.msk.bf16.mxu1 %vm2034_vm7, %v2721_v40 }
 0x625   : > { %4251 = vmatmul.mubr.msk.bf16.vlgmr.msra.gmra.mxu1 %vm1632_vm6, %v2437_v27 }
 0x626   : > { %4263 = vmatpush3.bf16.msra.mxu1 %v2731_v54 }
 0x627   : > { %4241 = vmatpush3.bf16.xpose.msra.mxu0 %v2383_v5  ;;  %4264 = vmatprep.subr.bf16.mxu1 %v2722_v58 }
 0x628   : > { %4384 = vmatprep.subr.msk.bf16.mxu0 %vm1632_vm6, %v2506_v0 }
 0x62a   : > { %4265 = vmatpush3.bf16.msra.mxu1 %v2722_v58 }
 0x62e   : > { %4243 = vmatmul.mubr.msk.bf16.vlgmr.msra.gmra.mxu0 %vm1632_vm6, %v2371_v57 }
 0x62f   : > { %4255 = vmatpush3.bf16.xpose.msra.mxu0 %v2518_v18  ;;  %4258 = vmatprep.mubr.msk.bf16.mxu0 %vm1632_vm6, %v2504_v19 }
 0x630   : > { %4385 = vmatprep.subr.msk.bf16.mxu0 %vm1632_vm6, %v2507_v25 }
 0x637   : > { %4257 = vmatpush3.bf16.xpose.msra.mxu0 %v2515_v24 }
 0x63e   : > { %4259 = vmatmul.mubr.msk.bf16.vlgmr.msra.gmra.mxu0 %vm1632_vm6, %v2503_v1 }
 0x64b   : > { %v5562_v23 = vpop.f32.mrf.mxu0 }
 0x64d   : > { %v5564_v6 = vpop.f32.mrf.mxu0 }
 0x64f   : > { %v4205_v29 = vpop.f32.mrf.mxu0 }
 0x651   : > { %v5568_v16 = vpop.f32.mrf.mxu0 }
 0x6a6   : > { %v5566_v31 = vpop.f32.mrf.mxu1 }
 0x6a8   : > { %v5570_v7 = vpop.f32.mrf.mxu1 }
 0x6a9   : > { %v5572_v34 = vpop.f32.mrf.mxu0 }
 0x6aa   : > { %v4221_v32 = vpop.f32.mrf.mxu1 }
 0x6ab   : > { %v5574_v17 = vpop.f32.mrf.mxu0 }
 0x6ac   : > { %v5576_v52 = vpop.f32.mrf.mxu1 }
 0x6ad   : > { %v4475_v53 = vpack.i.bf16 %v5576_v52, %v5570_v7  ;;  %v4213_v35 = vpop.f32.mrf.mxu0 }
 0x6af   : > { %v5580_v12 = vpop.f32.mrf.mxu0 }
 0x6b0   : > { %v4470_v62 = vpack.i.bf16 %v5580_v12, %v5574_v17 }
 0x6b6   : > { %v4236_v22 = vpop.f32.mrf.mxu1 }
 0x6b7   : > { %v2570_v36 = vsel %vm1631_vm8, %v4236_v22, -1e+30 }
 0x6b8   : > { %v2356_v38 = vpop.f32.mrf.mxu1  ;;  %v2586_v51 = vsel %vm1887_vm9, %v2570_v36, -inf }
 0x6b9   : > { %v2568_v8 = vsel %vm1631_vm8, %v2356_v38, -1e+30  ;;  %2587 = vmax.xlane.f32.xlu0 %v2586_v51 }
 0x6ba   : > { %v4237_v42 = vpop.f32.mrf.mxu1  ;;  %v2580_v44 = vsel %vm1887_vm9, %v2568_v8, -inf }
 0x6bc   : > { %v2359_v43 = vpop.f32.mrf.mxu1 }
 0x6bd   : > { %v2569_v46 = vsel %vm1631_vm8, %v2359_v43, -1e+30  ;;  %2581 = vmax.xlane.f32.xlu0 %v2580_v44 }
 0x6be   : > { %v2583_v47 = vsel %vm1887_vm9, %v2569_v46, -inf }
 0x6bf   : > { %2584 = vmax.xlane.f32.xlu1 %v2583_v47 }
 0x6de   : > { %v5593_v41 = vpop.f32.mrf.mxu0 }
 0x6e0   : > { %v5595_v49 = vpop.f32.mrf.mxu0 }
 0x6e2   : > { %v4229_v50 = vpop.f32.mrf.mxu0 }
 0x6e4   : > { %v5597_v39 = vpop.f32.mrf.mxu0 }
 0x6e5   : > { %v4480_v27 = vpack.i.bf16 %v5597_v39, %v5595_v49  ;;  %v4252_v30 = vpop.f32.mrf.mxu1 }
 0x6e6   : > { %v2576_v0 = vsel %vm1631_vm8, %v4252_v30, -1e+30 }
 0x6e7   : > { %v2488_v10 = vpop.f32.mrf.mxu1  ;;  %v2604_v58 = vsel %vm1887_vm9, %v2576_v0, -inf }
 0x6e8   : > { %v5613_v28 = vsel %vm1631_vm8, %v2488_v10, -1e+30 }
 0x6e9   : > { %v4253_v33 = vpop.f32.mrf.mxu1  ;;  %v2598_v3 = vsel %vm1887_vm9, %v5613_v28, -inf }
 0x6eb   : > { %v2491_v56 = vpop.f32.mrf.mxu1 }
 0x6ec   : > { %v5606_v20 = vsel %vm1631_vm8, %v2491_v56, -1e+30 }
 0x6ed   : > { %v2601_v63 = vsel %vm1887_vm9, %v5606_v20, -inf }
 0x6ee   : > { %v4244_v45 = vpop.f32.mrf.mxu0 }
 0x6ef   : > { %v2573_v57 = vsel %vm1631_vm8, %v4244_v45, -1e+30 }
 0x6f0   : > { %v2422_v48 = vpop.f32.mrf.mxu0  ;;  %v2595_v60 = vsel %vm1887_vm9, %v2573_v57, -inf }
 0x6f1   : > { %v2571_v55 = vsel %vm1631_vm8, %v2422_v48, -1e+30  ;;  %2596 = vmax.xlane.f32.xlu1 %v2595_v60 }
 0x6f2   : > { %v4245_v61 = vpop.f32.mrf.mxu0  ;;  %v2589_v21 = vsel %vm1887_vm9, %v2571_v55, -inf }
 0x6f3   : > { %2590 = vmax.xlane.f32.xlu0 %v2589_v21 }
 0x6f4   : > { %v2425_v40 = vpop.f32.mrf.mxu0 }
 0x6f5   : > { %2602 = vmax.xlane.f32.xlu1 %v2601_v63  ;;  %v5621_v15 = vsel %vm1631_vm8, %v2425_v40, -1e+30 }
 0x6f6   : > { %v2592_v54 = vsel %vm1887_vm9, %v5621_v15, -inf }
 0x6f7   : > { %2599 = vmax.xlane.f32.xlu0 %v2598_v3 }
 0x6fb   : > { %2593 = vmax.xlane.f32.xlu0 %v2592_v54 }
 0x6fe   : > { %v4260_v5 = vpop.f32.mrf.mxu0 }
 0x6ff   : > { %2605 = vmax.xlane.f32.xlu0 %v2604_v58  ;;  %v5636_v18 = vsel %vm1631_vm8, %v4260_v5, -1e+30 }
 0x700   : > { %v2554_v9 = vpop.f32.mrf.mxu0  ;;  %v2613_v29 = vsel %vm1887_vm9, %v5636_v18, -inf }
 0x701   : > { %v5630_v1 = vsel %vm1631_vm8, %v2554_v9, -1e+30 }
 0x702   : > { %v4261_v14 = vpop.f32.mrf.mxu0  ;;  %v2607_v59 = vsel %vm1887_vm9, %v5630_v1, -inf }
 0x703   : > { %2608 = vmax.xlane.f32.xlu1 %v2607_v59 }
 0x704   : > { %v2557_v19 = vpop.f32.mrf.mxu0 }
 0x705   : > { %v5640_v25 = vsel %vm1631_vm8, %v2557_v19, -1e+30 }
 0x706   : > { %v2610_v24 = vsel %vm1887_vm9, %v5640_v25, -inf }
 0x707   : > { %2611 = vmax.xlane.f32.xlu0 %v2610_v24  ;;  %2614 = vmax.xlane.f32.xlu1 %v2613_v29 }
 0x742   : > { %v2588_v32 = vpop.xlane.xlu0 %2587 }
 0x743   : > { %v2618_v35 = vsub.f32 %v2570_v36, %v2588_v32 }
 0x745   : > { %v2632_v22 = vmul.f32 1.442695, %v2618_v35 }
 0x746   : > { %v2582_v38 = vpop.xlane.xlu0 %2581 }
 0x747   : > { %4593 = vpow2.f32 %v2632_v22  ;;  %v2616_v51 = vsub.f32 %v2568_v8, %v2582_v38 }
 0x748   : > { %v2585_v42 = vpop.xlane.xlu1 %2584 }
 0x749   : > { %v2628_v43 = vmul.f32 1.442695, %v2616_v51  ;;  %v2617_v44 = vsub.f32 %v2569_v46, %v2585_v42 }
 0x74b   : > { %4595 = vpow2.f32 %v2628_v43  ;;  %v2630_v26 = vmul.f32 1.442695, %v2617_v44 }
 0x74d   : > { %4597 = vpow2.f32 %v2630_v26 }
 0x754   : > { %v5646_v47 = vpop.eup %4593 }
 0x755   : > { %v2658_v50 = vsel %vm1887_vm9, %v5646_v47, 0.0 }
 0x756   : > { %2659 = vadd.xlane.f32.xlu0 %v2658_v50 }
 0x758   : > { %v5650_v30 = vpop.eup %4595 }
 0x759   : > { %v2652_v36 = vsel %vm1887_vm9, %v5650_v30, 0.0 }
 0x75a   : > { %v5654_v10 = vpop.eup %4597  ;;  %2653 = vadd.xlane.f32.xlu0 %v2652_v36 }
 0x75b   : > { %v2655_v8 = vsel %vm1887_vm9, %v5654_v10, 0.0 }
 0x75c   : > { %2656 = vadd.xlane.f32.xlu1 %v2655_v8 }
 0x77a   : > { %v2597_v46 = vpop.xlane.xlu1 %2596 }
 0x77b   : > { %v2621_v33 = vsub.f32 %v2573_v57, %v2597_v46 }
 0x77c   : > { %v2591_v56 = vpop.xlane.xlu0 %2590 }
 0x77d   : > { %v2638_v45 = vmul.f32 1.442695, %v2621_v33  ;;  %v2619_v48 = vsub.f32 %v2571_v55, %v2591_v56 }
 0x77e   : > { %v2603_v60 = vpop.xlane.xlu1 %2602 }
 0x77f   : > { %4599 = vpow2.f32 %v2638_v45  ;;  %v2634_v61 = vmul.f32 1.442695, %v2619_v48  ;;  %v2623_v21 = vsub.f32 %v5606_v20, %v2603_v60 }
 0x780   : > { %v2600_v40 = vpop.xlane.xlu0 %2599 }
 0x781   : > { %4601 = vpow2.f32 %v2634_v61  ;;  %v2642_v63 = vmul.f32 1.442695, %v2623_v21  ;;  %v2622_v54 = vsub.f32 %v5613_v28, %v2600_v40 }
 0x783   : > { %4603 = vpow2.f32 %v2642_v63  ;;  %v2640_v9 = vmul.f32 1.442695, %v2622_v54 }
 0x784   : > { %v2594_v3 = vpop.xlane.xlu0 %2593 }
 0x785   : > { %v2620_v57 = vsub.f32 %v5621_v15, %v2594_v3 }
 0x787   : > { %v2636_v28 = vmul.f32 1.442695, %v2620_v57  ;;  %v2842_v57 = vrot.slane %v5438_v13, 4 }
 0x788   : > { %v2606_v5 = vpop.xlane.xlu0 %2605 }
 0x789   : > { %v2624_v58 = vsub.f32 %v2576_v0, %v2606_v5 }
 0x78b   : > { %v2644_v14 = vmul.f32 1.442695, %v2624_v58 }
 0x78c   : > { %v5661_v59 = vpop.eup %4599  ;;  %v2609_v55 = vpop.xlane.xlu1 %2608 }
 0x78d   : > { %4605 = vpow2.f32 %v2644_v14  ;;  %v2667_v20 = vsel %vm1887_vm9, %v5661_v59, 0.0  ;;  %v2625_v24 = vsub.f32 %v5630_v1, %v2609_v55 }
 0x78e   : > { %v5665_v19 = vpop.eup %4601  ;;  %2668 = vadd.xlane.f32.xlu1 %v2667_v20  ;;  %4607 = vpow2.f32 %v2640_v9  ;;  %v2781_v9 = vrot.slane %v5432_v11, 4 }
 0x78f   : > { %v2661_v35 = vsel %vm1887_vm9, %v5665_v19, 0.0  ;;  %v2646_v38 = vmul.f32 1.442695, %v2625_v24  ;;  %4609 = vpow2.f32 %v2636_v28 }
 0x790   : > { %v2615_v29 = vpop.xlane.xlu1 %2614  ;;  %v2612_v0 = vpop.xlane.xlu0 %2611 }
 0x791   : > { %v2627_v32 = vsub.f32 %v5636_v18, %v2615_v29  ;;  %v2626_v15 = vsub.f32 %v5640_v25, %v2612_v0  ;;  %v5672_v22 = vpop.eup %4603 }
 0x792   : > { %2662 = vadd.xlane.f32.xlu1 %v2661_v35  ;;  %v2673_v1 = vsel %vm1887_vm9, %v5672_v22, 0.0 }
 0x793   : > { %v2650_v51 = vmul.f32 1.442695, %v2627_v32  ;;  %v2648_v42 = vmul.f32 1.442695, %v2626_v15 }
 0x795   : > { %4611 = vpow2.f32 %v2650_v51 }
 0x796   : > { %4613 = vpow2.f32 %v2646_v38  ;;  %2674 = vadd.xlane.f32.xlu1 %v2673_v1 }
 0x797   : > { %4615 = vpow2.f32 %v2648_v42 }
 0x79a   : > { %v5676_v18 = vpop.eup %4605 }
 0x79b   : > { %v2676_v25 = vsel %vm1887_vm9, %v5676_v18, 0.0  ;;  %v5680_v43 = vpop.eup %4607 }
 0x79c   : > { %2677 = vadd.xlane.f32.xlu0 %v2676_v25  ;;  %v2670_v44 = vsel %vm1887_vm9, %v5680_v43, 0.0  ;;  %v5684_v26 = vpop.eup %4609 }
 0x79d   : > { %v2664_v46 = vsel %vm1887_vm9, %v5684_v26, 0.0 }
 0x7a0   : > { %2671 = vadd.xlane.f32.xlu0 %v2670_v44 }
 0x7a2   : > { %v5686_v50 = vpop.eup %4611 }
 0x7a3   : > { %v5688_v36 = vpop.eup %4613  ;;  %v2685_v8 = vsel %vm1887_vm9, %v5686_v50, 0.0 }
 0x7a4   : > { %v5694_v33 = vpop.eup %4615  ;;  %2686 = vadd.xlane.f32.xlu1 %v2685_v8  ;;  %2665 = vadd.xlane.f32.xlu0 %v2664_v46  ;;  %v2679_v56 = vsel %vm1887_vm9, %v5688_v36, 0.0 }
 0x7a5   : > { %v2682_v45 = vsel %vm1887_vm9, %v5694_v33, 0.0 }
 0x7a8   : > { %2680 = vadd.xlane.f32.xlu1 %v2679_v56  ;;  %2683 = vadd.xlane.f32.xlu0 %v2682_v45 }
 0x7b9   : > { %1619 = vrot.lane.b32.xlu1 %v5285_v2, %s4823_s13 }
 0x7bd   : > { %1626 = vrot.lane.b32.xlu1 %v5285_v2, %s4822_s6  ;;  %s6077_s6 = scalar_lea.vmem %s6013_s16, %s5043_s25  ;;  %s6078_s25 = sld [smem:[#allocation13_spill]] }
 0x7be   : > { %1612 = vrot.lane.b32.xlu0 %v5285_v2, %s4821_s30 }
 0x7c1   : > { %4471 = vrot.lane.b32.xlu1 %v4470_v62, %s4824_s0 }
 0x7c2   : > { %4476 = vrot.lane.b32.xlu0 %v4475_v53, %s4825_s26 }
 0x7c3   : > { %p3983_p3 = scmp.ne.s32.totalorder %s6078_s25, 1 }
 0x7c4   : > { %s6079_s21 = sld [smem:[#allocation31_spill]] (!%p3983_p3) }
 0x7c5   : > { %4481 = vrot.lane.b32.xlu1 %v4480_v27, %s4826_s27  ;;  %s6082_s30 = sld [smem:[#allocation32_spill]] (!%p3983_p3) }
 0x7df   : > { %v2660_v48 = vpop.xlane.xlu0 %2659 }
 0x7e0   : > { %4617 = vrcp.f32 %v2660_v48  ;;  %v4521_v48 = vld [vmem:[%s5084_s8 + $0x8] sm:$0xff]  }
 0x7e3   : > { %v2654_v2 = vpop.xlane.xlu0 %2653 }
 0x7e4   : > { %4619 = vrcp.f32 %v2654_v2  ;;  %v2903_v2 = vrot.slane %v5477_v37, 4 }
 0x7e5   : > { %v2657_v60 = vpop.xlane.xlu1 %2656 }
 0x7e6   : > { %4621 = vrcp.f32 %v2657_v60 }
 0x7ed   : > { %v4618_v17 = vpop.eup %4617 }
 0x7ee   : > { %v2702_v61 = vmul.f32 %v4618_v17, %v5646_v47 }
 0x7f0   : > { %v2713_v21 = vpack.c.bf16 %v2702_v61, %v2702_v61 }
 0x7f1   : > { %v4620_v12 = vpop.eup %4619 }
 0x7f2   : > { %v2700_v7 = vmul.f32 %v4620_v12, %v5650_v30 }
 0x7f3   : > { %v4622_v62 = vpop.eup %4621 }
 0x7f4   : > { %v2701_v52 = vmul.f32 %v4622_v62, %v5654_v10 }
 0x7f6   : > { %v2712_v53 = vpack.c.bf16 %v2701_v52, %v2700_v7 }
 0x7f8   : > { %4266 = vmatprep.mubr.msk.bf16.mxu1 %vm1887_vm9, %v2712_v53 }
 0x7f9   : > { %4267 = vmatmul.mubr.msk.bf16.vlgmr.msra.gmra.mxu1 %vm1887_vm9, %v2713_v21 }
 0x817   : > { %v2669_v49 = vpop.xlane.xlu1 %2668 }
 0x81b   : > { %v2663_v39 = vpop.xlane.xlu1 %2662 }
 0x81f   : > { %v2675_v40 = vpop.xlane.xlu1 %2674 }
 0x820   : > { %4623 = vrcp.f32 %v2675_v40 }
 0x825   : > { %v2678_v27 = vpop.xlane.xlu0 %2677 }
 0x829   : > { %v2672_v63 = vpop.xlane.xlu0 %2671 }
 0x82a   : > { %4625 = vrcp.f32 %v2672_v63 }
 0x82b   : > { %4627 = vrcp.f32 %v2678_v27 }
 0x82c   : > { %4629 = vrcp.f32 %v2669_v49 }
 0x82d   : > { %4631 = vrcp.f32 %v2663_v39  ;;  %v2687_v47 = vpop.xlane.xlu1 %2686  ;;  %v2666_v30 = vpop.xlane.xlu0 %2665 }
 0x82e   : > { %4633 = vrcp.f32 %v2666_v30  ;;  %v4624_v58 = vpop.eup %4623 }
 0x82f   : > { %v2707_v35 = vmul.f32 %v4624_v58, %v5672_v22 }
 0x831   : > { %v2681_v10 = vpop.xlane.xlu1 %2680  ;;  %v2684_v3 = vpop.xlane.xlu0 %2683 }
 0x832   : > { %4635 = vrcp.f32 %v2681_v10 }
 0x833   : > { %4637 = vrcp.f32 %v2684_v3 }
 0x834   : > { %4639 = vrcp.f32 %v2687_v47 }
 0x835   : > { %v1620_v54 = vpop.permute.xlu1 %1619  ;;  %v1613_v5 = vpop.permute.xlu0 %1612 }
 0x836   : > { %v2843_v14 = vrot.slane %v1620_v54, 4  ;;  %v2782_v55 = vrot.slane %v1613_v5, 4 }
 0x837   : > { %v4626_v20 = vpop.eup %4625 }
 0x838   : > { %v4628_v24 = vpop.eup %4627  ;;  %4387 = vmatprep.subr.msk.bf16.mxu0 %vm2034_vm7, %v2782_v55  ;;  %4388 = vmatprep.subr.msk.bf16.mxu1 %vm2034_vm7, %v2843_v14  ;;  %v2792_v28 = vsel %vm2034_vm7, %v2782_v55, 0  ;;  %v2853_v29 = vsel %vm2034_vm7, %v2843_v14, 0  ;;  %v2783_v0 = vsel %vm2034_vm7, %v2781_v9, %v2782_v55  ;;  %v2844_v32 = vsel %vm2034_vm7, %v2842_v57, %v2843_v14 }
 0x839   : > { %v4630_v15 = vpop.eup %4629  ;;  %v1627_v11 = vpop.permute.xlu1 %1626  ;;  %4271 = vmatpush3.bf16.msra.mxu0 %v2792_v28  ;;  %4279 = vmatpush3.bf16.msra.mxu1 %v2853_v29  ;;  %v2706_v13 = vmul.f32 %v4626_v20, %v5680_v43  ;;  %v2708_v42 = vmul.f32 %v4628_v24, %v5676_v18 }
 0x83a   : > { %v4632_v38 = vpop.eup %4631  ;;  %4272 = vmatprep.subr.bf16.mxu0 %v2783_v0  ;;  %4280 = vmatprep.subr.bf16.mxu1 %v2844_v32  ;;  %v2904_v25 = vrot.slane %v1627_v11, 4  ;;  %v2705_v44 = vmul.f32 %v4630_v15, %v5661_v59  ;;  %v4477_v22 = vpop.permute.xlu0 %4476 }
 0x83b   : > { %v2716_v51 = vpack.c.bf16 %v2707_v35, %v2706_v13  ;;  %v4634_v1 = vpop.eup %4633  ;;  %v2703_v46 = vmul.f32 %v4632_v38, %v5665_v19  ;;  %v2717_v59 = vpack.c.bf16 %v2708_v42, %v2708_v42  ;;  %v4479_v7 = vunpack.i.h.bf16 %v4477_v22 }
 0x83c   : > { %v2704_v43 = vmul.f32 %v4634_v1, %v5684_v26  ;;  %v2715_v12 = vpack.c.bf16 %v2705_v44, %v2705_v44  ;;  %v4478_v52 = vunpack.i.l.bf16 %v4477_v22  ;;  %v5789_v44 = vld [vmem:[%s6076_s11] ss:$0 sm:$0xff] }
 0x83d   : > { %4282 = vmatprep.mubr.msk.bf16.mxu1 %vm1887_vm9, %v2716_v51  ;;  %v4472_v8 = vpop.permute.xlu1 %4471  ;;  %4273 = vmatpush3.bf16.msra.mxu0 %v2783_v0 }
 0x83e   : > { %v4474_v56 = vunpack.i.h.bf16 %v4472_v8  ;;  %v4473_v45 = vunpack.i.l.bf16 %v4472_v8  ;;  %4281 = vmatpush3.bf16.msra.mxu1 %v2844_v32  ;;  %4389 = vmatprep.subr.msk.bf16.mxu0 %vm2034_vm7, %v2904_v25  ;;  %v2714_v60 = vpack.c.bf16 %v2704_v43, %v2703_v46  ;;  %v4665_v8 = vld [vmem:[#allocation2] sm:$0xff] }
 0x83f   : > { %v4636_v18 = vpop.eup %4635  ;;  %4294 = vmatprep.subr.bf16.mxu1 %v4819_v4 }
 0x840   : > { %v4638_v17 = vpop.eup %4637  ;;  %v2294_v19 = vsel %vm1632_vm6, %v5568_v16, %v4474_v56  ;;  %v2293_v26 = vsel %vm1632_vm6, %v5564_v6, %v4473_v45  ;;  %v2709_v62 = vmul.f32 %v4636_v18, %v5688_v36  ;;  %4274 = vmatprep.mubr.msk.bf16.mxu0 %vm1887_vm9, %v2714_v60  ;;  %v2914_v6 = vsel %vm2034_vm7, %v2904_v25, 0  ;;  %v4522_v36 = vld [vmem:[%s5084_s8] sm:$0xff]   ;;  %v4666_v56 = vld [vmem:[#allocation2 + $0x8] sm:$0xff]  ;;  %s6080_s8 = sld [smem:[#allocation29_spill]] (!%p3983_p3) }
 0x841   : > { %v4640_v61 = vpop.eup %4639  ;;  %4283 = vmatmul.mubr.msk.bf16.vlgmr.msra.gmra.mxu1 %vm1887_vm9, %v2717_v59  ;;  %v4482_v37 = vpop.permute.xlu1 %4481  ;;  %v2710_v53 = vmul.f32 %v4638_v17, %v5694_v33  ;;  %4275 = vmatmul.mubr.msk.bf16.vlgmr.msra.gmra.mxu0 %vm1887_vm9, %v2715_v12  ;;  %v2905_v16 = vsel %vm2034_vm7, %v2903_v2, %v2904_v25  ;;  %v2297_v39 = vsel %vm2296_vm10, %v2293_v26, %v4478_v52 }
 0x842   : > { %v4484_v21 = vunpack.i.h.bf16 %v4482_v37  ;;  %v4483_v49 = vunpack.i.l.bf16 %v4482_v37  ;;  %4295 = vmatpush3.bf16.msra.mxu1 %v4521_v48  ;;  %v2298_v27 = vsel %vm2296_vm10, %v2294_v19, %v4479_v7  ;;  %4287 = vmatpush3.bf16.msra.mxu0 %v2914_v6  ;;  %v2711_v47 = vmul.f32 %v4640_v61, %v5686_v50 }
 0x843   : > { %v2718_v40 = vpack.c.bf16 %v2710_v53, %v2709_v62  ;;  %4296 = vmatprep.subr.bf16.mxu1 %v4819_v4  ;;  %4288 = vmatprep.subr.bf16.mxu0 %v2905_v16 }
 0x844   : > { %v2300_v33 = vsel %vm1887_vm9, %v2297_v39, %v4483_v49  ;;  %v2301_v63 = vsel %vm1887_vm9, %v2298_v27, %v4484_v21  ;;  %4298 = vmatprep.mubr.msk.bf16.mxu1 %vm4820_vm5, %v4819_v4  ;;  %v2719_v10 = vpack.c.bf16 %v2711_v47, %v2711_v47 }
 0x845   : > { %v3009_v30 = vpack.c.bf16 %v2301_v63, %v2300_v33  ;;  %4290 = vmatprep.mubr.msk.bf16.mxu0 %vm1887_vm9, %v2718_v40 }
 0x846   : > { %4297 = vmatpush3.bf16.msra.mxu1 %v4522_v36  ;;  %4289 = vmatpush3.bf16.msra.mxu0 %v2905_v16 }
 0x847   : > { %4326 = vmatprep.subr.bf16.mxu1 %v4819_v4  ;;  %4310 = vmatprep.subr.bf16.mxu0 %v4819_v4 }
 0x849   : > { %4299 = vmatmul.mubr.msk.bf16.vlgmr.msra.gmra.mxu1 %vm1192_vm4, %v3009_v30  ;;  %4291 = vmatmul.mubr.msk.bf16.vlgmr.msra.gmra.mxu0 %vm1887_vm9, %v2719_v10 }
 0x84a   : > { %4302 = vmatprep.mubr.msk.bf16.mxu1 %vm4820_vm5, %v4819_v4  ;;  %4314 = vmatprep.mubr.msk.bf16.mxu0 %vm4820_vm5, %v4819_v4 }
 0x8b9   : > { %v5771_v50 = vpop.f32.mrf.mxu1 }
 0x8bb   : > { %v2767_v3 = vpop.f32.mrf.mxu1 }
 0x8bd   : > { %v4269_v54 = vpop.f32.mrf.mxu1 }
 0x8bf   : > { %v5773_v5 = vpop.f32.mrf.mxu1 }
 0x901   : > { %v4284_v58 = vpop.f32.mrf.mxu1  ;;  %v4276_v9 = vpop.f32.mrf.mxu0 }
 0x903   : > { %v2889_v57 = vpop.f32.mrf.mxu1  ;;  %v2828_v55 = vpop.f32.mrf.mxu0 }
 0x904   : > { %v4490_v14 = vpack.i.bf16 %v2889_v57, %v5566_v31  ;;  %v4485_v20 = vpack.i.bf16 %v2828_v55, %v5572_v34  ;;  %v4667_v55 = vld [vmem:[#allocation2 + $0x10] sm:$0xff] }
 0x905   : > { %v4285_v24 = vpop.f32.mrf.mxu1  ;;  %v4277_v28 = vpop.f32.mrf.mxu0 }
 0x906   : > { %4491 = vrot.lane.b32.xlu1 %v4490_v14, %s4825_s26  ;;  %4486 = vrot.lane.b32.xlu0 %v4485_v20, %s4824_s0 }
 0x907   : > { %v2892_v29 = vpop.f32.mrf.mxu1  ;;  %v2831_v0 = vpop.f32.mrf.mxu0 }
 0x908   : > { %v4500_v32 = vpack.i.bf16 %v4276_v9, %v2831_v0  ;;  %v4505_v1 = vpack.i.bf16 %v4284_v58, %v2892_v29 }
 0x909   : > { %v3078_v15 = vpop.f32.mrf.mxu1  ;;  %v4292_v11 = vpop.f32.mrf.mxu0 }
 0x90a   : > { %4501 = vrot.lane.b32.xlu1 %v4500_v32, %s4824_s0 }
 0x90b   : > { %v4300_v13 = vpop.f32.mrf.mxu1  ;;  %v2950_v35 = vpop.f32.mrf.mxu0 }
 0x90c   : > { %v4495_v31 = vpack.i.bf16 %v2950_v35, %v5593_v41  ;;  %v3079_v41 = vadd.f32 %v5789_v44, %v3078_v15 }
 0x90d   : > { %v3081_v38 = vpop.f32.mrf.mxu1  ;;  %v4293_v34 = vpop.f32.mrf.mxu0 }
 0x90e   : > { %4496 = vrot.lane.b32.xlu0 %v4495_v31, %s4826_s27  ;;  %v5792_v46 = vadd.f32 %v4665_v8, %v3079_v41  ;;  %v3082_v43 = vadd.f32 %v5789_v44, %v3081_v38 }
 0x90f   : > { %v4301_v51 = vpop.f32.mrf.mxu1  ;;  %v2953_v42 = vpop.f32.mrf.mxu0 }
 0x910   : > { %v4510_v25 = vpack.i.bf16 %v4292_v11, %v2953_v42  ;;  %v3109_v22 = vsel %vm1192_vm4, %v5792_v46, 0.0  ;;  %v5797_v45 = vadd.f32 %v4666_v56, %v3082_v43  ;;  %v4668_v11 = vld [vmem:[#allocation2 + $0x18] sm:$0xff] }
 0x912   : > { %4506 = vrot.lane.b32.xlu0 %v4505_v1, %s4825_s26  ;;  %4511 = vrot.lane.b32.xlu1 %v4510_v25, %s4826_s27  ;;  %v3112_v48 = vsel %vm1192_vm4, %v5797_v45, 0.0  ;;  %v4669_v1 = vld [vmem:[#allocation2 + $0x20] sm:$0xff] }
 0x931   : > { %3110 = vadd.xlane.f32.xlu0 %v3109_v22 }
 0x936   : > { %3113 = vadd.xlane.f32.xlu1 %v3112_v48 }
 0x978   : > { %v4487_v18 = vpop.permute.xlu0 %4486  ;;  %v4492_v2 = vpop.permute.xlu1 %4491 }
 0x979   : > { %v4489_v60 = vunpack.i.h.bf16 %v4487_v18  ;;  %v4488_v59 = vunpack.i.l.bf16 %v4487_v18  ;;  %v4494_v12 = vunpack.i.h.bf16 %v4492_v2  ;;  %v4493_v62 = vunpack.i.l.bf16 %v4492_v2  ;;  %v4670_v18 = vld [vmem:[#allocation2 + $0x28] sm:$0xff] }
 0x97b   : > { %v3000_v17 = vsel %vm1632_vm6, %v2767_v3, %v4489_v60  ;;  %v2295_v19 = vsel %vm1632_vm6, %v5562_v23, %v4488_v59 }
 0x97c   : > { %v4502_v26 = vpop.permute.xlu1 %4501  ;;  %v2299_v21 = vsel %vm2296_vm10, %v2295_v19, %v4493_v62  ;;  %v3003_v49 = vsel %vm2296_vm10, %v3000_v17, %v4494_v12  ;;  %v4523_v19 = vld [vmem:[%s5101_s2 + $0x8] sm:$0xff]  }
 0x97d   : > { %v4504_v37 = vunpack.i.h.bf16 %v4502_v26  ;;  %v4503_v53 = vunpack.i.l.bf16 %v4502_v26  ;;  %4311 = vmatpush3.bf16.msra.mxu0 %v4523_v19  ;;  %v4524_v26 = vld [vmem:[%s5101_s2] sm:$0xff]   ;;  %s6081_s2 = sld [smem:[#allocation30_spill]] (!%p3983_p3) }
 0x97e   : > { %4312 = vmatprep.subr.bf16.mxu0 %v4819_v4 }
 0x97f   : > { %v3002_v47 = vsel %vm1632_vm6, %v5771_v50, %v4504_v37  ;;  %v3001_v30 = vsel %vm1632_vm6, %v5773_v5, %v4503_v53 }
 0x980   : > { %v4497_v61 = vpop.permute.xlu0 %4496 }
 0x981   : > { %v4499_v7 = vunpack.i.h.bf16 %v4497_v61  ;;  %v4498_v52 = vunpack.i.l.bf16 %v4497_v61  ;;  %4313 = vmatpush3.bf16.msra.mxu0 %v4524_v26 }
 0x983   : > { %v2302_v6 = vsel %vm1887_vm9, %v2299_v21, %v4498_v52  ;;  %v3006_v16 = vsel %vm1887_vm9, %v3003_v49, %v4499_v7 }
 0x984   : > { %v3010_v36 = vpack.c.bf16 %v3006_v16, %v2302_v6  ;;  %v4512_v39 = vpop.permute.xlu1 %4511  ;;  %v4507_v27 = vpop.permute.xlu0 %4506 }
 0x985   : > { %v4514_v23 = vunpack.i.h.bf16 %v4512_v39  ;;  %v4513_v40 = vunpack.i.l.bf16 %v4512_v39  ;;  %v4509_v33 = vunpack.i.h.bf16 %v4507_v27  ;;  %v4508_v63 = vunpack.i.l.bf16 %v4507_v27 }
 0x986   : > { %4303 = vmatmul.mubr.msk.bf16.gmra.mxu1 %vm1192_vm4, %v3010_v36 }
 0x987   : > { %v3005_v10 = vsel %vm2296_vm10, %v3002_v47, %v4509_v33  ;;  %v3004_v3 = vsel %vm2296_vm10, %v3001_v30, %v4508_v63  ;;  %4306 = vmatprep.mubr.msk.bf16.mxu1 %vm4820_vm5, %v4819_v4 }
 0x988   : > { %v3007_v54 = vsel %vm1887_vm9, %v3004_v3, %v4513_v40  ;;  %v3008_v58 = vsel %vm1887_vm9, %v3005_v10, %v4514_v23 }
 0x989   : > { %v3011_v9 = vpack.c.bf16 %v3008_v58, %v3007_v54 }
 0x98e   : > { %4307 = vmatmul.mubr.msk.bf16.gmra.mxu1 %vm1192_vm4, %v3011_v9 }
 0x98f   : > { %4342 = vmatprep.mubr.msk.bf16.mxu1 %vm4820_vm5, %v4819_v4 }
 0x9ba   : > { %v3111_v57 = vpop.xlane.xlu0 %3110 }
 0x9bb   : > { %v3127_v28 = vmul.f32 0.03125, %v3111_v57 }
 0x9bd   : > { %v3133_v31 = vsub.f32 %v5792_v46, %v3127_v28 }
 0x9bf   : > { %v3114_v32 = vpop.xlane.xlu1 %3113  ;;  %v3139_v56 = vmul.f32 %v3133_v31, %v3133_v31 }
 0x9c0   : > { %v3128_v38 = vmul.f32 0.03125, %v3114_v32 }
 0x9c1   : > { %v3145_v60 = vsel %vm1192_vm4, %v3139_v56, 0.0 }
 0x9c2   : > { %v3134_v8 = vsub.f32 %v5797_v45, %v3128_v38  ;;  %v4527_v38 = vld [vmem:[%s5111_s23 + $0x28] sm:$0xff]  }
 0x9c4   : > { %v3140_v17 = vmul.f32 %v3134_v8, %v3134_v8 }
 0xa46   : > { %v3086_v50 = vpop.f32.mrf.mxu1 }
 0xa47   : > { %v3087_v5 = vadd.f32 %v5789_v44, %v3086_v50 }
 0xa48   : > { %v4304_v14 = vpop.f32.mrf.mxu1 }
 0xa49   : > { %v5823_v20 = vadd.f32 %v4667_v55, %v3087_v5  ;;  %v5878_v14 = vld [vmem:[%s1038_s5] ss:$0 sm:$0xff] }
 0xa4a   : > { %v3089_v24 = vpop.f32.mrf.mxu1 }
 0xa4b   : > { %v3090_v29 = vadd.f32 %v5789_v44, %v3089_v24  ;;  %v3115_v0 = vsel %vm1192_vm4, %v5823_v20, 0.0 }
 0xa4c   : > { %3116 = vadd.xlane.f32.xlu0 %v3115_v0  ;;  %v4305_v15 = vpop.f32.mrf.mxu1 }
 0xa4d   : > { %v5828_v13 = vadd.f32 %v4668_v11, %v3090_v29  ;;  %v5886_v29 = vld [vmem:[%s6077_s6] ss:$0 sm:$0xff] }
 0xa4e   : > { %v3094_v35 = vpop.f32.mrf.mxu1 }
 0xa4f   : > { %v3095_v34 = vadd.f32 %v5789_v44, %v3094_v35  ;;  %v3118_v51 = vsel %vm1192_vm4, %v5828_v13, 0.0  ;;  %v4525_v35 = vld [vmem:[%s5111_s23 + $0x38] sm:$0xff]  }
 0xa50   : > { %3119 = vadd.xlane.f32.xlu0 %v3118_v51  ;;  %v4308_v42 = vpop.f32.mrf.mxu1  ;;  %4327 = vmatpush3.bf16.msra.mxu1 %v4525_v35  ;;  %v4529_v51 = vld [vmem:[%s5111_s23 + $0x18] sm:$0xff]  }
 0xa51   : > { %v5834_v25 = vadd.f32 %v4669_v1, %v3095_v34  ;;  %4328 = vmatprep.subr.bf16.mxu1 %v4819_v4  ;;  %v4528_v34 = vld [vmem:[%s5111_s23 + $0x20] sm:$0xff]   ;;  %v4530_v42 = vld [vmem:[%s5111_s23 + $0x10] sm:$0xff]   ;;  %v4531_v1 = vld [vmem:[%s5111_s23 + $0x8] sm:$0xff]  }
 0xa52   : > { %v3097_v41 = vpop.f32.mrf.mxu1 }
 0xa53   : > { %v3098_v43 = vadd.f32 %v5789_v44, %v3097_v41  ;;  %v3121_v22 = vsel %vm1192_vm4, %v5834_v25, 0.0  ;;  %v3148_v44 = vsel %vm1192_vm4, %v3140_v17, 0.0  ;;  %v4532_v41 = vld [vmem:[%s5111_s23] sm:$0xff]  }
 0xa54   : > { %3122 = vadd.xlane.f32.xlu0 %v3121_v22  ;;  %v4309_v48 = vpop.f32.mrf.mxu1 }
 0xa55   : > { %v5840_v2 = vadd.f32 %v4670_v18, %v3098_v43 }
 0xa57   : > { %v3124_v59 = vsel %vm1192_vm4, %v5840_v2, 0.0 }
 0xa58   : > { %3146 = vadd.xlane.f32.xlu0 %v3145_v60  ;;  %3125 = vadd.xlane.f32.xlu1 %v3124_v59 }
 0xa5c   : > { %3149 = vadd.xlane.f32.xlu1 %v3148_v44 }
 0xad5   : > { %v3117_v12 = vpop.xlane.xlu0 %3116 }
 0xad6   : > { %v3129_v62 = vmul.f32 0.03125, %v3117_v12 }
 0xad8   : > { %v5850_v61 = vsub.f32 %v5823_v20, %v3129_v62 }
 0xad9   : > { %v3120_v7 = vpop.xlane.xlu0 %3119 }
 0xada   : > { %v3130_v52 = vmul.f32 0.03125, %v3120_v7  ;;  %v3141_v37 = vmul.f32 %v5850_v61, %v5850_v61 }
 0xadc   : > { %v5855_v53 = vsub.f32 %v5828_v13, %v3130_v52  ;;  %v3151_v21 = vsel %vm1192_vm4, %v3141_v37, 0.0 }
 0xadd   : > { %3152 = vadd.xlane.f32.xlu0 %v3151_v21  ;;  %v3123_v49 = vpop.xlane.xlu0 %3122 }
 0xade   : > { %v3131_v6 = vmul.f32 0.03125, %v3123_v49  ;;  %v3142_v16 = vmul.f32 %v5855_v53, %v5855_v53 }
 0xae0   : > { %v5861_v36 = vsub.f32 %v5834_v25, %v3131_v6  ;;  %v3154_v39 = vsel %vm1192_vm4, %v3142_v16, 0.0 }
 0xae1   : > { %v3147_v27 = vpop.xlane.xlu0 %3146  ;;  %3155 = vadd.xlane.f32.xlu1 %v3154_v39  ;;  %v3126_v23 = vpop.xlane.xlu1 %3125 }
 0xae2   : > { %v3163_v40 = vmul.f32 0.03125, %v3147_v27  ;;  %v3132_v33 = vmul.f32 0.03125, %v3126_v23  ;;  %v3143_v63 = vmul.f32 %v5861_v36, %v5861_v36 }
 0xae4   : > { %v3169_v47 = vadd.f32 1e-05, %v3163_v40  ;;  %v5867_v30 = vsub.f32 %v5840_v2, %v3132_v33  ;;  %v3157_v10 = vsel %vm1192_vm4, %v3143_v63, 0.0 }
 0xae5   : > { %3158 = vadd.xlane.f32.xlu0 %v3157_v10  ;;  %v3150_v3 = vpop.xlane.xlu1 %3149 }
 0xae6   : > { %4641 = vrsqrt.f32 %v3169_v47  ;;  %v3164_v54 = vmul.f32 0.03125, %v3150_v3  ;;  %v3144_v58 = vmul.f32 %v5867_v30, %v5867_v30 }
 0xae8   : > { %v3170_v9 = vadd.f32 1e-05, %v3164_v54  ;;  %v3160_v50 = vsel %vm1192_vm4, %v3144_v58, 0.0 }
 0xae9   : > { %3161 = vadd.xlane.f32.xlu1 %v3160_v50 }
 0xaea   : > { %4643 = vrsqrt.f32 %v3170_v9 }
 0xaf3   : > { %v4642_v5 = vpop.eup %4641 }
 0xaf4   : > { %v3181_v57 = vmul.f32 %v4642_v5, %v3133_v31  ;;  %v4526_v31 = vld [vmem:[%s5111_s23 + $0x30] sm:$0xff]  }
 0xaf5   : > { %4329 = vmatpush3.bf16.msra.mxu1 %v4526_v31 }
 0xaf6   : > { %v3193_v28 = vmul.f32 %v5878_v14, %v3181_v57  ;;  %4330 = vmatprep.subr.bf16.mxu1 %v4819_v4 }
 0xaf7   : > { %v4644_v55 = vpop.eup %4643 }
 0xaf8   : > { %v3182_v24 = vmul.f32 %v4644_v55, %v3134_v8  ;;  %v3205_v32 = vadd.f32 %v5886_v29, %v3193_v28 }
 0xaf9   : > { %4331 = vmatpush3.bf16.msra.mxu1 %v4527_v38 }
 0xafa   : > { %v3194_v0 = vmul.f32 %v5878_v14, %v3182_v24  ;;  %4332 = vmatprep.subr.bf16.mxu1 %v4819_v4 }
 0xafc   : > { %v3206_v15 = vadd.f32 %v5886_v29, %v3194_v0 }
 0xafd   : > { %4333 = vmatpush3.bf16.msra.mxu1 %v4528_v34 }
 0xafe   : > { %v3211_v11 = vpack.c.bf16 %v3206_v15, %v3205_v32  ;;  %4334 = vmatprep.subr.bf16.mxu1 %v4819_v4 }
 0xb00   : > { %4315 = vmatmul.mubr.msk.bf16.vlgmr.msra.gmra.mxu0 %vm1192_vm4, %v3211_v11 }
 0xb01   : > { %4318 = vmatprep.mubr.msk.bf16.mxu0 %vm4820_vm5, %v4819_v4  ;;  %4335 = vmatpush3.bf16.msra.mxu1 %v4529_v51 }
 0xb02   : > { %4336 = vmatprep.subr.bf16.mxu1 %v4819_v4 }
 0xb05   : > { %4337 = vmatpush3.bf16.msra.mxu1 %v4530_v42 }
 0xb06   : > { %4338 = vmatprep.subr.bf16.mxu1 %v4819_v4 }
 0xb09   : > { %4339 = vmatpush3.bf16.msra.mxu1 %v4531_v1 }
 0xb0a   : > { %4340 = vmatprep.subr.bf16.mxu1 %v4819_v4 }
 0xb0d   : > { %4341 = vmatpush3.bf16.msra.mxu1 %v4532_v41 }
 0xb66   : > { %v3153_v8 = vpop.xlane.xlu0 %3152 }
 0xb67   : > { %v3165_v43 = vmul.f32 0.03125, %v3153_v8 }
 0xb69   : > { %v3171_v22 = vadd.f32 1e-05, %v3165_v43 }
 0xb6a   : > { %v3156_v56 = vpop.xlane.xlu1 %3155 }
 0xb6b   : > { %4645 = vrsqrt.f32 %v3171_v22  ;;  %v3166_v48 = vmul.f32 0.03125, %v3156_v56 }
 0xb6d   : > { %v3172_v18 = vadd.f32 1e-05, %v3166_v48 }
 0xb6e   : > { %v3159_v60 = vpop.xlane.xlu0 %3158 }
 0xb6f   : > { %4647 = vrsqrt.f32 %v3172_v18  ;;  %v3167_v59 = vmul.f32 0.03125, %v3159_v60 }
 0xb71   : > { %v3173_v17 = vadd.f32 1e-05, %v3167_v59 }
 0xb72   : > { %v3162_v44 = vpop.xlane.xlu1 %3161 }
 0xb73   : > { %4649 = vrsqrt.f32 %v3173_v17  ;;  %v3168_v19 = vmul.f32 0.03125, %v3162_v44 }
 0xb75   : > { %v3174_v26 = vadd.f32 1e-05, %v3168_v19 }
 0xb77   : > { %4651 = vrsqrt.f32 %v3174_v26 }
 0xb78   : > { %v4646_v12 = vpop.eup %4645 }
 0xb79   : > { %v3183_v62 = vmul.f32 %v4646_v12, %v5850_v61 }
 0xb7b   : > { %v3195_v37 = vmul.f32 %v5878_v14, %v3183_v62 }
 0xb7c   : > { %v4648_v7 = vpop.eup %4647 }
 0xb7d   : > { %v3184_v52 = vmul.f32 %v4648_v7, %v5855_v53  ;;  %v3207_v6 = vadd.f32 %v5886_v29, %v3195_v37 }
 0xb7f   : > { %v3196_v21 = vmul.f32 %v5878_v14, %v3184_v52 }
 0xb80   : > { %v4650_v49 = vpop.eup %4649 }
 0xb81   : > { %v3208_v16 = vadd.f32 %v5886_v29, %v3196_v21  ;;  %v3185_v39 = vmul.f32 %v4650_v49, %v5861_v36  ;;  %v3968_v36 = vld [vmem:[%s1049_s7] ss:$0 sm:$0xff] }
 0xb83   : > { %v3212_v27 = vpack.c.bf16 %v3208_v16, %v3207_v6  ;;  %v3197_v53 = vmul.f32 %v5878_v14, %v3185_v39 }
 0xb84   : > { %v4652_v23 = vpop.eup %4651 }
 0xb85   : > { %4319 = vmatmul.mubr.msk.bf16.gmra.mxu0 %vm1192_vm4, %v3212_v27  ;;  %v3186_v61 = vmul.f32 %v4652_v23, %v5867_v30  ;;  %v3209_v33 = vadd.f32 %v5886_v29, %v3197_v53 }
 0xb86   : > { %4322 = vmatprep.mubr.msk.bf16.mxu0 %vm4820_vm5, %v4819_v4 }
 0xb87   : > { %v3198_v40 = vmul.f32 %v5878_v14, %v3186_v61 }
 0xb89   : > { %v3210_v63 = vadd.f32 %v5886_v29, %v3198_v40 }
 0xb8b   : > { %v3213_v47 = vpack.c.bf16 %v3210_v63, %v3209_v33 }
 0xb8d   : > { %4323 = vmatmul.mubr.msk.bf16.gmra.mxu0 %vm1192_vm4, %v3213_v47 }
 0xbc0   : > { %v3280_v30 = vpop.f32.mrf.mxu0 }
 0xbc1   : > { %v3281_v10 = vadd.f32 %v3968_v36, %v3280_v30 }
 0xbc2   : > { %v4316_v3 = vpop.f32.mrf.mxu0 }
 0xbc3   : > { %v3309_v54 = vmul.f32 0.044715, %v3281_v10  ;;  %v3303_v31 = vmul.f32 0.5, %v3281_v10 }
 0xbc4   : > { %v3283_v58 = vpop.f32.mrf.mxu0 }
 0xbc5   : > { %v3315_v9 = vmul.f32 %v3309_v54, %v3281_v10  ;;  %v3284_v50 = vadd.f32 %v3968_v36, %v3283_v58 }
 0xbc6   : > { %v4317_v5 = vpop.f32.mrf.mxu0 }
 0xbc7   : > { %v3321_v57 = vmul.f32 %v3315_v9, %v3281_v10  ;;  %v3310_v14 = vmul.f32 0.044715, %v3284_v50  ;;  %v3304_v38 = vmul.f32 0.5, %v3284_v50 }
 0xbc9   : > { %v3327_v55 = vadd.f32 %v3321_v57, %v3281_v10  ;;  %v3316_v24 = vmul.f32 %v3310_v14, %v3284_v50 }
 0xbcb   : > { %v3333_v28 = vmul.f32 0.7978846, %v3327_v55  ;;  %v3322_v29 = vmul.f32 %v3316_v24, %v3284_v50 }
 0xbcd   : > { %4653 = vtanh.f32 %v3333_v28  ;;  %v3328_v0 = vadd.f32 %v3322_v29, %v3284_v50 }
 0xbcf   : > { %v3334_v32 = vmul.f32 0.7978846, %v3328_v0 }
 0xbd1   : > { %4655 = vtanh.f32 %v3334_v32 }
 0xbda   : > { %v4654_v15 = vpop.eup %4653 }
 0xbdb   : > { %v3345_v11 = vadd.f32 1.0, %v4654_v15 }
 0xbdd   : > { %v3351_v51 = vmul.f32 %v3345_v11, %v3303_v31 }
 0xbde   : > { %v4656_v35 = vpop.eup %4655 }
 0xbdf   : > { %v3346_v34 = vadd.f32 1.0, %v4656_v35  ;;  %v3974_v35 = vld [vmem:[%s1057_s3] ss:$0 sm:$0xff] }
 0xbe1   : > { %v3352_v42 = vmul.f32 %v3346_v34, %v3304_v38 }
 0xbe3   : > { %v3357_v1 = vpack.c.bf16 %v3352_v42, %v3351_v51 }
 0xbe5   : > { %4343 = vmatmul.mubr.bf16.vlgmr.msra.gmra.mxu1 %v3357_v1 }
 0xbe6   : > { %4346 = vmatprep.mubr.msk.bf16.mxu1 %vm4820_vm5, %v4819_v4 }
 0xc45   : > { %v3288_v41 = vpop.f32.mrf.mxu0 }
 0xc46   : > { %v3289_v8 = vadd.f32 %v3968_v36, %v3288_v41 }
 0xc47   : > { %v4320_v43 = vpop.f32.mrf.mxu0 }
 0xc48   : > { %v3311_v22 = vmul.f32 0.044715, %v3289_v8  ;;  %v3305_v58 = vmul.f32 0.5, %v3289_v8 }
 0xc49   : > { %v3291_v56 = vpop.f32.mrf.mxu0 }
 0xc4a   : > { %v3317_v48 = vmul.f32 %v3311_v22, %v3289_v8  ;;  %v3292_v18 = vadd.f32 %v3968_v36, %v3291_v56 }
 0xc4b   : > { %v4321_v60 = vpop.f32.mrf.mxu0 }
 0xc4c   : > { %v3323_v59 = vmul.f32 %v3317_v48, %v3289_v8  ;;  %v3312_v17 = vmul.f32 0.044715, %v3292_v18 }
 0xc4d   : > { %v3296_v44 = vpop.f32.mrf.mxu0 }
 0xc4e   : > { %v3318_v19 = vmul.f32 %v3312_v17, %v3292_v18  ;;  %v3297_v26 = vadd.f32 %v3968_v36, %v3296_v44  ;;  %v3329_v12 = vadd.f32 %v3323_v59, %v3289_v8 }
 0xc4f   : > { %v4324_v62 = vpop.f32.mrf.mxu0 }
 0xc50   : > { %v3324_v7 = vmul.f32 %v3318_v19, %v3292_v18  ;;  %v3313_v52 = vmul.f32 0.044715, %v3297_v26  ;;  %v3335_v37 = vmul.f32 0.7978846, %v3329_v12  ;;  %v3307_v28 = vmul.f32 0.5, %v3297_v26 }
 0xc51   : > { %v3299_v21 = vpop.f32.mrf.mxu0 }
 0xc52   : > { %v3319_v49 = vmul.f32 %v3313_v52, %v3297_v26  ;;  %v3300_v6 = vadd.f32 %v3968_v36, %v3299_v21  ;;  %v3330_v16 = vadd.f32 %v3324_v7, %v3292_v18  ;;  %4657 = vtanh.f32 %v3335_v37 }
 0xc53   : > { %v4325_v39 = vpop.f32.mrf.mxu0  ;;  %v3306_v36 = vmul.f32 0.5, %v3292_v18 }
 0xc54   : > { %v3325_v27 = vmul.f32 %v3319_v49, %v3297_v26  ;;  %v3314_v23 = vmul.f32 0.044715, %v3300_v6  ;;  %v3336_v61 = vmul.f32 0.7978846, %v3330_v16  ;;  %v3308_v29 = vmul.f32 0.5, %v3300_v6 }
 0xc56   : > { %v3320_v53 = vmul.f32 %v3314_v23, %v3300_v6  ;;  %4659 = vtanh.f32 %v3336_v61  ;;  %v3331_v40 = vadd.f32 %v3325_v27, %v3297_v26 }
 0xc58   : > { %v3326_v33 = vmul.f32 %v3320_v53, %v3300_v6  ;;  %v3337_v63 = vmul.f32 0.7978846, %v3331_v40 }
 0xc5a   : > { %v3332_v47 = vadd.f32 %v3326_v33, %v3300_v6  ;;  %4661 = vtanh.f32 %v3337_v63 }
 0xc5c   : > { %v3338_v30 = vmul.f32 0.7978846, %v3332_v47 }
 0xc5e   : > { %4663 = vtanh.f32 %v3338_v30 }
 0xc5f   : > { %v4658_v10 = vpop.eup %4657 }
 0xc60   : > { %v3347_v3 = vadd.f32 1.0, %v4658_v10 }
 0xc62   : > { %v3353_v50 = vmul.f32 %v3347_v3, %v3305_v58 }
 0xc63   : > { %v4660_v54 = vpop.eup %4659 }
 0xc64   : > { %v3348_v9 = vadd.f32 1.0, %v4660_v54 }
 0xc66   : > { %v3354_v5 = vmul.f32 %v3348_v9, %v3306_v36 }
 0xc67   : > { %v4662_v57 = vpop.eup %4661 }
 0xc68   : > { %v3358_v14 = vpack.c.bf16 %v3354_v5, %v3353_v50  ;;  %v3349_v55 = vadd.f32 1.0, %v4662_v57 }
 0xc6a   : > { %4347 = vmatmul.mubr.bf16.gmra.mxu1 %v3358_v14  ;;  %v3355_v32 = vmul.f32 %v3349_v55, %v3307_v28 }
 0xc6b   : > { %v4664_v24 = vpop.eup %4663  ;;  %4350 = vmatprep.mubr.msk.bf16.mxu1 %vm4820_vm5, %v4819_v4 }
 0xc6c   : > { %v3350_v0 = vadd.f32 1.0, %v4664_v24 }
 0xc6e   : > { %v3356_v15 = vmul.f32 %v3350_v0, %v3308_v29 }
 0xc70   : > { %v3359_v11 = vpack.c.bf16 %v3356_v15, %v3355_v32 }
 0xc72   : > { %4351 = vmatmul.mubr.bf16.gmra.mxu1 %v3359_v11 }
 0xca5   : > { %v3465_v31 = vpop.f32.mrf.mxu1 }
 0xca6   : > { %v3466_v38 = vadd.f32 %v3974_v35, %v3465_v31 }
 0xca7   : > { %v4344_v34 = vpop.f32.mrf.mxu1 }
 0xca8   : > { %v3488_v51 = vadd.f32 %v3466_v38, %v5792_v46 }
 0xca9   : > { %v3468_v42 = vpop.f32.mrf.mxu1 }
 0xcaa   : > { %3494 = vst.msk [vmem:[#allocation2] sm:$0xff] %vm1192_vm4, %v3488_v51  ;;  %v3469_v4 = vadd.f32 %v3974_v35, %v3468_v42 }
 0xcab   : > { %v4345_v1 = vpop.f32.mrf.mxu1 }
 0xcac   : > { %v3489_v41 = vadd.f32 %v3469_v4, %v5797_v45 }
 0xcae   : > { %3495 = vst.msk [vmem:[#allocation2 + $0x8] sm:$0xff] %vm1192_vm4, %v3489_v41 }
 0xd2a   : > { %v3473_v8 = vpop.f32.mrf.mxu1 }
 0xd2b   : > { %v3474_v43 = vadd.f32 %v3974_v35, %v3473_v8 }
 0xd2c   : > { %v4348_v22 = vpop.f32.mrf.mxu1 }
 0xd2d   : > { %v3490_v56 = vadd.f32 %v3474_v43, %v5823_v20 }
 0xd2e   : > { %v3476_v48 = vpop.f32.mrf.mxu1 }
 0xd2f   : > { %3496 = vst.msk [vmem:[#allocation2 + $0x10] sm:$0xff] %vm1192_vm4, %v3490_v56  ;;  %v3477_v18 = vadd.f32 %v3974_v35, %v3476_v48 }
 0xd30   : > { %v4349_v60 = vpop.f32.mrf.mxu1 }
 0xd31   : > { %v3491_v46 = vadd.f32 %v3477_v18, %v5828_v13 }
 0xd32   : > { %v3481_v59 = vpop.f32.mrf.mxu1 }
 0xd33   : > { %3497 = vst.msk [vmem:[#allocation2 + $0x18] sm:$0xff] %vm1192_vm4, %v3491_v46  ;;  %v3482_v17 = vadd.f32 %v3974_v35, %v3481_v59 }
 0xd34   : > { %v4352_v44 = vpop.f32.mrf.mxu1 }
 0xd35   : > { %v3492_v45 = vadd.f32 %v3482_v17, %v5834_v25 }
 0xd36   : > { %v3484_v19 = vpop.f32.mrf.mxu1 }
 0xd37   : > { %3498 = vst.msk [vmem:[#allocation2 + $0x20] sm:$0xff] %vm1192_vm4, %v3492_v45  ;;  %v3485_v26 = vadd.f32 %v3974_v35, %v3484_v19  ;;  %3503 = sbr.rel (%p3983_p3) target bundleno = 3914 (0xf4a), region = 140 }
 0xd38   : > { %v4353_v12 = vpop.f32.mrf.mxu1 }
 0xd39   : > { %v3493_v20 = vadd.f32 %v3485_v26, %v5840_v2 }
 0xd3b   : > { %3499 = vst.msk [vmem:[#allocation2 + $0x28] sm:$0xff] %vm1192_vm4, %v3493_v20 }
 0xd3c   : > { %v3508_v13 = vrot.slane %v3491_v46, 7  ;;  %vm3509_vm11 = vcmask 1041409   ;;  %vm3512_vm12 = vcmask 254976   ;;  %v4671_v23 = vld [vmem:[%s6079_s21 + $0x8] sm:$0xff]   ;;  %v4827_v61 = vmov 0.0   ;;  %v4672_v53 = vld [vmem:[%s6079_s21] sm:$0xff]  }
 0xd3d   : > { %4354 = vmatprep.subr.bf16.mxu0 %v4827_v61  ;;  %vm4828_vm13 = vmmov 0   ;;  %v3984_v30 = vld [vmem:[%s6080_s8] ss:$0 sm:$0xff]  ;;  %vm3633_vm14 = vcmask 33792  }
 0xd3e   : > { %v3510_v62 = vsel %vm3509_vm11, %v3508_v13, %v3488_v51  ;;  %4358 = vmatprep.mubr.msk.bf16.mxu0 %vm4828_vm13, %v4827_v61  ;;  %4355 = vmatpush3.bf16.msra.mxu0 %v4671_v23  ;;  %v3985_v54 = vld [vmem:[%s6081_s2] ss:$0 sm:$0xff] }
 0xd3f   : > { %v3513_v7 = vsel %vm3512_vm12, %v3510_v62, 0.0  ;;  %4356 = vmatprep.subr.bf16.mxu0 %v4827_v61  ;;  %v3986_v32 = vld [vmem:[%s6082_s30] ss:$0 sm:$0xff] }
 0xd40   : > { %3514 = vadd.xlane.f32.xlu0 %v3513_v7 }
 0xd42   : > { %4357 = vmatpush3.bf16.msra.mxu0 %v4672_v53 }
 0xdc9   : > { %v3515_v25 = vpop.xlane.xlu0 %3514 }
 0xdca   : > { %v3516_v52 = vmul.f32 0.03125, %v3515_v25 }
 0xdcc   : > { %v3518_v37 = vrot.slane %v3516_v52, 1  ;;  %v3521_v21 = vsub.f32 %v3488_v51, %v3516_v52 }
 0xdce   : > { %v3522_v49 = vsub.f32 %v3491_v46, %v3518_v37  ;;  %v3523_v16 = vmul.f32 %v3521_v21, %v3521_v21 }
 0xdd0   : > { %v3524_v6 = vmul.f32 %v3522_v49, %v3522_v49 }
 0xdd2   : > { %v3527_v2 = vrot.slane %v3524_v6, 7 }
 0xdd4   : > { %v3528_v39 = vsel %vm3509_vm11, %v3527_v2, %v3523_v16 }
 0xdd5   : > { %v3530_v27 = vsel %vm3512_vm12, %v3528_v39, 0.0 }
 0xdd6   : > { %3531 = vadd.xlane.f32.xlu0 %v3530_v27 }
 0xe5f   : > { %v3532_v40 = vpop.xlane.xlu0 %3531 }
 0xe60   : > { %v3533_v33 = vmul.f32 0.03125, %v3532_v40 }
 0xe62   : > { %v3534_v63 = vadd.f32 1e-05, %v3533_v33 }
 0xe64   : > { %4673 = vrsqrt.f32 %v3534_v63 }
 0xe71   : > { %v4674_v47 = vpop.eup %4673 }
 0xe72   : > { %v3537_v10 = vrot.slane %v4674_v47, 1  ;;  %v3540_v3 = vmul.f32 %v4674_v47, %v3521_v21 }
 0xe74   : > { %v3541_v58 = vmul.f32 %v3537_v10, %v3522_v49  ;;  %v3548_v36 = vmul.f32 %v3984_v30, %v3540_v3 }
 0xe76   : > { %v3549_v9 = vmul.f32 %v3984_v30, %v3541_v58  ;;  %v3556_v50 = vadd.f32 %v3985_v54, %v3548_v36 }
 0xe78   : > { %v3557_v5 = vadd.f32 %v3985_v54, %v3549_v9  ;;  %v3558_v57 = vpack.c.bf16 %v3556_v50, %v3556_v50 }
 0xe7a   : > { %v3559_v14 = vpack.c.bf16 %v3557_v5, %v3557_v5  ;;  %v3573_v24 = vunpack.c.l.b16 %v3558_v57 }
 0xe7c   : > { %v3574_v55 = vunpack.c.l.b16 %v3559_v14 }
 0xe7e   : > { %v3575_v28 = vrot.slane %v3574_v55, 7 }
 0xe80   : > { %v3576_v29 = vsel %vm3509_vm11, %v3575_v28, %v3573_v24 }
 0xe81   : > { %v3577_v0 = vpack.c.b16 %v3576_v29, %v3576_v29 }
 0xe83   : > { %4359 = vmatmul.mubr.msk.bf16.vlgmr.msra.gmra.mxu0 %vm1192_vm4, %v3577_v0 }
 0xf43   : > { %v3627_v15 = vpop.f32.mrf.mxu0 }
 0xf44   : > { %v3628_v11 = vadd.f32 %v3986_v32, %v3627_v15 }
 0xf45   : > { %v4360_v35 = vpop.f32.mrf.mxu0 }
 0xf46   : > { %3634 = vst.msk [vmem:[#allocation9] sm:$0x3] %vm3633_vm14, %v3628_v11 }
 0xf47   : > { %v3630_v31 = vpop.f32.mrf.mxu0 }
 0xf49   : > { %v4361_v38 = vpop.f32.mrf.mxu0 }
 0xf4a PF: > { %s6083_s6 = sld [smem:[#allocation15_spill]]  ;;  %s4829_s7 = smov [#allocation9]  }
 0xf4b   : > { %s3644_s13 = sshll.u32 %s4829_s7, 4  ;;  %s3645_s13 = int_to_ptr.vmem [resolvable:$true] %s3644_s13 }
 0xf4c   : > { %s4753_s25 = scalar_lea.vmem %s3645_s13, 32  ;;  %p4760_p6 = scmp.lt.s32.totalorder %s3645_s13, %s3645_s13 }
 0xf4d   : > { %p4754_p10 = scmp.ne.s32.totalorder %s3645_s13, %s4753_s25  ;;  %p4761_p13 = scmp.lt.s32.totalorder %s4753_s25, %s4753_s25 }
 0xf4f   : > { %p4762_p0 = por %p4761_p13, %p4760_p6 }
 0xf50   : > { %s6084_s5 = sadd.s32 4294967295, %s6083_s6  }
 0xf51   : > { %p5973_p5 = scmp.eq.s32.totalorder %s6084_s5, 1 }
 0xf53   : > { %p4755_p11 = pnand %p4754_p10, %p5973_p5 }
 0xf55   : > { %p4756_p12 = pneg %p4755_p11 }
 0xf57   : > { %p4763_p1 = pnand %p4762_p0, %p4756_p12 }
 0xf59   : > { %4766 = shalt.err (!%p4763_p1)
}
 0xf5a   : > { %s6086_s22 = sld [smem:[#allocation33_spill]] }
 0xf60   : > { %4403 = dma.vmem_to_hbm [thread:$0]  (%p5973_p5), %s3645_s13, 32, %s6086_s22, [#allocation5]  }
 0xf61   : > { %4798 = dma.done.wait (%p5973_p5), [#allocation5], 32  }
 0xf62   : > { %4800 = vsyncadd (%p5973_p5), [#allocation5], 4294967264 }
 0xf63 PF: > { %s6087_s0 = sld [smem:[#allocation15_spill]] }
 0xf64   : > { %s6088_s29 = sld [smem:[#allocation14_spill]] }
 0xf65   : > { %s6089_s2 = sld [smem:[#allocation16_spill]] }
 0xf69   : > { %s38_s6 = sadd.s32 1, %s6087_s0  }
 0xf6a   : > { %p35_p4 = scmp.ge.s32.totalorder %s38_s6, 4  }
 0xf6c   :  { %37 = sbr.rel (!%p35_p4) target bundleno = 22 (0x16), region = 215 }
 0xf71   :  { %3657 = vsyncpa [#allocation4], 1 }
 0xf72   :  { %3659 = vsyncpa [#allocation4 + $0x1], 1 }
 0xf73   :  { %3660 = vsyncpa [#allocation7], 1 }
 0xf74   :  { %3661 = vsyncpa [#allocation5], 1 }
 0xf75   :  { %3663 = vsyncpa [#allocation5 + $0x1], 1 }

</bundles_post_ra>
